<compile_context>
chip_gen: v6e
topology: v6e:2x2x1
jax: 0.10.0
libtpu: 0.0.40
codegen_flags: <defaults>
</compile_context>

<pallas_src>
import functools

import jax
import jax.numpy as jnp
from jax.experimental import pallas as pl
from jax.experimental.pallas import tpu as pltpu


# ------------------------------ helpers --------------------------------------
def _round_up(x, m):
    return ((x + m - 1) // m) * m


# ----------------------------- Pallas kernel ----------------------------------
def _matmul_bias_act_kernel(x_ref, w_ref, b_ref, o_ref, *, apply_relu):
    # Full-K, full-N per grid step: a single MXU dot plus f32 epilogue.
    out = jnp.dot(x_ref[...], w_ref[...], preferred_element_type=jnp.float32)
    out = out + b_ref[...]                       # f32 bias add
    if apply_relu:
        out = jnp.maximum(out, 0.0)
    o_ref[...] = out.astype(o_ref.dtype)


def pallas_matmul_bias(x, w, b, *, apply_relu, out_dtype):
    """act(x @ w + b) with x:(M,K), w:(K,N), b:(N,).

    Operands are cast to bf16 for the MXU; accumulation, bias and ReLU are f32.
    K and N are never padded (full-extent blocks); only M is padded, to a
    multiple of 16 (bf16 sublane packing), and tiled at <= 512 rows.
    """
    M, K = x.shape
    K2, N = w.shape
    assert K == K2 and b.shape == (N,)

    tm = 512 if M > 512 else _round_up(M, 16)
    m_pad = _round_up(M, tm)

    x_p = x.astype(jnp.bfloat16)
    if m_pad != M:
        x_p = jnp.pad(x_p, ((0, m_pad - M), (0, 0)))
    w_p = w.astype(jnp.bfloat16)
    b_p = b.astype(jnp.float32).reshape(1, N)

    grid = (m_pad // tm,)
    kernel = functools.partial(_matmul_bias_act_kernel, apply_relu=apply_relu)

    out = pl.pallas_call(
        kernel,
        out_shape=jax.ShapeDtypeStruct((m_pad, N), out_dtype),
        grid_spec=pltpu.PrefetchScalarGridSpec(
            num_scalar_prefetch=0,
            grid=grid,
            in_specs=[
                pl.BlockSpec((tm, K), lambda i: (i, 0)),   # K = full extent
                pl.BlockSpec((K, N), lambda i: (0, 0)),    # whole weight
                pl.BlockSpec((1, N), lambda i: (0, 0)),    # bias row
            ],
            out_specs=pl.BlockSpec((tm, N), lambda i: (i, 0)),
        ),
        compiler_params=pltpu.CompilerParams(
            dimension_semantics=("parallel",),
            vmem_limit_bytes=32 * 1024 * 1024,
        ),
        cost_estimate=pl.CostEstimate(
            flops=2 * m_pad * N * K,
            transcendentals=0,
            bytes_accessed=(
                m_pad * K * 2 + K * N * 2 + N * 4
                + m_pad * N * jnp.dtype(out_dtype).itemsize
            ),
        ),
    )(x_p, w_p, b_p)

    if m_pad != M:
        out = out[:M]
    return out


# ------------------------------ JAX glue (NHWC) -------------------------------
def im2col_nhwc(x, kh, kw, stride):
    """x: (N, H, W, C) -> (N*OH*OW, KH*KW*C), column order (kh, kw, c)."""
    # TODO(synk): fuse this gather into the Pallas kernel (shift-and-accumulate)
    # to avoid the KH*KW activation inflation in HBM.
    n, h, w, c = x.shape
    oh = (h - kh) // stride + 1
    ow = (w - kw) // stride + 1
    cols = []
    for i in range(kh):
        for j in range(kw):
            cols.append(
                x[:, i : i + stride * oh : stride, j : j + stride * ow : stride, :]
            )
    p = jnp.concatenate(cols, axis=-1)           # (N, OH, OW, KH*KW*C), c fastest
    return p.reshape(n * oh * ow, kh * kw * c), oh, ow


def conv2d_relu_nhwc(x, weight, bias, stride, apply_relu=True):
    """x: NHWC (bf16), weight: (Cout, Cin, KH, KW) [PyTorch layout]. Returns NHWC bf16."""
    n = x.shape[0]
    cout, cin, kh, kw = weight.shape
    patches, oh, ow = im2col_nhwc(x, kh, kw, stride)        # (N*OH*OW, KH*KW*Cin)
    w_mat = jnp.transpose(weight, (2, 3, 1, 0)).reshape(kh * kw * cin, cout)
    out = pallas_matmul_bias(
        patches, w_mat, bias, apply_relu=apply_relu, out_dtype=jnp.bfloat16
    )
    return out.reshape(n, oh, ow, cout)                     # NHWC bf16


# ------------------------------ Model -----------------------------------------
def init_params(key, in_channels=1):
    ks = jax.random.split(key, 8)

    def uinit(k, shape, fan_in):
        bound = 1.0 / jnp.sqrt(fan_in)
        return jax.random.uniform(k, shape, jnp.float32, -bound, bound)

    p = {}
    p["conv1_w"] = uinit(ks[0], (64, in_channels, 8, 8), in_channels * 8 * 8)
    p["conv1_b"] = uinit(ks[1], (64,), in_channels * 8 * 8)
    p["conv2_w"] = uinit(ks[2], (128, 64, 6, 6), 64 * 6 * 6)
    p["conv2_b"] = uinit(ks[3], (128,), 64 * 6 * 6)
    p["conv3_w"] = uinit(ks[4], (128, 128, 5, 5), 128 * 5 * 5)
    p["conv3_b"] = uinit(ks[5], (128,), 128 * 5 * 5)
    p["fc_w"] = uinit(ks[6], (10, 128 * 3 * 3), 128 * 3 * 3)
    p["fc_b"] = uinit(ks[7], (10,), 128 * 3 * 3)
    return p


def cnn_forward(params, x_nchw):
    # x: (N, Cin, 32, 32) NCHW (PyTorch convention); 32x32 required by fc dims.
    x = jnp.transpose(x_nchw, (0, 2, 3, 1)).astype(jnp.bfloat16)  # one layout+dtype pass
    x = conv2d_relu_nhwc(x, params["conv1_w"], params["conv1_b"], stride=1)  # (N,25,25,64)
    x = conv2d_relu_nhwc(x, params["conv2_w"], params["conv2_b"], stride=2)  # (N,10,10,128)
    x = conv2d_relu_nhwc(x, params["conv3_w"], params["conv3_b"], stride=2)  # (N,3,3,128)

    n = x.shape[0]
    x_flat = x.reshape(n, 3 * 3 * 128)                      # NHWC flatten: (h, w, c)
    # fc weight is laid out for the NCHW flatten (c, h, w); permute once to (h, w, c).
    fc_w = params["fc_w"].reshape(10, 128, 3, 3)
    fc_w = jnp.transpose(fc_w, (2, 3, 1, 0)).reshape(3 * 3 * 128, 10)
    # TODO(synk): fold this tiny matmul into conv3's epilogue to save a launch.
    logits = pallas_matmul_bias(
        x_flat, fc_w, params["fc_b"], apply_relu=False, out_dtype=jnp.float32
    )
    return logits                                           # (N, 10) f32


if __name__ == "__main__":
    key = jax.random.PRNGKey(0)
    k_param, k_x = jax.random.split(key)

    in_channels = 1
    batch = 2
    params = init_params(k_param, in_channels=in_channels)
    x = jax.random.normal(k_x, (batch, in_channels, 32, 32), jnp.float32)

    out = jax.jit(cnn_forward)(params, x)
    out = jax.block_until_ready(out)
    assert out.shape == (batch, 10), out.shape
    print("KERNEL_OK")
</pallas_src>

<mosaic_0001>
module attributes {stable_mosaic.version = 11 : i64} {
  func.func @_matmul_bias_act_kernel(%arg0: i32, %arg1: memref<512x64xbf16, #tpu.memory_space<vmem>>, %arg2: memref<64x64xbf16, #tpu.memory_space<vmem>>, %arg3: memref<1x64xf32, #tpu.memory_space<vmem>>, %arg4: memref<512x64xbf16, #tpu.memory_space<vmem>>) attributes {dimension_semantics = [#tpu.dimension_semantics<parallel>], iteration_bounds = array<i64: 3>, scalar_prefetch = 0 : i64, scratch_operands = 0 : i64, tpu.core_type = #tpu.core_type<tc>, window_params = [{transform_indices = @transform_0, window_bounds = array<i64: 512, 64>}, {pipeline_mode = #tpu.pipeline_mode<synchronous>, transform_indices = @transform_1, window_bounds = array<i64: 64, 64>}, {pipeline_mode = #tpu.pipeline_mode<synchronous>, transform_indices = @transform_2, window_bounds = array<i64: 1, 64>}, {transform_indices = @transform_3, window_bounds = array<i64: 512, 64>}]} {
    %c0 = arith.constant 0 : index
    %c0_0 = arith.constant 0 : index
    %0 = vector.load %arg1[%c0, %c0_0] : memref<512x64xbf16, #tpu.memory_space<vmem>>, vector<512x64xbf16>
    %c0_1 = arith.constant 0 : index
    %c0_2 = arith.constant 0 : index
    %1 = vector.load %arg2[%c0_1, %c0_2] : memref<64x64xbf16, #tpu.memory_space<vmem>>, vector<64x64xbf16>
    %cst = arith.constant dense<0.000000e+00> : vector<512x64xf32>
    %2 = tpu.matmul %0, %1, %cst {dimension_numbers = #tpu.dot_dimension_numbers<[1], [0], [0], [1], [0, 0, 1, 1], [], []>} : vector<512x64xbf16>, vector<64x64xbf16>, vector<512x64xf32> -> vector<512x64xf32>
    %c0_3 = arith.constant 0 : index
    %c0_4 = arith.constant 0 : index
    %3 = vector.load %arg3[%c0_3, %c0_4] : memref<1x64xf32, #tpu.memory_space<vmem>>, vector<1x64xf32>
    %4 = vector.broadcast %3 : vector<1x64xf32> to vector<512x64xf32>
    %5 = arith.addf %2, %4 : vector<512x64xf32>
    %cst_5 = arith.constant 0.000000e+00 : f32
    %6 = vector.broadcast %cst_5 : f32 to vector<512x64xf32>
    %7 = arith.maximumf %5, %6 : vector<512x64xf32>
    %8 = arith.truncf %7 : vector<512x64xf32> to vector<512x64xbf16>
    %c0_6 = arith.constant 0 : index
    %c0_7 = arith.constant 0 : index
    %9 = vector.load %arg4[%c0_6, %c0_7] : memref<512x64xbf16, #tpu.memory_space<vmem>>, vector<512x64xbf16>
    tpu.vector_store %arg4[%c0_6, %c0_7], %8 {strides = array<i32>} : memref<512x64xbf16, #tpu.memory_space<vmem>>, vector<512x64xbf16>,
    return
  }
  func.func @transform_0(%arg0: i32) -> (i32, i32) {
    %c0_i32 = arith.constant 0 : i32
    %c0_i32_0 = arith.constant 0 : i32
    return %arg0, %c0_i32 : i32, i32
  }
  func.func @transform_1(%arg0: i32) -> (i32, i32) {
    %c0_i32 = arith.constant 0 : i32
    %c0_i32_0 = arith.constant 0 : i32
    %c0_i32_1 = arith.constant 0 : i32
    return %c0_i32, %c0_i32_0 : i32, i32
  }
  func.func @transform_2(%arg0: i32) -> (i32, i32) {
    %c0_i32 = arith.constant 0 : i32
    %c0_i32_0 = arith.constant 0 : i32
    %c0_i32_1 = arith.constant 0 : i32
    return %c0_i32, %c0_i32_0 : i32, i32
  }
  func.func @transform_3(%arg0: i32) -> (i32, i32) {
    %c0_i32 = arith.constant 0 : i32
    %c0_i32_0 = arith.constant 0 : i32
    return %arg0, %c0_i32 : i32, i32
  }
}

module attributes {stable_mosaic.version = 11 : i64} {
  func.func @_matmul_bias_act_kernel(%arg0: i32, %arg1: memref<208x2304xbf16, #tpu.memory_space<vmem>>, %arg2: memref<2304x128xbf16, #tpu.memory_space<vmem>>, %arg3: memref<1x128xf32, #tpu.memory_space<vmem>>, %arg4: memref<208x128xbf16, #tpu.memory_space<vmem>>) attributes {dimension_semantics = [#tpu.dimension_semantics<parallel>], iteration_bounds = array<i64: 1>, scalar_prefetch = 0 : i64, scratch_operands = 0 : i64, tpu.core_type = #tpu.core_type<tc>, window_params = [{transform_indices = @transform_0, window_bounds = array<i64: 208, 2304>}, {pipeline_mode = #tpu.pipeline_mode<synchronous>, transform_indices = @transform_1, window_bounds = array<i64: 2304, 128>}, {pipeline_mode = #tpu.pipeline_mode<synchronous>, transform_indices = @transform_2, window_bounds = array<i64: 1, 128>}, {transform_indices = @transform_3, window_bounds = array<i64: 208, 128>}]} {
    %c0 = arith.constant 0 : index
    %c0_0 = arith.constant 0 : index
    %0 = vector.load %arg1[%c0, %c0_0] : memref<208x2304xbf16, #tpu.memory_space<vmem>>, vector<208x2304xbf16>
    %c0_1 = arith.constant 0 : index
    %c0_2 = arith.constant 0 : index
    %1 = vector.load %arg2[%c0_1, %c0_2] : memref<2304x128xbf16, #tpu.memory_space<vmem>>, vector<2304x128xbf16>
    %cst = arith.constant dense<0.000000e+00> : vector<208x128xf32>
    %2 = tpu.matmul %0, %1, %cst {dimension_numbers = #tpu.dot_dimension_numbers<[1], [0], [0], [1], [0, 0, 1, 1], [], []>} : vector<208x2304xbf16>, vector<2304x128xbf16>, vector<208x128xf32> -> vector<208x128xf32>
    %c0_3 = arith.constant 0 : index
    %c0_4 = arith.constant 0 : index
    %3 = vector.load %arg3[%c0_3, %c0_4] : memref<1x128xf32, #tpu.memory_space<vmem>>, vector<1x128xf32>
    %4 = vector.broadcast %3 : vector<1x128xf32> to vector<208x128xf32>
    %5 = arith.addf %2, %4 : vector<208x128xf32>
    %cst_5 = arith.constant 0.000000e+00 : f32
    %6 = vector.broadcast %cst_5 : f32 to vector<208x128xf32>
    %7 = arith.maximumf %5, %6 : vector<208x128xf32>
    %8 = arith.truncf %7 : vector<208x128xf32> to vector<208x128xbf16>
    %c0_6 = arith.constant 0 : index
    %c0_7 = arith.constant 0 : index
    %9 = vector.load %arg4[%c0_6, %c0_7] : memref<208x128xbf16, #tpu.memory_space<vmem>>, vector<208x128xbf16>
    tpu.vector_store %arg4[%c0_6, %c0_7], %8 {strides = array<i32>} : memref<208x128xbf16, #tpu.memory_space<vmem>>, vector<208x128xbf16>,
    return
  }
  func.func @transform_0(%arg0: i32) -> (i32, i32) {
    %c0_i32 = arith.constant 0 : i32
    %c0_i32_0 = arith.constant 0 : i32
    return %arg0, %c0_i32 : i32, i32
  }
  func.func @transform_1(%arg0: i32) -> (i32, i32) {
    %c0_i32 = arith.constant 0 : i32
    %c0_i32_0 = arith.constant 0 : i32
    %c0_i32_1 = arith.constant 0 : i32
    return %c0_i32, %c0_i32_0 : i32, i32
  }
  func.func @transform_2(%arg0: i32) -> (i32, i32) {
    %c0_i32 = arith.constant 0 : i32
    %c0_i32_0 = arith.constant 0 : i32
    %c0_i32_1 = arith.constant 0 : i32
    return %c0_i32, %c0_i32_0 : i32, i32
  }
  func.func @transform_3(%arg0: i32) -> (i32, i32) {
    %c0_i32 = arith.constant 0 : i32
    %c0_i32_0 = arith.constant 0 : i32
    return %arg0, %c0_i32 : i32, i32
  }
}

module attributes {stable_mosaic.version = 11 : i64} {
  func.func @_matmul_bias_act_kernel(%arg0: i32, %arg1: memref<32x3200xbf16, #tpu.memory_space<vmem>>, %arg2: memref<3200x128xbf16, #tpu.memory_space<vmem>>, %arg3: memref<1x128xf32, #tpu.memory_space<vmem>>, %arg4: memref<32x128xbf16, #tpu.memory_space<vmem>>) attributes {dimension_semantics = [#tpu.dimension_semantics<parallel>], iteration_bounds = array<i64: 1>, scalar_prefetch = 0 : i64, scratch_operands = 0 : i64, tpu.core_type = #tpu.core_type<tc>, window_params = [{transform_indices = @transform_0, window_bounds = array<i64: 32, 3200>}, {pipeline_mode = #tpu.pipeline_mode<synchronous>, transform_indices = @transform_1, window_bounds = array<i64: 3200, 128>}, {pipeline_mode = #tpu.pipeline_mode<synchronous>, transform_indices = @transform_2, window_bounds = array<i64: 1, 128>}, {transform_indices = @transform_3, window_bounds = array<i64: 32, 128>}]} {
    %c0 = arith.constant 0 : index
    %c0_0 = arith.constant 0 : index
    %0 = vector.load %arg1[%c0, %c0_0] : memref<32x3200xbf16, #tpu.memory_space<vmem>>, vector<32x3200xbf16>
    %c0_1 = arith.constant 0 : index
    %c0_2 = arith.constant 0 : index
    %1 = vector.load %arg2[%c0_1, %c0_2] : memref<3200x128xbf16, #tpu.memory_space<vmem>>, vector<3200x128xbf16>
    %cst = arith.constant dense<0.000000e+00> : vector<32x128xf32>
    %2 = tpu.matmul %0, %1, %cst {dimension_numbers = #tpu.dot_dimension_numbers<[1], [0], [0], [1], [0, 0, 1, 1], [], []>} : vector<32x3200xbf16>, vector<3200x128xbf16>, vector<32x128xf32> -> vector<32x128xf32>
    %c0_3 = arith.constant 0 : index
    %c0_4 = arith.constant 0 : index
    %3 = vector.load %arg3[%c0_3, %c0_4] : memref<1x128xf32, #tpu.memory_space<vmem>>, vector<1x128xf32>
    %4 = vector.broadcast %3 : vector<1x128xf32> to vector<32x128xf32>
    %5 = arith.addf %2, %4 : vector<32x128xf32>
    %cst_5 = arith.constant 0.000000e+00 : f32
    %6 = vector.broadcast %cst_5 : f32 to vector<32x128xf32>
    %7 = arith.maximumf %5, %6 : vector<32x128xf32>
    %8 = arith.truncf %7 : vector<32x128xf32> to vector<32x128xbf16>
    %c0_6 = arith.constant 0 : index
    %c0_7 = arith.constant 0 : index
    %9 = vector.load %arg4[%c0_6, %c0_7] : memref<32x128xbf16, #tpu.memory_space<vmem>>, vector<32x128xbf16>
    tpu.vector_store %arg4[%c0_6, %c0_7], %8 {strides = array<i32>} : memref<32x128xbf16, #tpu.memory_space<vmem>>, vector<32x128xbf16>,
    return
  }
  func.func @transform_0(%arg0: i32) -> (i32, i32) {
    %c0_i32 = arith.constant 0 : i32
    %c0_i32_0 = arith.constant 0 : i32
    return %arg0, %c0_i32 : i32, i32
  }
  func.func @transform_1(%arg0: i32) -> (i32, i32) {
    %c0_i32 = arith.constant 0 : i32
    %c0_i32_0 = arith.constant 0 : i32
    %c0_i32_1 = arith.constant 0 : i32
    return %c0_i32, %c0_i32_0 : i32, i32
  }
  func.func @transform_2(%arg0: i32) -> (i32, i32) {
    %c0_i32 = arith.constant 0 : i32
    %c0_i32_0 = arith.constant 0 : i32
    %c0_i32_1 = arith.constant 0 : i32
    return %c0_i32, %c0_i32_0 : i32, i32
  }
  func.func @transform_3(%arg0: i32) -> (i32, i32) {
    %c0_i32 = arith.constant 0 : i32
    %c0_i32_0 = arith.constant 0 : i32
    return %arg0, %c0_i32 : i32, i32
  }
}

module attributes {stable_mosaic.version = 11 : i64} {
  func.func @_matmul_bias_act_kernel(%arg0: i32, %arg1: memref<16x1152xbf16, #tpu.memory_space<vmem>>, %arg2: memref<1152x10xbf16, #tpu.memory_space<vmem>>, %arg3: memref<1x10xf32, #tpu.memory_space<vmem>>, %arg4: memref<16x10xf32, #tpu.memory_space<vmem>>) attributes {dimension_semantics = [#tpu.dimension_semantics<parallel>], iteration_bounds = array<i64: 1>, scalar_prefetch = 0 : i64, scratch_operands = 0 : i64, tpu.core_type = #tpu.core_type<tc>, window_params = [{transform_indices = @transform_0, window_bounds = array<i64: 16, 1152>}, {pipeline_mode = #tpu.pipeline_mode<synchronous>, transform_indices = @transform_1, window_bounds = array<i64: 1152, 10>}, {pipeline_mode = #tpu.pipeline_mode<synchronous>, transform_indices = @transform_2, window_bounds = array<i64: 1, 10>}, {transform_indices = @transform_3, window_bounds = array<i64: 16, 10>}]} {
    %c0 = arith.constant 0 : index
    %c0_0 = arith.constant 0 : index
    %0 = vector.load %arg1[%c0, %c0_0] : memref<16x1152xbf16, #tpu.memory_space<vmem>>, vector<16x1152xbf16>
    %c0_1 = arith.constant 0 : index
    %c0_2 = arith.constant 0 : index
    %1 = vector.load %arg2[%c0_1, %c0_2] : memref<1152x10xbf16, #tpu.memory_space<vmem>>, vector<1152x10xbf16>
    %cst = arith.constant dense<0.000000e+00> : vector<16x10xf32>
    %2 = tpu.matmul %0, %1, %cst {dimension_numbers = #tpu.dot_dimension_numbers<[1], [0], [0], [1], [0, 0, 1, 1], [], []>} : vector<16x1152xbf16>, vector<1152x10xbf16>, vector<16x10xf32> -> vector<16x10xf32>
    %c0_3 = arith.constant 0 : index
    %c0_4 = arith.constant 0 : index
    %3 = vector.load %arg3[%c0_3, %c0_4] : memref<1x10xf32, #tpu.memory_space<vmem>>, vector<1x10xf32>
    %4 = vector.broadcast %3 : vector<1x10xf32> to vector<16x10xf32>
    %5 = arith.addf %2, %4 : vector<16x10xf32>
    %c0_5 = arith.constant 0 : index
    %c0_6 = arith.constant 0 : index
    %6 = vector.load %arg4[%c0_5, %c0_6] : memref<16x10xf32, #tpu.memory_space<vmem>>, vector<16x10xf32>
    tpu.vector_store %arg4[%c0_5, %c0_6], %5 {strides = array<i32>} : memref<16x10xf32, #tpu.memory_space<vmem>>, vector<16x10xf32>,
    return
  }
  func.func @transform_0(%arg0: i32) -> (i32, i32) {
    %c0_i32 = arith.constant 0 : i32
    %c0_i32_0 = arith.constant 0 : i32
    return %arg0, %c0_i32 : i32, i32
  }
  func.func @transform_1(%arg0: i32) -> (i32, i32) {
    %c0_i32 = arith.constant 0 : i32
    %c0_i32_0 = arith.constant 0 : i32
    %c0_i32_1 = arith.constant 0 : i32
    return %c0_i32, %c0_i32_0 : i32, i32
  }
  func.func @transform_2(%arg0: i32) -> (i32, i32) {
    %c0_i32 = arith.constant 0 : i32
    %c0_i32_0 = arith.constant 0 : i32
    %c0_i32_1 = arith.constant 0 : i32
    return %c0_i32, %c0_i32_0 : i32, i32
  }
  func.func @transform_3(%arg0: i32) -> (i32, i32) {
    %c0_i32 = arith.constant 0 : i32
    %c0_i32_0 = arith.constant 0 : i32
    return %arg0, %c0_i32 : i32, i32
  }
}

</mosaic_0001>

<bundles_post_ra>
// kernel: cnn_forward.4
= control target key start
LH: loop header
LB: loop body
LE: loop exit
PB: predicated region body
PF: predicated region fallthrough
CT: control target
= control target key end

     0   :  { %s1661_s12 = smov 0   ;;  %s1962_s0 = inlined_call_operand.vmem [shape: bf16[1536,64], index: 0, kind: input, shape index: {}]   ;;  %s1963_s1 = inlined_call_operand.vmem [shape: bf16[64,64], index: 1, kind: input, shape index: {}]   ;;  %s1964_s2 = inlined_call_operand.vmem [shape: f32[1,64], index: 2, kind: input, shape index: {}]   ;;  %s1965_s3 = inlined_call_operand.vmem [shape: bf16[1536,64], index: 3, kind: output, shape index: {}]  }
   0x1 LB: > { %s1265_s13 = sadd.s32 4294967295, %s1639_s12   ;;  %p1269_p0 = scmp.ge.s32.totalorder %s1639_s12, 1  ;;  %s1639_s12 = sphi %s1661_s12, %s13_s12  }
   0x2   : > { %p138_p1 = scmp.lt.s32.totalorder %s1639_s12, 4 }
   0x4   : > { %p139_p2 = pnand %p1269_p0, %p138_p1 }
   0x5   : > { %s1270_s16 = sshll.u32 (!%p139_p2), %s1265_s13, 6 }
   0x6   : > { %142 = sbr.rel (%p139_p2) target bundleno = 290 (0x122), region = 32  ;;  %p163_p3 = scmp.lt.s32.totalorder (!%p139_p2), %s1270_s16, 191 }
   0xb   : > { %v1597_v0 = vld [vmem:[%s1963_s1 + $0x18] sm:$0xff]   ;;  %v1598_v1 = vld [vmem:[%s1963_s1 + $0x10] sm:$0xff]   ;;  %s1967_s16 = smov (!%p163_p3, %s1270_s16), 191  ;;  %v1599_v2 = vld [vmem:[%s1963_s1 + $0x8] sm:$0xff]   ;;  %vm438_vm0 = vcmask 523264   ;;  %vm1144_vm1 = vcmask 519168  }
   0xc   : > { %1509 = vmatprep.subr.bf16.mxu0 %v1597_v0  ;;  %1581 = vmatprep.subr.bf16.mxu1 %v1597_v0  ;;  %s1271_s21 = sshll.u32 %s1967_s16, 2  ;;  %v1600_v3 = vld [vmem:[%s1963_s1] sm:$0xff]  }
   0xd   : > { %1510 = vmatpush3.bf16.msra.mxu0 %v1597_v0  ;;  %1585 = vmatpush3.bf16.msra.mxu1 %v1597_v0  ;;  %s1689_s26 = scalar_lea.vmem %s1962_s0, %s1271_s21  ;;  %v1758_v36 = vld [vmem:[%s1964_s2] ss:$0 sm:$0xff]  ;;  %s1769_s4 = scalar_lea.vmem %s1965_s3, %s1271_s21 }
   0xe   : > { %1511 = vmatprep.subr.bf16.mxu0 %v1598_v1  ;;  %1582 = vmatprep.subr.bf16.mxu1 %v1598_v1  ;;  %v1601_v4 = vld [vmem:[%s1689_s26] sm:$0xff]   ;;  %v1603_v6 = vld [vmem:[%s1689_s26 + $0x8] sm:$0xff]   ;;  %v1605_v8 = vld [vmem:[%s1689_s26 + $0x10] sm:$0xff]  }
   0xf   : > { %v1602_v5 = vld [vmem:[%s1689_s26 + $0x80] sm:$0xff]   ;;  %1517 = vmatprep.mubr.msk.bf16.mxu0 %vm438_vm0, %v1601_v4  ;;  %v1604_v7 = vld [vmem:[%s1689_s26 + $0x88] sm:$0xff]   ;;  %v1606_v9 = vld [vmem:[%s1689_s26 + $0x90] sm:$0xff]  }
  0x10   : > { %1549 = vmatprep.mubr.msk.bf16.mxu1 %vm438_vm0, %v1602_v5  ;;  %v1607_v10 = vld [vmem:[%s1689_s26 + $0x18] sm:$0xff]   ;;  %v1609_v12 = vld [vmem:[%s1689_s26 + $0x20] sm:$0xff]   ;;  %v1611_v14 = vld [vmem:[%s1689_s26 + $0x28] sm:$0xff]  }
  0x11   : > { %1512 = vmatpush3.bf16.msra.mxu0 %v1598_v1  ;;  %1586 = vmatpush3.bf16.msra.mxu1 %v1598_v1  ;;  %v1608_v11 = vld [vmem:[%s1689_s26 + $0x98] sm:$0xff]   ;;  %v1610_v13 = vld [vmem:[%s1689_s26 + $0xa0] sm:$0xff]   ;;  %v1612_v15 = vld [vmem:[%s1689_s26 + $0xa8] sm:$0xff]  }
  0x12   : > { %1513 = vmatprep.subr.bf16.mxu0 %v1599_v2  ;;  %1583 = vmatprep.subr.bf16.mxu1 %v1599_v2  ;;  %v1613_v16 = vld [vmem:[%s1689_s26 + $0x30] sm:$0xff]   ;;  %v1615_v18 = vld [vmem:[%s1689_s26 + $0x38] sm:$0xff]   ;;  %v1617_v20 = vld [vmem:[%s1689_s26 + $0x40] sm:$0xff]  }
  0x13   : > { %v1614_v17 = vld [vmem:[%s1689_s26 + $0xb0] sm:$0xff]   ;;  %v1616_v19 = vld [vmem:[%s1689_s26 + $0xb8] sm:$0xff]   ;;  %v1618_v21 = vld [vmem:[%s1689_s26 + $0xc0] sm:$0xff]  }
  0x14   : > { %v1619_v22 = vld [vmem:[%s1689_s26 + $0x48] sm:$0xff]   ;;  %v1621_v24 = vld [vmem:[%s1689_s26 + $0x50] sm:$0xff]   ;;  %v1623_v26 = vld [vmem:[%s1689_s26 + $0x58] sm:$0xff]  }
  0x15   : > { %1514 = vmatpush3.bf16.msra.mxu0 %v1599_v2  ;;  %1587 = vmatpush3.bf16.msra.mxu1 %v1599_v2  ;;  %v1620_v23 = vld [vmem:[%s1689_s26 + $0xc8] sm:$0xff]   ;;  %v1622_v25 = vld [vmem:[%s1689_s26 + $0xd0] sm:$0xff]   ;;  %v1624_v27 = vld [vmem:[%s1689_s26 + $0xd8] sm:$0xff]  }
  0x16   : > { %1515 = vmatprep.subr.bf16.mxu0 %v1600_v3  ;;  %1584 = vmatprep.subr.bf16.mxu1 %v1600_v3  ;;  %v1625_v28 = vld [vmem:[%s1689_s26 + $0x60] sm:$0xff]   ;;  %v1627_v30 = vld [vmem:[%s1689_s26 + $0x68] sm:$0xff]   ;;  %v1629_v32 = vld [vmem:[%s1689_s26 + $0x70] sm:$0xff]  }
  0x17   : > { %v1626_v29 = vld [vmem:[%s1689_s26 + $0xe0] sm:$0xff]   ;;  %v1628_v31 = vld [vmem:[%s1689_s26 + $0xe8] sm:$0xff]   ;;  %v1630_v33 = vld [vmem:[%s1689_s26 + $0xf0] sm:$0xff]  }
  0x18   : > { %v1631_v34 = vld [vmem:[%s1689_s26 + $0x78] sm:$0xff]  }
  0x19   : > { %1516 = vmatpush3.bf16.msra.mxu0 %v1600_v3  ;;  %1588 = vmatpush3.bf16.msra.mxu1 %v1600_v3  ;;  %v1632_v35 = vld [vmem:[%s1689_s26 + $0xf8] sm:$0xff]  }
  0x1c   : > { %1518 = vmatmul.mubr.msk.bf16.vlgmr.msra.gmra.mxu0 %vm438_vm0, %v1603_v6  ;;  %1550 = vmatmul.mubr.msk.bf16.vlgmr.msra.gmra.mxu1 %vm438_vm0, %v1604_v7 }
  0x1d   : > { %1521 = vmatprep.mubr.msk.bf16.mxu0 %vm438_vm0, %v1605_v8  ;;  %1553 = vmatprep.mubr.msk.bf16.mxu1 %vm438_vm0, %v1606_v9 }
  0x24   : > { %1522 = vmatmul.mubr.msk.bf16.gmra.mxu0 %vm438_vm0, %v1607_v10  ;;  %1554 = vmatmul.mubr.msk.bf16.gmra.mxu1 %vm438_vm0, %v1608_v11 }
  0x25   : > { %1525 = vmatprep.mubr.msk.bf16.mxu0 %vm438_vm0, %v1609_v12  ;;  %1557 = vmatprep.mubr.msk.bf16.mxu1 %vm438_vm0, %v1610_v13 }
  0x2c   : > { %1526 = vmatmul.mubr.msk.bf16.gmra.mxu0 %vm438_vm0, %v1611_v14  ;;  %1558 = vmatmul.mubr.msk.bf16.gmra.mxu1 %vm438_vm0, %v1612_v15 }
  0x2d   : > { %1529 = vmatprep.mubr.msk.bf16.mxu0 %vm438_vm0, %v1613_v16  ;;  %1561 = vmatprep.mubr.msk.bf16.mxu1 %vm438_vm0, %v1614_v17 }
  0x34   : > { %1530 = vmatmul.mubr.msk.bf16.gmra.mxu0 %vm438_vm0, %v1615_v18  ;;  %1562 = vmatmul.mubr.msk.bf16.gmra.mxu1 %vm438_vm0, %v1616_v19 }
  0x35   : > { %1533 = vmatprep.mubr.msk.bf16.mxu0 %vm438_vm0, %v1617_v20  ;;  %1565 = vmatprep.mubr.msk.bf16.mxu1 %vm438_vm0, %v1618_v21 }
  0x3c   : > { %1534 = vmatmul.mubr.msk.bf16.gmra.mxu0 %vm438_vm0, %v1619_v22  ;;  %1566 = vmatmul.mubr.msk.bf16.gmra.mxu1 %vm438_vm0, %v1620_v23 }
  0x3d   : > { %1537 = vmatprep.mubr.msk.bf16.mxu0 %vm438_vm0, %v1621_v24  ;;  %1569 = vmatprep.mubr.msk.bf16.mxu1 %vm438_vm0, %v1622_v25 }
  0x44   : > { %1538 = vmatmul.mubr.msk.bf16.gmra.mxu0 %vm438_vm0, %v1623_v26  ;;  %1570 = vmatmul.mubr.msk.bf16.gmra.mxu1 %vm438_vm0, %v1624_v27 }
  0x45   : > { %1541 = vmatprep.mubr.msk.bf16.mxu0 %vm438_vm0, %v1625_v28  ;;  %1573 = vmatprep.mubr.msk.bf16.mxu1 %vm438_vm0, %v1626_v29 }
  0x4c   : > { %1542 = vmatmul.mubr.msk.bf16.gmra.mxu0 %vm438_vm0, %v1627_v30  ;;  %1574 = vmatmul.mubr.msk.bf16.gmra.mxu1 %vm438_vm0, %v1628_v31 }
  0x4d   : > { %1545 = vmatprep.mubr.msk.bf16.mxu0 %vm438_vm0, %v1629_v32  ;;  %1577 = vmatprep.mubr.msk.bf16.mxu1 %vm438_vm0, %v1630_v33 }
  0x54   : > { %1546 = vmatmul.mubr.msk.bf16.gmra.mxu0 %vm438_vm0, %v1631_v34  ;;  %1578 = vmatmul.mubr.msk.bf16.gmra.mxu1 %vm438_vm0, %v1632_v35 }
  0xdc   : > { %v1519_v37 = vpop.f32.mrf.mxu0  ;;  %v1551_v38 = vpop.f32.mrf.mxu1 }
  0xdd   : > { %v578_v39 = vadd.f32 %v1519_v37, %v1758_v36  ;;  %v706_v40 = vadd.f32 %v1551_v38, %v1758_v36 }
  0xde   : > { %v569_v41 = vpop.f32.mrf.mxu0  ;;  %v697_v42 = vpop.f32.mrf.mxu1 }
  0xdf   : > { %v826_v43 = vmax.f32 %v578_v39, 0.0  ;;  %v858_v44 = vmax.f32 %v706_v40, 0.0  ;;  %v570_v45 = vadd.f32 %v1758_v36, %v569_v41  ;;  %v698_v46 = vadd.f32 %v1758_v36, %v697_v42 }
  0xe0   : > { %v1520_v47 = vpop.f32.mrf.mxu0  ;;  %v1552_v48 = vpop.f32.mrf.mxu1 }
  0xe1   : > { %v1411_v49 = vpack.c.bf16 %v826_v43, %v826_v43  ;;  %v1443_v50 = vpack.c.bf16 %v858_v44, %v858_v44  ;;  %v824_v51 = vmax.f32 %v570_v45, 0.0  ;;  %v856_v52 = vmax.f32 %v698_v46, 0.0 }
  0xe2   : > { %v581_v53 = vadd.f32 %v1520_v47, %v1758_v36  ;;  %v709_v54 = vadd.f32 %v1552_v48, %v1758_v36  ;;  %v572_v55 = vpop.f32.mrf.mxu0  ;;  %v700_v56 = vpop.f32.mrf.mxu1 }
  0xe3   : > { %1147 = vst.msk [vmem:[%s1769_s4 + $0x8] sm:$0xf] %vm1144_vm1, %v1411_v49  ;;  %1179 = vst.msk [vmem:[%s1769_s4 + $0x88] sm:$0xf] %vm1144_vm1, %v1443_v50  ;;  %v1409_v57 = vpack.c.bf16 %v824_v51, %v824_v51  ;;  %v1441_v58 = vpack.c.bf16 %v856_v52, %v856_v52  ;;  %v573_v59 = vadd.f32 %v1758_v36, %v572_v55 }
  0xe4   : > { %v701_v60 = vadd.f32 %v1758_v36, %v700_v56  ;;  %v827_v61 = vmax.f32 %v581_v53, 0.0  ;;  %v859_v62 = vmax.f32 %v709_v54, 0.0  ;;  %v1523_v63 = vpop.f32.mrf.mxu0  ;;  %v1555_v0 = vpop.f32.mrf.mxu1 }
  0xe5   : > { %1145 = vst.msk [vmem:[%s1769_s4] sm:$0xf] %vm1144_vm1, %v1409_v57  ;;  %1177 = vst.msk [vmem:[%s1769_s4 + $0x80] sm:$0xf] %vm1144_vm1, %v1441_v58  ;;  %v825_v1 = vmax.f32 %v573_v59, 0.0  ;;  %v594_v3 = vadd.f32 %v1523_v63, %v1758_v36  ;;  %v722_v4 = vadd.f32 %v1555_v0, %v1758_v36 }
  0xe6   : > { %v857_v2 = vmax.f32 %v701_v60, 0.0  ;;  %v1412_v5 = vpack.c.bf16 %v827_v61, %v827_v61  ;;  %v1444_v6 = vpack.c.bf16 %v859_v62, %v859_v62  ;;  %v585_v7 = vpop.f32.mrf.mxu0  ;;  %v713_v8 = vpop.f32.mrf.mxu1 }
  0xe7   : > { %v1410_v9 = vpack.c.bf16 %v825_v1, %v825_v1  ;;  %v830_v11 = vmax.f32 %v594_v3, 0.0  ;;  %v862_v12 = vmax.f32 %v722_v4, 0.0  ;;  %v586_v13 = vadd.f32 %v1758_v36, %v585_v7 }
  0xe8   : > { %v1442_v10 = vpack.c.bf16 %v857_v2, %v857_v2  ;;  %1148 = vst.msk [vmem:[%s1769_s4 + $0xc] sm:$0xf] %vm1144_vm1, %v1412_v5  ;;  %1180 = vst.msk [vmem:[%s1769_s4 + $0x8c] sm:$0xf] %vm1144_vm1, %v1444_v6  ;;  %v714_v14 = vadd.f32 %v1758_v36, %v713_v8  ;;  %v1524_v15 = vpop.f32.mrf.mxu0  ;;  %v1556_v16 = vpop.f32.mrf.mxu1 }
  0xe9   : > { %1146 = vst.msk [vmem:[%s1769_s4 + $0x4] sm:$0xf] %vm1144_vm1, %v1410_v9  ;;  %v1415_v17 = vpack.c.bf16 %v830_v11, %v830_v11  ;;  %v1447_v18 = vpack.c.bf16 %v862_v12, %v862_v12  ;;  %v597_v19 = vadd.f32 %v1524_v15, %v1758_v36  ;;  %v725_v20 = vadd.f32 %v1556_v16, %v1758_v36 }
  0xea   : > { %1178 = vst.msk [vmem:[%s1769_s4 + $0x84] sm:$0xf] %vm1144_vm1, %v1442_v10  ;;  %v828_v21 = vmax.f32 %v586_v13, 0.0  ;;  %v860_v22 = vmax.f32 %v714_v14, 0.0  ;;  %v588_v23 = vpop.f32.mrf.mxu0  ;;  %v716_v24 = vpop.f32.mrf.mxu1 }
  0xeb   : > { %1151 = vst.msk [vmem:[%s1769_s4 + $0x18] sm:$0xf] %vm1144_vm1, %v1415_v17  ;;  %1183 = vst.msk [vmem:[%s1769_s4 + $0x98] sm:$0xf] %vm1144_vm1, %v1447_v18  ;;  %v831_v25 = vmax.f32 %v597_v19, 0.0  ;;  %v863_v26 = vmax.f32 %v725_v20, 0.0  ;;  %v589_v27 = vadd.f32 %v1758_v36, %v588_v23  ;;  %v717_v28 = vadd.f32 %v1758_v36, %v716_v24 }
  0xec   : > { %v1413_v29 = vpack.c.bf16 %v828_v21, %v828_v21  ;;  %v1445_v30 = vpack.c.bf16 %v860_v22, %v860_v22  ;;  %v1527_v31 = vpop.f32.mrf.mxu0  ;;  %v1559_v32 = vpop.f32.mrf.mxu1 }
  0xed   : > { %v1416_v33 = vpack.c.bf16 %v831_v25, %v831_v25  ;;  %v1448_v34 = vpack.c.bf16 %v863_v26, %v863_v26  ;;  %v829_v35 = vmax.f32 %v589_v27, 0.0  ;;  %v861_v37 = vmax.f32 %v717_v28, 0.0 }
  0xee   : > { %1149 = vst.msk [vmem:[%s1769_s4 + $0x10] sm:$0xf] %vm1144_vm1, %v1413_v29  ;;  %1181 = vst.msk [vmem:[%s1769_s4 + $0x90] sm:$0xf] %vm1144_vm1, %v1445_v30  ;;  %v610_v38 = vadd.f32 %v1527_v31, %v1758_v36  ;;  %v738_v39 = vadd.f32 %v1559_v32, %v1758_v36  ;;  %v601_v40 = vpop.f32.mrf.mxu0  ;;  %v729_v41 = vpop.f32.mrf.mxu1 }
  0xef   : > { %1152 = vst.msk [vmem:[%s1769_s4 + $0x1c] sm:$0xf] %vm1144_vm1, %v1416_v33  ;;  %1184 = vst.msk [vmem:[%s1769_s4 + $0x9c] sm:$0xf] %vm1144_vm1, %v1448_v34  ;;  %v1414_v42 = vpack.c.bf16 %v829_v35, %v829_v35  ;;  %v1446_v43 = vpack.c.bf16 %v861_v37, %v861_v37  ;;  %v602_v44 = vadd.f32 %v1758_v36, %v601_v40 }
  0xf0   : > { %v730_v45 = vadd.f32 %v1758_v36, %v729_v41  ;;  %v834_v46 = vmax.f32 %v610_v38, 0.0  ;;  %v866_v47 = vmax.f32 %v738_v39, 0.0  ;;  %v1528_v48 = vpop.f32.mrf.mxu0  ;;  %v1560_v49 = vpop.f32.mrf.mxu1 }
  0xf1   : > { %1150 = vst.msk [vmem:[%s1769_s4 + $0x14] sm:$0xf] %vm1144_vm1, %v1414_v42  ;;  %1182 = vst.msk [vmem:[%s1769_s4 + $0x94] sm:$0xf] %vm1144_vm1, %v1446_v43  ;;  %v832_v50 = vmax.f32 %v602_v44, 0.0  ;;  %v613_v52 = vadd.f32 %v1528_v48, %v1758_v36  ;;  %v741_v53 = vadd.f32 %v1560_v49, %v1758_v36 }
  0xf2   : > { %v864_v51 = vmax.f32 %v730_v45, 0.0  ;;  %v1419_v54 = vpack.c.bf16 %v834_v46, %v834_v46  ;;  %v1451_v55 = vpack.c.bf16 %v866_v47, %v866_v47  ;;  %v604_v56 = vpop.f32.mrf.mxu0  ;;  %v732_v57 = vpop.f32.mrf.mxu1 }
  0xf3   : > { %v1417_v58 = vpack.c.bf16 %v832_v50, %v832_v50  ;;  %v835_v60 = vmax.f32 %v613_v52, 0.0  ;;  %v867_v61 = vmax.f32 %v741_v53, 0.0  ;;  %v605_v62 = vadd.f32 %v1758_v36, %v604_v56 }
  0xf4   : > { %v1449_v59 = vpack.c.bf16 %v864_v51, %v864_v51  ;;  %1155 = vst.msk [vmem:[%s1769_s4 + $0x28] sm:$0xf] %vm1144_vm1, %v1419_v54  ;;  %1187 = vst.msk [vmem:[%s1769_s4 + $0xa8] sm:$0xf] %vm1144_vm1, %v1451_v55  ;;  %v733_v63 = vadd.f32 %v1758_v36, %v732_v57  ;;  %v1531_v0 = vpop.f32.mrf.mxu0  ;;  %v1563_v1 = vpop.f32.mrf.mxu1 }
  0xf5   : > { %1153 = vst.msk [vmem:[%s1769_s4 + $0x20] sm:$0xf] %vm1144_vm1, %v1417_v58  ;;  %v1420_v2 = vpack.c.bf16 %v835_v60, %v835_v60  ;;  %v1452_v3 = vpack.c.bf16 %v867_v61, %v867_v61  ;;  %v626_v4 = vadd.f32 %v1531_v0, %v1758_v36  ;;  %v754_v5 = vadd.f32 %v1563_v1, %v1758_v36 }
  0xf6   : > { %1185 = vst.msk [vmem:[%s1769_s4 + $0xa0] sm:$0xf] %vm1144_vm1, %v1449_v59  ;;  %v833_v6 = vmax.f32 %v605_v62, 0.0  ;;  %v865_v7 = vmax.f32 %v733_v63, 0.0  ;;  %v617_v8 = vpop.f32.mrf.mxu0  ;;  %v745_v9 = vpop.f32.mrf.mxu1 }
  0xf7   : > { %1156 = vst.msk [vmem:[%s1769_s4 + $0x2c] sm:$0xf] %vm1144_vm1, %v1420_v2  ;;  %1188 = vst.msk [vmem:[%s1769_s4 + $0xac] sm:$0xf] %vm1144_vm1, %v1452_v3  ;;  %v838_v10 = vmax.f32 %v626_v4, 0.0  ;;  %v870_v11 = vmax.f32 %v754_v5, 0.0  ;;  %v618_v12 = vadd.f32 %v1758_v36, %v617_v8  ;;  %v746_v13 = vadd.f32 %v1758_v36, %v745_v9 }
  0xf8   : > { %v1418_v14 = vpack.c.bf16 %v833_v6, %v833_v6  ;;  %v1450_v15 = vpack.c.bf16 %v865_v7, %v865_v7  ;;  %v1532_v16 = vpop.f32.mrf.mxu0  ;;  %v1564_v17 = vpop.f32.mrf.mxu1 }
  0xf9   : > { %v1423_v18 = vpack.c.bf16 %v838_v10, %v838_v10  ;;  %v1455_v19 = vpack.c.bf16 %v870_v11, %v870_v11  ;;  %v836_v20 = vmax.f32 %v618_v12, 0.0  ;;  %v868_v21 = vmax.f32 %v746_v13, 0.0 }
  0xfa   : > { %1154 = vst.msk [vmem:[%s1769_s4 + $0x24] sm:$0xf] %vm1144_vm1, %v1418_v14  ;;  %1186 = vst.msk [vmem:[%s1769_s4 + $0xa4] sm:$0xf] %vm1144_vm1, %v1450_v15  ;;  %v629_v22 = vadd.f32 %v1532_v16, %v1758_v36  ;;  %v757_v23 = vadd.f32 %v1564_v17, %v1758_v36  ;;  %v620_v24 = vpop.f32.mrf.mxu0  ;;  %v748_v25 = vpop.f32.mrf.mxu1 }
  0xfb   : > { %1159 = vst.msk [vmem:[%s1769_s4 + $0x38] sm:$0xf] %vm1144_vm1, %v1423_v18  ;;  %1191 = vst.msk [vmem:[%s1769_s4 + $0xb8] sm:$0xf] %vm1144_vm1, %v1455_v19  ;;  %v1421_v26 = vpack.c.bf16 %v836_v20, %v836_v20  ;;  %v1453_v27 = vpack.c.bf16 %v868_v21, %v868_v21  ;;  %v621_v28 = vadd.f32 %v1758_v36, %v620_v24 }
  0xfc   : > { %v749_v29 = vadd.f32 %v1758_v36, %v748_v25  ;;  %v839_v30 = vmax.f32 %v629_v22, 0.0  ;;  %v871_v31 = vmax.f32 %v757_v23, 0.0  ;;  %v1535_v32 = vpop.f32.mrf.mxu0  ;;  %v1567_v33 = vpop.f32.mrf.mxu1 }
  0xfd   : > { %1157 = vst.msk [vmem:[%s1769_s4 + $0x30] sm:$0xf] %vm1144_vm1, %v1421_v26  ;;  %1189 = vst.msk [vmem:[%s1769_s4 + $0xb0] sm:$0xf] %vm1144_vm1, %v1453_v27  ;;  %v837_v34 = vmax.f32 %v621_v28, 0.0  ;;  %v642_v37 = vadd.f32 %v1535_v32, %v1758_v36  ;;  %v770_v38 = vadd.f32 %v1567_v33, %v1758_v36 }
  0xfe   : > { %v869_v35 = vmax.f32 %v749_v29, 0.0  ;;  %v1424_v39 = vpack.c.bf16 %v839_v30, %v839_v30  ;;  %v1456_v40 = vpack.c.bf16 %v871_v31, %v871_v31  ;;  %v633_v41 = vpop.f32.mrf.mxu0  ;;  %v761_v42 = vpop.f32.mrf.mxu1 }
  0xff   : > { %v1422_v43 = vpack.c.bf16 %v837_v34, %v837_v34  ;;  %v842_v45 = vmax.f32 %v642_v37, 0.0  ;;  %v874_v46 = vmax.f32 %v770_v38, 0.0  ;;  %v634_v47 = vadd.f32 %v1758_v36, %v633_v41 }
 0x100   : > { %v1454_v44 = vpack.c.bf16 %v869_v35, %v869_v35  ;;  %1160 = vst.msk [vmem:[%s1769_s4 + $0x3c] sm:$0xf] %vm1144_vm1, %v1424_v39  ;;  %1192 = vst.msk [vmem:[%s1769_s4 + $0xbc] sm:$0xf] %vm1144_vm1, %v1456_v40  ;;  %v762_v48 = vadd.f32 %v1758_v36, %v761_v42  ;;  %v1536_v49 = vpop.f32.mrf.mxu0  ;;  %v1568_v50 = vpop.f32.mrf.mxu1 }
 0x101   : > { %1158 = vst.msk [vmem:[%s1769_s4 + $0x34] sm:$0xf] %vm1144_vm1, %v1422_v43  ;;  %v1427_v51 = vpack.c.bf16 %v842_v45, %v842_v45  ;;  %v1459_v52 = vpack.c.bf16 %v874_v46, %v874_v46  ;;  %v645_v53 = vadd.f32 %v1536_v49, %v1758_v36  ;;  %v773_v54 = vadd.f32 %v1568_v50, %v1758_v36 }
 0x102   : > { %1190 = vst.msk [vmem:[%s1769_s4 + $0xb4] sm:$0xf] %vm1144_vm1, %v1454_v44  ;;  %v840_v55 = vmax.f32 %v634_v47, 0.0  ;;  %v872_v56 = vmax.f32 %v762_v48, 0.0  ;;  %v636_v57 = vpop.f32.mrf.mxu0  ;;  %v764_v58 = vpop.f32.mrf.mxu1 }
 0x103   : > { %1163 = vst.msk [vmem:[%s1769_s4 + $0x48] sm:$0xf] %vm1144_vm1, %v1427_v51  ;;  %1195 = vst.msk [vmem:[%s1769_s4 + $0xc8] sm:$0xf] %vm1144_vm1, %v1459_v52  ;;  %v843_v59 = vmax.f32 %v645_v53, 0.0  ;;  %v875_v60 = vmax.f32 %v773_v54, 0.0  ;;  %v637_v61 = vadd.f32 %v1758_v36, %v636_v57  ;;  %v765_v62 = vadd.f32 %v1758_v36, %v764_v58 }
 0x104   : > { %v1425_v63 = vpack.c.bf16 %v840_v55, %v840_v55  ;;  %v1457_v0 = vpack.c.bf16 %v872_v56, %v872_v56  ;;  %v1539_v1 = vpop.f32.mrf.mxu0  ;;  %v1571_v2 = vpop.f32.mrf.mxu1 }
 0x105   : > { %v1428_v3 = vpack.c.bf16 %v843_v59, %v843_v59  ;;  %v1460_v4 = vpack.c.bf16 %v875_v60, %v875_v60  ;;  %v841_v5 = vmax.f32 %v637_v61, 0.0  ;;  %v873_v6 = vmax.f32 %v765_v62, 0.0 }
 0x106   : > { %1161 = vst.msk [vmem:[%s1769_s4 + $0x40] sm:$0xf] %vm1144_vm1, %v1425_v63  ;;  %1193 = vst.msk [vmem:[%s1769_s4 + $0xc0] sm:$0xf] %vm1144_vm1, %v1457_v0  ;;  %v658_v7 = vadd.f32 %v1539_v1, %v1758_v36  ;;  %v786_v8 = vadd.f32 %v1571_v2, %v1758_v36  ;;  %v649_v9 = vpop.f32.mrf.mxu0  ;;  %v777_v10 = vpop.f32.mrf.mxu1 }
 0x107   : > { %1164 = vst.msk [vmem:[%s1769_s4 + $0x4c] sm:$0xf] %vm1144_vm1, %v1428_v3  ;;  %1196 = vst.msk [vmem:[%s1769_s4 + $0xcc] sm:$0xf] %vm1144_vm1, %v1460_v4  ;;  %v1426_v11 = vpack.c.bf16 %v841_v5, %v841_v5  ;;  %v1458_v12 = vpack.c.bf16 %v873_v6, %v873_v6  ;;  %v650_v13 = vadd.f32 %v1758_v36, %v649_v9 }
 0x108   : > { %v778_v14 = vadd.f32 %v1758_v36, %v777_v10  ;;  %v846_v15 = vmax.f32 %v658_v7, 0.0  ;;  %v878_v16 = vmax.f32 %v786_v8, 0.0  ;;  %v1540_v17 = vpop.f32.mrf.mxu0  ;;  %v1572_v18 = vpop.f32.mrf.mxu1 }
 0x109   : > { %1162 = vst.msk [vmem:[%s1769_s4 + $0x44] sm:$0xf] %vm1144_vm1, %v1426_v11  ;;  %1194 = vst.msk [vmem:[%s1769_s4 + $0xc4] sm:$0xf] %vm1144_vm1, %v1458_v12  ;;  %v844_v19 = vmax.f32 %v650_v13, 0.0  ;;  %v661_v21 = vadd.f32 %v1540_v17, %v1758_v36  ;;  %v789_v22 = vadd.f32 %v1572_v18, %v1758_v36 }
 0x10a   : > { %v876_v20 = vmax.f32 %v778_v14, 0.0  ;;  %v1431_v23 = vpack.c.bf16 %v846_v15, %v846_v15  ;;  %v1463_v24 = vpack.c.bf16 %v878_v16, %v878_v16  ;;  %v652_v25 = vpop.f32.mrf.mxu0  ;;  %v780_v26 = vpop.f32.mrf.mxu1 }
 0x10b   : > { %v1429_v27 = vpack.c.bf16 %v844_v19, %v844_v19  ;;  %v847_v29 = vmax.f32 %v661_v21, 0.0  ;;  %v879_v30 = vmax.f32 %v789_v22, 0.0  ;;  %v653_v31 = vadd.f32 %v1758_v36, %v652_v25 }
 0x10c   : > { %v1461_v28 = vpack.c.bf16 %v876_v20, %v876_v20  ;;  %1167 = vst.msk [vmem:[%s1769_s4 + $0x58] sm:$0xf] %vm1144_vm1, %v1431_v23  ;;  %1199 = vst.msk [vmem:[%s1769_s4 + $0xd8] sm:$0xf] %vm1144_vm1, %v1463_v24  ;;  %v781_v32 = vadd.f32 %v1758_v36, %v780_v26  ;;  %v1543_v33 = vpop.f32.mrf.mxu0  ;;  %v1575_v34 = vpop.f32.mrf.mxu1 }
 0x10d   : > { %1165 = vst.msk [vmem:[%s1769_s4 + $0x50] sm:$0xf] %vm1144_vm1, %v1429_v27  ;;  %v1432_v35 = vpack.c.bf16 %v847_v29, %v847_v29  ;;  %v1464_v37 = vpack.c.bf16 %v879_v30, %v879_v30  ;;  %v674_v38 = vadd.f32 %v1543_v33, %v1758_v36  ;;  %v802_v39 = vadd.f32 %v1575_v34, %v1758_v36 }
 0x10e   : > { %1197 = vst.msk [vmem:[%s1769_s4 + $0xd0] sm:$0xf] %vm1144_vm1, %v1461_v28  ;;  %v845_v40 = vmax.f32 %v653_v31, 0.0  ;;  %v877_v41 = vmax.f32 %v781_v32, 0.0  ;;  %v665_v42 = vpop.f32.mrf.mxu0  ;;  %v793_v43 = vpop.f32.mrf.mxu1 }
 0x10f   : > { %1168 = vst.msk [vmem:[%s1769_s4 + $0x5c] sm:$0xf] %vm1144_vm1, %v1432_v35  ;;  %1200 = vst.msk [vmem:[%s1769_s4 + $0xdc] sm:$0xf] %vm1144_vm1, %v1464_v37  ;;  %v850_v44 = vmax.f32 %v674_v38, 0.0  ;;  %v882_v45 = vmax.f32 %v802_v39, 0.0  ;;  %v666_v46 = vadd.f32 %v1758_v36, %v665_v42  ;;  %v794_v47 = vadd.f32 %v1758_v36, %v793_v43 }
 0x110   : > { %v1430_v48 = vpack.c.bf16 %v845_v40, %v845_v40  ;;  %v1462_v49 = vpack.c.bf16 %v877_v41, %v877_v41  ;;  %v1544_v50 = vpop.f32.mrf.mxu0  ;;  %v1576_v51 = vpop.f32.mrf.mxu1 }
 0x111   : > { %v1435_v52 = vpack.c.bf16 %v850_v44, %v850_v44  ;;  %v1467_v53 = vpack.c.bf16 %v882_v45, %v882_v45  ;;  %v848_v54 = vmax.f32 %v666_v46, 0.0  ;;  %v880_v55 = vmax.f32 %v794_v47, 0.0 }
 0x112   : > { %1166 = vst.msk [vmem:[%s1769_s4 + $0x54] sm:$0xf] %vm1144_vm1, %v1430_v48  ;;  %1198 = vst.msk [vmem:[%s1769_s4 + $0xd4] sm:$0xf] %vm1144_vm1, %v1462_v49  ;;  %v677_v56 = vadd.f32 %v1544_v50, %v1758_v36  ;;  %v805_v57 = vadd.f32 %v1576_v51, %v1758_v36  ;;  %v668_v58 = vpop.f32.mrf.mxu0  ;;  %v796_v59 = vpop.f32.mrf.mxu1 }
 0x113   : > { %1171 = vst.msk [vmem:[%s1769_s4 + $0x68] sm:$0xf] %vm1144_vm1, %v1435_v52  ;;  %1203 = vst.msk [vmem:[%s1769_s4 + $0xe8] sm:$0xf] %vm1144_vm1, %v1467_v53  ;;  %v1433_v60 = vpack.c.bf16 %v848_v54, %v848_v54  ;;  %v1465_v61 = vpack.c.bf16 %v880_v55, %v880_v55  ;;  %v669_v62 = vadd.f32 %v1758_v36, %v668_v58 }
 0x114   : > { %v797_v63 = vadd.f32 %v1758_v36, %v796_v59  ;;  %v851_v0 = vmax.f32 %v677_v56, 0.0  ;;  %v883_v1 = vmax.f32 %v805_v57, 0.0  ;;  %v1547_v2 = vpop.f32.mrf.mxu0  ;;  %v1579_v3 = vpop.f32.mrf.mxu1 }
 0x115   : > { %1169 = vst.msk [vmem:[%s1769_s4 + $0x60] sm:$0xf] %vm1144_vm1, %v1433_v60  ;;  %1201 = vst.msk [vmem:[%s1769_s4 + $0xe0] sm:$0xf] %vm1144_vm1, %v1465_v61  ;;  %v849_v4 = vmax.f32 %v669_v62, 0.0  ;;  %v690_v6 = vadd.f32 %v1547_v2, %v1758_v36  ;;  %v818_v7 = vadd.f32 %v1579_v3, %v1758_v36 }
 0x116   : > { %v881_v5 = vmax.f32 %v797_v63, 0.0  ;;  %v1436_v8 = vpack.c.bf16 %v851_v0, %v851_v0  ;;  %v1468_v9 = vpack.c.bf16 %v883_v1, %v883_v1  ;;  %v681_v10 = vpop.f32.mrf.mxu0  ;;  %v809_v11 = vpop.f32.mrf.mxu1 }
 0x117   : > { %v1434_v12 = vpack.c.bf16 %v849_v4, %v849_v4  ;;  %v854_v14 = vmax.f32 %v690_v6, 0.0  ;;  %v886_v15 = vmax.f32 %v818_v7, 0.0  ;;  %v682_v16 = vadd.f32 %v1758_v36, %v681_v10 }
 0x118   : > { %v1466_v13 = vpack.c.bf16 %v881_v5, %v881_v5  ;;  %1172 = vst.msk [vmem:[%s1769_s4 + $0x6c] sm:$0xf] %vm1144_vm1, %v1436_v8  ;;  %1204 = vst.msk [vmem:[%s1769_s4 + $0xec] sm:$0xf] %vm1144_vm1, %v1468_v9  ;;  %v810_v17 = vadd.f32 %v1758_v36, %v809_v11  ;;  %v1548_v18 = vpop.f32.mrf.mxu0  ;;  %v1580_v19 = vpop.f32.mrf.mxu1 }
 0x119   : > { %1170 = vst.msk [vmem:[%s1769_s4 + $0x64] sm:$0xf] %vm1144_vm1, %v1434_v12  ;;  %v1439_v20 = vpack.c.bf16 %v854_v14, %v854_v14  ;;  %v1471_v21 = vpack.c.bf16 %v886_v15, %v886_v15  ;;  %v693_v22 = vadd.f32 %v1548_v18, %v1758_v36  ;;  %v821_v23 = vadd.f32 %v1580_v19, %v1758_v36 }
 0x11a   : > { %1202 = vst.msk [vmem:[%s1769_s4 + $0xe4] sm:$0xf] %vm1144_vm1, %v1466_v13  ;;  %v852_v24 = vmax.f32 %v682_v16, 0.0  ;;  %v884_v25 = vmax.f32 %v810_v17, 0.0  ;;  %v684_v26 = vpop.f32.mrf.mxu0  ;;  %v812_v27 = vpop.f32.mrf.mxu1 }
 0x11b   : > { %1175 = vst.msk [vmem:[%s1769_s4 + $0x78] sm:$0xf] %vm1144_vm1, %v1439_v20  ;;  %1207 = vst.msk [vmem:[%s1769_s4 + $0xf8] sm:$0xf] %vm1144_vm1, %v1471_v21  ;;  %v855_v28 = vmax.f32 %v693_v22, 0.0  ;;  %v887_v29 = vmax.f32 %v821_v23, 0.0  ;;  %v685_v30 = vadd.f32 %v1758_v36, %v684_v26  ;;  %v813_v31 = vadd.f32 %v1758_v36, %v812_v27 }
 0x11c   : > { %v1437_v32 = vpack.c.bf16 %v852_v24, %v852_v24  ;;  %v1469_v33 = vpack.c.bf16 %v884_v25, %v884_v25 }
 0x11d   : > { %v1440_v34 = vpack.c.bf16 %v855_v28, %v855_v28  ;;  %v1472_v35 = vpack.c.bf16 %v887_v29, %v887_v29  ;;  %v853_v37 = vmax.f32 %v685_v30, 0.0  ;;  %v885_v38 = vmax.f32 %v813_v31, 0.0 }
 0x11e   : > { %1173 = vst.msk [vmem:[%s1769_s4 + $0x70] sm:$0xf] %vm1144_vm1, %v1437_v32  ;;  %1205 = vst.msk [vmem:[%s1769_s4 + $0xf0] sm:$0xf] %vm1144_vm1, %v1469_v33 }
 0x11f   : > { %1176 = vst.msk [vmem:[%s1769_s4 + $0x7c] sm:$0xf] %vm1144_vm1, %v1440_v34  ;;  %1208 = vst.msk [vmem:[%s1769_s4 + $0xfc] sm:$0xf] %vm1144_vm1, %v1472_v35  ;;  %v1438_v39 = vpack.c.bf16 %v853_v37, %v853_v37  ;;  %v1470_v40 = vpack.c.bf16 %v885_v38, %v885_v38 }
 0x121   : > { %1174 = vst.msk [vmem:[%s1769_s4 + $0x74] sm:$0xf] %vm1144_vm1, %v1438_v39  ;;  %1206 = vst.msk [vmem:[%s1769_s4 + $0xf4] sm:$0xf] %vm1144_vm1, %v1470_v40 }
 0x122 PF: > { %s13_s12 = sadd.s32 1, %s1639_s12  }
 0x123   : > { %p10_p4 = scmp.ge.s32.totalorder %s13_s12, 5  }
 0x125   :  { %12 = sbr.rel (!%p10_p4) target bundleno = 1 (0x1), region = 62 }

// kernel: cnn_forward.5
= control target key start
LH: loop header
LB: loop body
LE: loop exit
PB: predicated region body
PF: predicated region fallthrough
CT: control target
= control target key end

     0   :  { %s7372_s1 = inlined_call_operand.vmem [shape: bf16[2304,128], index: 1, kind: input, shape index: {}]   ;;  %s7373_s0 = inlined_call_operand.vmem [shape: bf16[208,2304], index: 0, kind: input, shape index: {}]   ;;  %s7374_s2 = inlined_call_operand.vmem [shape: f32[1,128], index: 2, kind: input, shape index: {}]   ;;  %s7375_s3 = inlined_call_operand.vmem [shape: bf16[208,128], index: 3, kind: output, shape index: {}]  }
   0x1   :  { %v5341_v0 = vld [vmem:[%s7372_s1 + $0x78] sm:$0xff]   ;;  %v5343_v2 = vld [vmem:[%s7372_s1 + $0x70] sm:$0xff]   ;;  %v5345_v4 = vld [vmem:[%s7372_s1 + $0x68] sm:$0xff]  }
   0x2   :  { %v5342_v1 = vld [vmem:[%s7372_s1 + $0x38] sm:$0xff]   ;;  %4479 = vmatprep.subr.bf16.mxu0 %v5341_v0  ;;  %5325 = vmatprep.subr.bf16.mxu1 %v5341_v0  ;;  %v5344_v3 = vld [vmem:[%s7372_s1 + $0x30] sm:$0xff]   ;;  %v5346_v5 = vld [vmem:[%s7372_s1 + $0x28] sm:$0xff]  }
   0x3   :  { %4480 = vmatpush3.bf16.msra.mxu0 %v5342_v1  ;;  %5333 = vmatpush3.bf16.msra.mxu1 %v5342_v1  ;;  %v5347_v6 = vld [vmem:[%s7372_s1 + $0x60] sm:$0xff]   ;;  %v5349_v8 = vld [vmem:[%s7372_s1 + $0x58] sm:$0xff]   ;;  %v5351_v10 = vld [vmem:[%s7372_s1 + $0x50] sm:$0xff]  }
   0x4   :  { %4481 = vmatprep.subr.bf16.mxu0 %v5343_v2  ;;  %5326 = vmatprep.subr.bf16.mxu1 %v5343_v2  ;;  %v5348_v7 = vld [vmem:[%s7372_s1 + $0x20] sm:$0xff]   ;;  %v5350_v9 = vld [vmem:[%s7372_s1 + $0x18] sm:$0xff]   ;;  %v5352_v13 = vld [vmem:[%s7372_s1 + $0x10] sm:$0xff]  }
   0x5   :  { %v5359_v11 = vld [vmem:[%s7373_s0 + $0x4] ss:$72 sps:$4 sm:$0xff]   ;;  %v5362_v12 = vld [vmem:[%s7373_s0 + $0x3f4] ss:$72 sps:$4 sm:$0xff]   ;;  %v5357_v19 = vld [vmem:[%s7373_s0] ss:$72 sps:$4 sm:$0xff]  }
   0x6   :  { %v5353_v14 = vld [vmem:[%s7372_s1 + $0x48] sm:$0xff]   ;;  %2610 = vmatprep.mubr.bf16.mxu0 %v5359_v11  ;;  %2666 = vmatprep.mubr.bf16.mxu1 %v5362_v12  ;;  %v5355_v16 = vld [vmem:[%s7372_s1 + $0x40] sm:$0xff]   ;;  %v5363_v18 = vld [vmem:[%s7372_s1 + $0x178] sm:$0xff]  }
   0x7   :  { %4482 = vmatpush3.bf16.msra.mxu0 %v5344_v3  ;;  %5334 = vmatpush3.bf16.msra.mxu1 %v5344_v3  ;;  %v5354_v15 = vld [vmem:[%s7372_s1 + $0x8] sm:$0xff]   ;;  %v5356_v17 = vld [vmem:[%s7372_s1] sm:$0xff]   ;;  %v5360_v20 = vld [vmem:[%s7373_s0 + $0x3f0] ss:$72 sps:$4 sm:$0xff]  }
   0x8   :  { %4483 = vmatprep.subr.bf16.mxu0 %v5345_v4  ;;  %5327 = vmatprep.subr.bf16.mxu1 %v5345_v4  ;;  %v5365_v21 = vld [vmem:[%s7372_s1 + $0xf8] sm:$0xff]   ;;  %v5368_v24 = vld [vmem:[%s7373_s0 + $0x484] ss:$72 sps:$4 sm:$0xff]   ;;  %v5371_v26 = vld [vmem:[%s7372_s1 + $0x170] sm:$0xff]  }
   0x9   :  { %v5364_v22 = vld [vmem:[%s7372_s1 + $0x138] sm:$0xff]   ;;  %v5375_v27 = vld [vmem:[%s7372_s1 + $0xf0] sm:$0xff]   ;;  %v5373_v31 = vld [vmem:[%s7373_s0 + $0x480] ss:$72 sps:$4 sm:$0xff]  }
   0xa   :  { %v5366_v23 = vld [vmem:[%s7373_s0 + $0x94] ss:$72 sps:$4 sm:$0xff]   ;;  %v5372_v30 = vld [vmem:[%s7373_s0 + $0x90] ss:$72 sps:$4 sm:$0xff]   ;;  %v5377_v32 = vld [vmem:[%s7372_s1 + $0x168] sm:$0xff]  }
   0xb   :  { %4484 = vmatpush3.bf16.msra.mxu0 %v5346_v5  ;;  %5335 = vmatpush3.bf16.msra.mxu1 %v5346_v5  ;;  %v5370_v25 = vld [vmem:[%s7372_s1 + $0xb8] sm:$0xff]   ;;  %v5374_v28 = vld [vmem:[%s7372_s1 + $0x130] sm:$0xff]   ;;  %v5378_v33 = vld [vmem:[%s7373_s0 + $0x124] ss:$72 sps:$4 sm:$0xff]  }
   0xc   :  { %4485 = vmatprep.subr.bf16.mxu0 %v5347_v6  ;;  %5328 = vmatprep.subr.bf16.mxu1 %v5347_v6  ;;  %v5376_v29 = vld [vmem:[%s7372_s1 + $0xb0] sm:$0xff]   ;;  %v5385_v34 = vld [vmem:[%s7372_s1 + $0xe8] sm:$0xff]   ;;  %v5387_v38 = vld [vmem:[%s7372_s1 + $0x160] sm:$0xff]  }
   0xd   :  { %v5380_v35 = vld [vmem:[%s7373_s0 + $0x514] ss:$72 sps:$4 sm:$0xff]   ;;  %v5382_v36 = vld [vmem:[%s7372_s1 + $0x128] sm:$0xff]   ;;  %v5395_v39 = vld [vmem:[%s7372_s1 + $0xe0] sm:$0xff]  }
   0xe   :  { %v5386_v37 = vld [vmem:[%s7372_s1 + $0xa8] sm:$0xff]   ;;  %v5388_v40 = vld [vmem:[%s7372_s1 + $0x120] sm:$0xff]   ;;  %v5384_v43 = vld [vmem:[%s7373_s0 + $0x510] ss:$72 sps:$4 sm:$0xff]  }
   0xf   :  { %4486 = vmatpush3.bf16.msra.mxu0 %v5348_v7  ;;  %5336 = vmatpush3.bf16.msra.mxu1 %v5348_v7  ;;  %v5396_v41 = vld [vmem:[%s7372_s1 + $0xa0] sm:$0xff]   ;;  %v5397_v44 = vld [vmem:[%s7372_s1 + $0x158] sm:$0xff]   ;;  %v5407_v50 = vld [vmem:[%s7372_s1 + $0x150] sm:$0xff]  }
  0x10   :  { %4487 = vmatprep.subr.bf16.mxu0 %v5349_v8  ;;  %5329 = vmatprep.subr.bf16.mxu1 %v5349_v8  ;;  %v5383_v42 = vld [vmem:[%s7373_s0 + $0x120] ss:$72 sps:$4 sm:$0xff]   ;;  %v5399_v45 = vld [vmem:[%s7372_s1 + $0xd8] sm:$0xff]   ;;  %v5391_v47 = vld [vmem:[%s7373_s0 + $0x5a4] ss:$72 sps:$4 sm:$0xff]  }
  0x11   :  { %v5389_v46 = vld [vmem:[%s7373_s0 + $0x1b4] ss:$72 sps:$4 sm:$0xff]   ;;  %v5393_v52 = vld [vmem:[%s7373_s0 + $0x1b0] ss:$72 sps:$4 sm:$0xff]   ;;  %v5394_v55 = vld [vmem:[%s7373_s0 + $0x5a0] ss:$72 sps:$4 sm:$0xff]  }
  0x12   :  { %v5398_v48 = vld [vmem:[%s7372_s1 + $0x118] sm:$0xff]   ;;  %v5408_v51 = vld [vmem:[%s7372_s1 + $0xd0] sm:$0xff]   ;;  %v5400_v56 = vld [vmem:[%s7373_s0 + $0x244] ss:$72 sps:$4 sm:$0xff]  }
  0x13   :  { %4488 = vmatpush3.bf16.msra.mxu0 %v5350_v9  ;;  %5337 = vmatpush3.bf16.msra.mxu1 %v5350_v9  ;;  %v5404_v49 = vld [vmem:[%s7372_s1 + $0x98] sm:$0xff]   ;;  %v5409_v53 = vld [vmem:[%s7372_s1 + $0x110] sm:$0xff]   ;;  %v5417_v58 = vld [vmem:[%s7372_s1 + $0xc8] sm:$0xff]  }
  0x14   :  { %4489 = vmatprep.subr.bf16.mxu0 %v5351_v10  ;;  %5330 = vmatprep.subr.bf16.mxu1 %v5351_v10  ;;  %v5410_v54 = vld [vmem:[%s7372_s1 + $0x90] sm:$0xff]   ;;  %v5418_v59 = vld [vmem:[%s7372_s1 + $0x88] sm:$0xff]   ;;  %v5421_v0 = vld [vmem:[%s7372_s1 + $0xc0] sm:$0xff]  }
  0x15   :  { %v5402_v57 = vld [vmem:[%s7373_s0 + $0x634] ss:$72 sps:$4 sm:$0xff]   ;;  %v5419_v60 = vld [vmem:[%s7372_s1 + $0x148] sm:$0xff]   ;;  %v5406_v63 = vld [vmem:[%s7373_s0 + $0x630] ss:$72 sps:$4 sm:$0xff]  }
  0x16   :  { %v5420_v61 = vld [vmem:[%s7372_s1 + $0x108] sm:$0xff]   ;;  %v5422_v1 = vld [vmem:[%s7372_s1 + $0x80] sm:$0xff]   ;;  %v5411_v2 = vld [vmem:[%s7373_s0 + $0x2d4] ss:$72 sps:$4 sm:$0xff]  }
  0x17   :  { %4490 = vmatpush3.bf16.msra.mxu0 %v5352_v13  ;;  %5338 = vmatpush3.bf16.msra.mxu1 %v5352_v13  ;;  %v5405_v62 = vld [vmem:[%s7373_s0 + $0x240] ss:$72 sps:$4 sm:$0xff]   ;;  %v5413_v3 = vld [vmem:[%s7373_s0 + $0x6c4] ss:$72 sps:$4 sm:$0xff]   ;;  %v5431_v6 = vld [vmem:[%s7372_s1 + $0x1f8] sm:$0xff]  }
  0x18   :  { %4491 = vmatprep.subr.bf16.mxu0 %v5353_v14  ;;  %5331 = vmatprep.subr.bf16.mxu1 %v5353_v14  ;;  %v5429_v4 = vld [vmem:[%s7372_s1 + $0x140] sm:$0xff]   ;;  %v5415_v7 = vld [vmem:[%s7373_s0 + $0x2d0] ss:$72 sps:$4 sm:$0xff]   ;;  %v5427_v10 = vld [vmem:[%s7373_s0 + $0xc] ss:$72 sps:$4 sm:$0xff]  }
  0x19   :  { %v5430_v5 = vld [vmem:[%s7372_s1 + $0x100] sm:$0xff]   ;;  %v5439_v11 = vld [vmem:[%s7372_s1 + $0x278] sm:$0xff]   ;;  %v5425_v12 = vld [vmem:[%s7373_s0 + $0x8] ss:$72 sps:$4 sm:$0xff]  }
  0x1a   :  { %v5416_v8 = vld [vmem:[%s7373_s0 + $0x6c0] ss:$72 sps:$4 sm:$0xff]   ;;  %v5423_v9 = vld [vmem:[%s7373_s0 + $0x364] ss:$72 sps:$4 sm:$0xff]  }
  0x1b   :  { %4492 = vmatpush3.bf16.msra.mxu0 %v5354_v15  ;;  %5339 = vmatpush3.bf16.msra.mxu1 %v5354_v15  ;;  %v5428_v13 = vld [vmem:[%s7373_s0 + $0x360] ss:$72 sps:$4 sm:$0xff]   ;;  %v5432_v14 = vld [vmem:[%s7373_s0 + $0x9c] ss:$72 sps:$4 sm:$0xff]  }
  0x1c   :  { %4493 = vmatprep.subr.bf16.mxu0 %v5355_v16  ;;  %5332 = vmatprep.subr.bf16.mxu1 %v5355_v16  ;;  %v5436_v15 = vld [vmem:[%s7373_s0 + $0x14] ss:$72 sps:$4 sm:$0xff]  }
  0x1d   :  { %v5437_v16 = vld [vmem:[%s7372_s1 + $0x1b8] sm:$0xff]  }
  0x1f   :  { %4494 = vmatpush3.bf16.msra.mxu0 %v5356_v17  ;;  %5340 = vmatpush3.bf16.msra.mxu1 %v5356_v17  ;;  %v5447_v17 = vld [vmem:[%s7372_s1 + $0x1f0] sm:$0xff]  }
  0x20   :  { %4667 = vmatprep.subr.bf16.mxu0 %v5363_v18  ;;  %4573 = vmatprep.subr.bf16.mxu1 %v5365_v21  ;;  %v5434_v18 = vld [vmem:[%s7373_s0 + $0x10] ss:$72 sps:$4 sm:$0xff]  }
  0x21   :  { %v5440_v21 = vld [vmem:[%s7372_s1 + $0x238] sm:$0xff]  }
  0x22   :  { %2611 = vmatmul.mubr.bf16.vlgmr.msra.gmra.mxu0 %v5357_v19  ;;  %2667 = vmatmul.mubr.bf16.vlgmr.msra.gmra.mxu1 %v5360_v20  ;;  %v5438_v19 = vld [vmem:[%s7373_s0 + $0x98] ss:$72 sps:$4 sm:$0xff]   ;;  %v5448_v20 = vld [vmem:[%s7372_s1 + $0x1b0] sm:$0xff]  }
  0x23   :  { %4668 = vmatpush3.bf16.msra.mxu0 %v5364_v22  ;;  %2618 = vmatprep.mubr.bf16.mxu0 %v5366_v23  ;;  %v5441_v22 = vld [vmem:[%s7373_s0 + $0x12c] ss:$72 sps:$4 sm:$0xff]  }
  0x24   :  { %2674 = vmatprep.mubr.bf16.mxu1 %v5368_v24  ;;  %4574 = vmatpush3.bf16.msra.mxu1 %v5370_v25  ;;  %v5463_v23 = vld [vmem:[%s7372_s1 + $0x1e8] sm:$0xff]   ;;  %v5449_v25 = vld [vmem:[%s7372_s1 + $0x270] sm:$0xff]  }
  0x25   :  { %4669 = vmatprep.subr.bf16.mxu0 %v5371_v26  ;;  %4575 = vmatprep.subr.bf16.mxu1 %v5375_v27  ;;  %v5443_v24 = vld [vmem:[%s7373_s0 + $0xa4] ss:$72 sps:$4 sm:$0xff]   ;;  %v5450_v27 = vld [vmem:[%s7372_s1 + $0x230] sm:$0xff]  }
  0x26   :  { %v5464_v26 = vld [vmem:[%s7372_s1 + $0x1a8] sm:$0xff]  }
  0x27   :  { %4670 = vmatpush3.bf16.msra.mxu0 %v5374_v28  ;;  %v5465_v28 = vld [vmem:[%s7372_s1 + $0x268] sm:$0xff]  }
  0x28   :  { %4576 = vmatpush3.bf16.msra.mxu1 %v5376_v29  ;;  %4671 = vmatprep.subr.bf16.mxu0 %v5377_v32  ;;  %v5445_v29 = vld [vmem:[%s7373_s0 + $0x128] ss:$72 sps:$4 sm:$0xff]   ;;  %v5474_v32 = vld [vmem:[%s7372_s1 + $0x1a0] sm:$0xff]  }
  0x29   :  { %4577 = vmatprep.subr.bf16.mxu1 %v5385_v34  ;;  %v5453_v34 = vld [vmem:[%s7373_s0 + $0x134] ss:$72 sps:$4 sm:$0xff]  }
  0x2a   :  { %2619 = vmatmul.mubr.bf16.gmra.mxu0 %v5372_v30  ;;  %2675 = vmatmul.mubr.bf16.gmra.mxu1 %v5373_v31  ;;  %v5446_v30 = vld [vmem:[%s7373_s0 + $0xa0] ss:$72 sps:$4 sm:$0xff]  }
  0x2b   :  { %2626 = vmatprep.mubr.bf16.mxu0 %v5378_v33  ;;  %2682 = vmatprep.mubr.bf16.mxu1 %v5380_v35  ;;  %v5473_v31 = vld [vmem:[%s7372_s1 + $0x1e0] sm:$0xff]   ;;  %v5466_v35 = vld [vmem:[%s7372_s1 + $0x228] sm:$0xff]  }
  0x2c   :  { %4672 = vmatpush3.bf16.msra.mxu0 %v5382_v36  ;;  %4578 = vmatpush3.bf16.msra.mxu1 %v5386_v37  ;;  %v5451_v33 = vld [vmem:[%s7373_s0 + $0x1bc] ss:$72 sps:$4 sm:$0xff]   ;;  %v5455_v37 = vld [vmem:[%s7373_s0 + $0x1b8] ss:$72 sps:$4 sm:$0xff]  }
  0x2d   :  { %4673 = vmatprep.subr.bf16.mxu0 %v5387_v38  ;;  %4579 = vmatprep.subr.bf16.mxu1 %v5395_v39  ;;  %v5479_v36 = vld [vmem:[%s7372_s1 + $0x260] sm:$0xff]   ;;  %v5456_v38 = vld [vmem:[%s7373_s0 + $0x130] ss:$72 sps:$4 sm:$0xff]  }
  0x2e   :  { %v5482_v39 = vld [vmem:[%s7372_s1 + $0x220] sm:$0xff]  }
  0x30   :  { %4674 = vmatpush3.bf16.msra.mxu0 %v5388_v40  ;;  %4580 = vmatpush3.bf16.msra.mxu1 %v5396_v41  ;;  %v5457_v40 = vld [vmem:[%s7373_s0 + $0x24c] ss:$72 sps:$4 sm:$0xff]  }
  0x31   :  { %4675 = vmatprep.subr.bf16.mxu0 %v5397_v44  ;;  %4581 = vmatprep.subr.bf16.mxu1 %v5399_v45  ;;  %v5459_v41 = vld [vmem:[%s7373_s0 + $0x1c4] ss:$72 sps:$4 sm:$0xff]   ;;  %v5491_v44 = vld [vmem:[%s7372_s1 + $0x258] sm:$0xff]  }
  0x32   :  { %2627 = vmatmul.mubr.bf16.gmra.mxu0 %v5383_v42  ;;  %2683 = vmatmul.mubr.bf16.gmra.mxu1 %v5384_v43  ;;  %v5489_v42 = vld [vmem:[%s7372_s1 + $0x1d8] sm:$0xff]  }
  0x33   :  { %2634 = vmatprep.mubr.bf16.mxu0 %v5389_v46  ;;  %2690 = vmatprep.mubr.bf16.mxu1 %v5391_v47  ;;  %v5490_v43 = vld [vmem:[%s7372_s1 + $0x198] sm:$0xff]   ;;  %v5461_v46 = vld [vmem:[%s7373_s0 + $0x248] ss:$72 sps:$4 sm:$0xff]  }
  0x34   :  { %4676 = vmatpush3.bf16.msra.mxu0 %v5398_v48  ;;  %4582 = vmatpush3.bf16.msra.mxu1 %v5404_v49  ;;  %v5492_v45 = vld [vmem:[%s7372_s1 + $0x218] sm:$0xff]   ;;  %v5462_v47 = vld [vmem:[%s7373_s0 + $0x1c0] ss:$72 sps:$4 sm:$0xff]   ;;  %v5503_v48 = vld [vmem:[%s7372_s1 + $0x1d0] sm:$0xff]  }
  0x35   :  { %4677 = vmatprep.subr.bf16.mxu0 %v5407_v50  ;;  %4583 = vmatprep.subr.bf16.mxu1 %v5408_v51  ;;  %v5467_v49 = vld [vmem:[%s7373_s0 + $0x2dc] ss:$72 sps:$4 sm:$0xff]   ;;  %v5506_v51 = vld [vmem:[%s7372_s1 + $0x190] sm:$0xff]  }
  0x36   :  { %v5469_v50 = vld [vmem:[%s7373_s0 + $0x254] ss:$72 sps:$4 sm:$0xff]  }
  0x38   :  { %4678 = vmatpush3.bf16.msra.mxu0 %v5409_v53  ;;  %4584 = vmatpush3.bf16.msra.mxu1 %v5410_v54  ;;  %v5508_v53 = vld [vmem:[%s7372_s1 + $0x210] sm:$0xff]   ;;  %v5471_v54 = vld [vmem:[%s7373_s0 + $0x2d8] ss:$72 sps:$4 sm:$0xff]  }
  0x39   :  { %4585 = vmatprep.subr.bf16.mxu1 %v5417_v58  ;;  %4679 = vmatprep.subr.bf16.mxu0 %v5419_v60  ;;  %v5515_v58 = vld [vmem:[%s7372_s1 + $0x1c8] sm:$0xff]  }
  0x3a   :  { %2635 = vmatmul.mubr.bf16.gmra.mxu0 %v5393_v52  ;;  %2691 = vmatmul.mubr.bf16.gmra.mxu1 %v5394_v55  ;;  %v5507_v52 = vld [vmem:[%s7372_s1 + $0x250] sm:$0xff]   ;;  %v5517_v60 = vld [vmem:[%s7372_s1 + $0x248] sm:$0xff]  }
  0x3b   :  { %2642 = vmatprep.mubr.bf16.mxu0 %v5400_v56  ;;  %2698 = vmatprep.mubr.bf16.mxu1 %v5402_v57  ;;  %v5472_v55 = vld [vmem:[%s7373_s0 + $0x250] ss:$72 sps:$4 sm:$0xff]   ;;  %v5475_v56 = vld [vmem:[%s7373_s0 + $0x36c] ss:$72 sps:$4 sm:$0xff]  }
  0x3c   :  { %4586 = vmatpush3.bf16.msra.mxu1 %v5418_v59  ;;  %4680 = vmatpush3.bf16.msra.mxu0 %v5420_v61  ;;  %v5477_v57 = vld [vmem:[%s7373_s0 + $0x2e4] ss:$72 sps:$4 sm:$0xff]  }
  0x3d   :  { %4587 = vmatprep.subr.bf16.mxu1 %v5421_v0  ;;  %4681 = vmatprep.subr.bf16.mxu0 %v5429_v4  ;;  %v5516_v59 = vld [vmem:[%s7372_s1 + $0x188] sm:$0xff]   ;;  %v5483_v0 = vld [vmem:[%s7373_s0 + $0x3fc] ss:$72 sps:$4 sm:$0xff]  }
  0x3e   :  { %v5522_v61 = vld [vmem:[%s7372_s1 + $0x208] sm:$0xff]   ;;  %v5533_v4 = vld [vmem:[%s7372_s1 + $0x240] sm:$0xff]  }
  0x40   :  { %4588 = vmatpush3.bf16.msra.mxu1 %v5422_v1  ;;  %4682 = vmatpush3.bf16.msra.mxu0 %v5430_v5  ;;  %v5485_v1 = vld [vmem:[%s7373_s0 + $0x374] ss:$72 sps:$4 sm:$0xff]   ;;  %v5534_v5 = vld [vmem:[%s7372_s1 + $0x200] sm:$0xff]  }
  0x41   :  { %4761 = vmatprep.subr.bf16.mxu1 %v5431_v6  ;;  %4855 = vmatprep.subr.bf16.mxu0 %v5439_v11  ;;  %v5487_v6 = vld [vmem:[%s7373_s0 + $0x3f8] ss:$72 sps:$4 sm:$0xff]  }
  0x42   :  { %2643 = vmatmul.mubr.bf16.gmra.mxu0 %v5405_v62  ;;  %2699 = vmatmul.mubr.bf16.gmra.mxu1 %v5406_v63  ;;  %v5480_v62 = vld [vmem:[%s7373_s0 + $0x368] ss:$72 sps:$4 sm:$0xff]   ;;  %v5549_v11 = vld [vmem:[%s7372_s1 + $0x378] sm:$0xff]  }
  0x43   :  { %2650 = vmatprep.mubr.bf16.mxu0 %v5411_v2  ;;  %2706 = vmatprep.mubr.bf16.mxu1 %v5413_v3  ;;  %v5481_v63 = vld [vmem:[%s7373_s0 + $0x2e0] ss:$72 sps:$4 sm:$0xff]  }
  0x44   :  { %v5531_v2 = vld [vmem:[%s7372_s1 + $0x1c0] sm:$0xff]  }
  0x45   :  { %v5532_v3 = vld [vmem:[%s7372_s1 + $0x180] sm:$0xff]  }
  0x4a   :  { %2651 = vmatmul.mubr.bf16.gmra.mxu0 %v5415_v7  ;;  %2707 = vmatmul.mubr.bf16.gmra.mxu1 %v5416_v8  ;;  %v5488_v7 = vld [vmem:[%s7373_s0 + $0x370] ss:$72 sps:$4 sm:$0xff]   ;;  %v5493_v8 = vld [vmem:[%s7373_s0 + $0x48c] ss:$72 sps:$4 sm:$0xff]  }
  0x4b   :  { %2658 = vmatprep.mubr.bf16.mxu0 %v5423_v9  ;;  %2747 = vmatprep.mubr.bf16.mxu1 %v5427_v10  ;;  %v5541_v9 = vld [vmem:[%s7372_s1 + $0x2f8] sm:$0xff]   ;;  %v5495_v10 = vld [vmem:[%s7373_s0 + $0x404] ss:$72 sps:$4 sm:$0xff]  }
  0x52   :  { %2659 = vmatmul.mubr.bf16.gmra.mxu0 %v5428_v13  ;;  %2748 = vmatmul.mubr.bf16.vlgmr.msra.gmra.mxu1 %v5425_v12  ;;  %v5497_v12 = vld [vmem:[%s7373_s0 + $0x488] ss:$72 sps:$4 sm:$0xff]  }
  0x53   :  { %2755 = vmatprep.mubr.bf16.mxu1 %v5432_v14  ;;  %2884 = vmatprep.mubr.bf16.mxu0 %v5436_v15  ;;  %v5498_v13 = vld [vmem:[%s7373_s0 + $0x400] ss:$72 sps:$4 sm:$0xff]   ;;  %v5499_v14 = vld [vmem:[%s7373_s0 + $0x51c] ss:$72 sps:$4 sm:$0xff]  }
  0x54   :  { %4762 = vmatpush3.bf16.msra.mxu1 %v5437_v16  ;;  %v5501_v15 = vld [vmem:[%s7373_s0 + $0x494] ss:$72 sps:$4 sm:$0xff]   ;;  %v5504_v16 = vld [vmem:[%s7373_s0 + $0x518] ss:$72 sps:$4 sm:$0xff]  }
  0x55   :  { %4763 = vmatprep.subr.bf16.mxu1 %v5447_v17  ;;  %v5505_v17 = vld [vmem:[%s7373_s0 + $0x490] ss:$72 sps:$4 sm:$0xff]  }
  0x58   :  { %4764 = vmatpush3.bf16.msra.mxu1 %v5448_v20  ;;  %v5513_v20 = vld [vmem:[%s7373_s0 + $0x5a8] ss:$72 sps:$4 sm:$0xff]  }
  0x59   :  { %4765 = vmatprep.subr.bf16.mxu1 %v5463_v23  ;;  %v5520_v23 = vld [vmem:[%s7373_s0 + $0x5b4] ss:$72 sps:$4 sm:$0xff]  }
  0x5a   :  { %2756 = vmatmul.mubr.bf16.gmra.mxu1 %v5438_v19  ;;  %2885 = vmatmul.mubr.bf16.vlgmr.msra.gmra.mxu0 %v5434_v18  ;;  %v5509_v18 = vld [vmem:[%s7373_s0 + $0x5ac] ss:$72 sps:$4 sm:$0xff]  }
  0x5b   :  { %4856 = vmatpush3.bf16.msra.mxu0 %v5440_v21  ;;  %2763 = vmatprep.mubr.bf16.mxu1 %v5441_v22  ;;  %v5511_v19 = vld [vmem:[%s7373_s0 + $0x524] ss:$72 sps:$4 sm:$0xff]   ;;  %v5514_v21 = vld [vmem:[%s7373_s0 + $0x520] ss:$72 sps:$4 sm:$0xff]  }
  0x5c   :  { %2892 = vmatprep.mubr.bf16.mxu0 %v5443_v24  ;;  %4857 = vmatprep.subr.bf16.mxu0 %v5449_v25  ;;  %v5518_v22 = vld [vmem:[%s7373_s0 + $0x63c] ss:$72 sps:$4 sm:$0xff]   ;;  %v5523_v24 = vld [vmem:[%s7373_s0 + $0x638] ss:$72 sps:$4 sm:$0xff]  }
  0x5d   :  { %4766 = vmatpush3.bf16.msra.mxu1 %v5464_v26  ;;  %v5524_v25 = vld [vmem:[%s7373_s0 + $0x5b0] ss:$72 sps:$4 sm:$0xff]   ;;  %v5525_v26 = vld [vmem:[%s7373_s0 + $0x6cc] ss:$72 sps:$4 sm:$0xff]  }
  0x5e   :  { %4767 = vmatprep.subr.bf16.mxu1 %v5473_v31  ;;  %v5539_v31 = vld [vmem:[%s7373_s0 + $0x1c] ss:$72 sps:$4 sm:$0xff]  }
  0x5f   :  { %4858 = vmatpush3.bf16.msra.mxu0 %v5450_v27  ;;  %v5527_v27 = vld [vmem:[%s7373_s0 + $0x644] ss:$72 sps:$4 sm:$0xff]  }
  0x60   :  { %4859 = vmatprep.subr.bf16.mxu0 %v5465_v28  ;;  %v5529_v28 = vld [vmem:[%s7373_s0 + $0x6c8] ss:$72 sps:$4 sm:$0xff]  }
  0x61   :  { %4768 = vmatpush3.bf16.msra.mxu1 %v5474_v32  ;;  %v5537_v32 = vld [vmem:[%s7373_s0 + $0x18] ss:$72 sps:$4 sm:$0xff]  }
  0x62   :  { %2764 = vmatmul.mubr.bf16.gmra.mxu1 %v5445_v29  ;;  %2893 = vmatmul.mubr.bf16.gmra.mxu0 %v5446_v30  ;;  %v5530_v29 = vld [vmem:[%s7373_s0 + $0x640] ss:$72 sps:$4 sm:$0xff]   ;;  %v5535_v30 = vld [vmem:[%s7373_s0 + $0x6d4] ss:$72 sps:$4 sm:$0xff]  }
  0x63   :  { %2771 = vmatprep.mubr.bf16.mxu1 %v5451_v33  ;;  %2900 = vmatprep.mubr.bf16.mxu0 %v5453_v34  ;;  %v5540_v33 = vld [vmem:[%s7373_s0 + $0x6d0] ss:$72 sps:$4 sm:$0xff]   ;;  %v5542_v34 = vld [vmem:[%s7373_s0 + $0xac] ss:$72 sps:$4 sm:$0xff]  }
  0x64   :  { %4860 = vmatpush3.bf16.msra.mxu0 %v5466_v35  ;;  %4769 = vmatprep.subr.bf16.mxu1 %v5489_v42  ;;  %v5546_v35 = vld [vmem:[%s7373_s0 + $0x24] ss:$72 sps:$4 sm:$0xff]  }
  0x65   :  { %4861 = vmatprep.subr.bf16.mxu0 %v5479_v36  ;;  %4770 = vmatpush3.bf16.msra.mxu1 %v5490_v43  ;;  %v5547_v36 = vld [vmem:[%s7372_s1 + $0x2b8] sm:$0xff]   ;;  %v5573_v42 = vld [vmem:[%s7372_s1 + $0x2e8] sm:$0xff]  }
  0x66   :  { %4771 = vmatprep.subr.bf16.mxu1 %v5503_v48  ;;  %v5551_v43 = vld [vmem:[%s7373_s0 + $0x13c] ss:$72 sps:$4 sm:$0xff]   ;;  %v5560_v48 = vld [vmem:[%s7372_s1 + $0x330] sm:$0xff]  }
  0x68   :  { %4862 = vmatpush3.bf16.msra.mxu0 %v5482_v39  ;;  %v5548_v39 = vld [vmem:[%s7373_s0 + $0xa8] ss:$72 sps:$4 sm:$0xff]  }
  0x69   :  { %4863 = vmatprep.subr.bf16.mxu0 %v5491_v44  ;;  %4772 = vmatpush3.bf16.msra.mxu1 %v5506_v51  ;;  %v5553_v44 = vld [vmem:[%s7373_s0 + $0xb4] ss:$72 sps:$4 sm:$0xff]   ;;  %v5575_v51 = vld [vmem:[%s7372_s1 + $0x368] sm:$0xff]  }
  0x6a   :  { %2772 = vmatmul.mubr.bf16.gmra.mxu1 %v5455_v37  ;;  %2901 = vmatmul.mubr.bf16.gmra.mxu0 %v5456_v38  ;;  %v5557_v37 = vld [vmem:[%s7372_s1 + $0x2f0] sm:$0xff]   ;;  %v5544_v38 = vld [vmem:[%s7373_s0 + $0x20] ss:$72 sps:$4 sm:$0xff]  }
  0x6b   :  { %2779 = vmatprep.mubr.bf16.mxu1 %v5457_v40  ;;  %2908 = vmatprep.mubr.bf16.mxu0 %v5459_v41  ;;  %v5558_v40 = vld [vmem:[%s7372_s1 + $0x2b0] sm:$0xff]   ;;  %v5550_v41 = vld [vmem:[%s7372_s1 + $0x338] sm:$0xff]  }
  0x6c   :  { %4864 = vmatpush3.bf16.msra.mxu0 %v5492_v45  ;;  %4773 = vmatprep.subr.bf16.mxu1 %v5515_v58  ;;  %v5559_v45 = vld [vmem:[%s7372_s1 + $0x370] sm:$0xff]   ;;  %v5600_v58 = vld [vmem:[%s7372_s1 + $0x298] sm:$0xff]  }
  0x6d   :  { %4865 = vmatprep.subr.bf16.mxu0 %v5507_v52  ;;  %4774 = vmatpush3.bf16.msra.mxu1 %v5516_v59  ;;  %v5561_v52 = vld [vmem:[%s7373_s0 + $0x1cc] ss:$72 sps:$4 sm:$0xff]  }
  0x6e   :  { %4775 = vmatprep.subr.bf16.mxu1 %v5531_v2  ;;  %v5615_v59 = vld [vmem:[%s7372_s1 + $0x2d0] sm:$0xff]  }
  0x6f   :  { %v5569_v2 = vld [vmem:[%s7373_s0 + $0x1d4] ss:$72 sps:$4 sm:$0xff]  }
  0x70   :  { %4866 = vmatpush3.bf16.msra.mxu0 %v5508_v53  ;;  %v5584_v53 = vld [vmem:[%s7372_s1 + $0x2a0] sm:$0xff]  }
  0x71   :  { %4867 = vmatprep.subr.bf16.mxu0 %v5517_v60  ;;  %4776 = vmatpush3.bf16.msra.mxu1 %v5532_v3  ;;  %v5592_v60 = vld [vmem:[%s7372_s1 + $0x320] sm:$0xff]   ;;  %v5602_v3 = vld [vmem:[%s7372_s1 + $0x318] sm:$0xff]  }
  0x72   :  { %2780 = vmatmul.mubr.bf16.gmra.mxu1 %v5461_v46  ;;  %2909 = vmatmul.mubr.bf16.gmra.mxu0 %v5462_v47  ;;  %v5574_v46 = vld [vmem:[%s7372_s1 + $0x2a8] sm:$0xff]   ;;  %v5583_v47 = vld [vmem:[%s7372_s1 + $0x2e0] sm:$0xff]  }
  0x73   :  { %2787 = vmatprep.mubr.bf16.mxu1 %v5467_v49  ;;  %2916 = vmatprep.mubr.bf16.mxu0 %v5469_v50  ;;  %v5555_v49 = vld [vmem:[%s7373_s0 + $0x138] ss:$72 sps:$4 sm:$0xff]  }
  0x74   :  { %4868 = vmatpush3.bf16.msra.mxu0 %v5522_v61  ;;  %4949 = vmatprep.subr.bf16.mxu1 %v5541_v9  ;;  %v5556_v50 = vld [vmem:[%s7373_s0 + $0xb0] ss:$72 sps:$4 sm:$0xff]  }
  0x75   :  { %4869 = vmatprep.subr.bf16.mxu0 %v5533_v4  ;;  %v5565_v61 = vld [vmem:[%s7373_s0 + $0x1c8] ss:$72 sps:$4 sm:$0xff]   ;;  %v5571_v9 = vld [vmem:[%s7373_s0 + $0x258] ss:$72 sps:$4 sm:$0xff]  }
  0x76   :  { %v5625_v4 = vld [vmem:[%s7372_s1 + $0x2c8] sm:$0xff]  }
  0x78   :  { %4870 = vmatpush3.bf16.msra.mxu0 %v5534_v5  ;;  %v5617_v5 = vld [vmem:[%s7372_s1 + $0x350] sm:$0xff]  }
  0x79   :  { %5043 = vmatprep.subr.bf16.mxu0 %v5549_v11  ;;  %v5627_v11 = vld [vmem:[%s7372_s1 + $0x348] sm:$0xff]  }
  0x7a   :  { %2788 = vmatmul.mubr.bf16.gmra.mxu1 %v5471_v54  ;;  %2917 = vmatmul.mubr.bf16.gmra.mxu0 %v5472_v55  ;;  %v5563_v54 = vld [vmem:[%s7373_s0 + $0x144] ss:$72 sps:$4 sm:$0xff]  }
  0x7b   :  { %2795 = vmatprep.mubr.bf16.mxu1 %v5475_v56  ;;  %2924 = vmatprep.mubr.bf16.mxu0 %v5477_v57  ;;  %v5576_v55 = vld [vmem:[%s7372_s1 + $0x328] sm:$0xff]   ;;  %v5589_v56 = vld [vmem:[%s7372_s1 + $0x360] sm:$0xff]   ;;  %v5599_v57 = vld [vmem:[%s7372_s1 + $0x2d8] sm:$0xff]  }
  0x82   :  { %2796 = vmatmul.mubr.bf16.gmra.mxu1 %v5480_v62  ;;  %2925 = vmatmul.mubr.bf16.gmra.mxu0 %v5481_v63  ;;  %v5566_v62 = vld [vmem:[%s7373_s0 + $0x140] ss:$72 sps:$4 sm:$0xff]   ;;  %v5601_v63 = vld [vmem:[%s7372_s1 + $0x358] sm:$0xff]  }
  0x83   :  { %2803 = vmatprep.mubr.bf16.mxu1 %v5483_v0  ;;  %2932 = vmatprep.mubr.bf16.mxu0 %v5485_v1  ;;  %v5567_v0 = vld [vmem:[%s7373_s0 + $0x25c] ss:$72 sps:$4 sm:$0xff]   ;;  %v5616_v1 = vld [vmem:[%s7372_s1 + $0x290] sm:$0xff]  }
  0x8a   :  { %2804 = vmatmul.mubr.bf16.gmra.mxu1 %v5487_v6  ;;  %2933 = vmatmul.mubr.bf16.gmra.mxu0 %v5488_v7  ;;  %v5626_v6 = vld [vmem:[%s7372_s1 + $0x288] sm:$0xff]   ;;  %v5641_v7 = vld [vmem:[%s7372_s1 + $0x2c0] sm:$0xff]  }
  0x8b   :  { %2811 = vmatprep.mubr.bf16.mxu1 %v5493_v8  ;;  %2940 = vmatprep.mubr.bf16.mxu0 %v5495_v10  ;;  %v5618_v8 = vld [vmem:[%s7372_s1 + $0x310] sm:$0xff]  }
  0x8c   :  { %v5572_v10 = vld [vmem:[%s7373_s0 + $0x1d0] ss:$72 sps:$4 sm:$0xff]  }
  0x92   :  { %2812 = vmatmul.mubr.bf16.gmra.mxu1 %v5497_v12  ;;  %2941 = vmatmul.mubr.bf16.gmra.mxu0 %v5498_v13  ;;  %v5642_v12 = vld [vmem:[%s7372_s1 + $0x280] sm:$0xff]   ;;  %v5577_v13 = vld [vmem:[%s7373_s0 + $0x2ec] ss:$72 sps:$4 sm:$0xff]  }
  0x93   :  { %2819 = vmatprep.mubr.bf16.mxu1 %v5499_v14  ;;  %2948 = vmatprep.mubr.bf16.mxu0 %v5501_v15  ;;  %v5579_v14 = vld [vmem:[%s7373_s0 + $0x264] ss:$72 sps:$4 sm:$0xff]  }
  0x94   :  { %v5634_v15 = vld [vmem:[%s7372_s1 + $0x308] sm:$0xff]  }
  0x9a   :  { %2820 = vmatmul.mubr.bf16.gmra.mxu1 %v5504_v16  ;;  %2949 = vmatmul.mubr.bf16.gmra.mxu0 %v5505_v17  ;;  %v5651_v16 = vld [vmem:[%s7372_s1 + $0x3f8] sm:$0xff]   ;;  %v5643_v17 = vld [vmem:[%s7372_s1 + $0x340] sm:$0xff]  }
  0x9b   :  { %2827 = vmatprep.mubr.bf16.mxu1 %v5509_v18  ;;  %2956 = vmatprep.mubr.bf16.mxu0 %v5511_v19  ;;  %v5581_v18 = vld [vmem:[%s7373_s0 + $0x2e8] ss:$72 sps:$4 sm:$0xff]  }
  0x9c   :  { %v5582_v19 = vld [vmem:[%s7373_s0 + $0x260] ss:$72 sps:$4 sm:$0xff]  }
  0xa2   :  { %2828 = vmatmul.mubr.bf16.gmra.mxu1 %v5513_v20  ;;  %2957 = vmatmul.mubr.bf16.gmra.mxu0 %v5514_v21  ;;  %v5644_v20 = vld [vmem:[%s7372_s1 + $0x300] sm:$0xff]   ;;  %v5659_v21 = vld [vmem:[%s7372_s1 + $0x478] sm:$0xff]  }
  0xa3   :  { %2835 = vmatprep.mubr.bf16.mxu1 %v5518_v22  ;;  %2964 = vmatprep.mubr.bf16.mxu0 %v5520_v23  ;;  %v5585_v22 = vld [vmem:[%s7373_s0 + $0x37c] ss:$72 sps:$4 sm:$0xff]  }
  0xa4   :  { %v5587_v23 = vld [vmem:[%s7373_s0 + $0x2f4] ss:$72 sps:$4 sm:$0xff]  }
  0xaa   :  { %2836 = vmatmul.mubr.bf16.gmra.mxu1 %v5523_v24  ;;  %2965 = vmatmul.mubr.bf16.gmra.mxu0 %v5524_v25 }
  0xab   :  { %2843 = vmatprep.mubr.bf16.mxu1 %v5525_v26  ;;  %2972 = vmatprep.mubr.bf16.mxu0 %v5527_v27 }
  0xb2   :  { %2844 = vmatmul.mubr.bf16.gmra.mxu1 %v5529_v28  ;;  %2973 = vmatmul.mubr.bf16.gmra.mxu0 %v5530_v29  ;;  %v5590_v28 = vld [vmem:[%s7373_s0 + $0x378] ss:$72 sps:$4 sm:$0xff]  }
  0xb3   :  { %2980 = vmatprep.mubr.bf16.mxu0 %v5535_v30  ;;  %3021 = vmatprep.mubr.bf16.mxu1 %v5539_v31  ;;  %v5591_v31 = vld [vmem:[%s7373_s0 + $0x2f0] ss:$72 sps:$4 sm:$0xff]  }
  0xba   :  { %2981 = vmatmul.mubr.bf16.gmra.mxu0 %v5540_v33  ;;  %3022 = vmatmul.mubr.bf16.vlgmr.msra.gmra.mxu1 %v5537_v32 }
  0xbb   :  { %3029 = vmatprep.mubr.bf16.mxu1 %v5542_v34  ;;  %3158 = vmatprep.mubr.bf16.mxu0 %v5546_v35  ;;  %v5593_v34 = vld [vmem:[%s7373_s0 + $0x40c] ss:$72 sps:$4 sm:$0xff]  }
  0xbc   :  { %4950 = vmatpush3.bf16.msra.mxu1 %v5547_v36  ;;  %v5595_v35 = vld [vmem:[%s7373_s0 + $0x384] ss:$72 sps:$4 sm:$0xff]  }
  0xbd   :  { %4951 = vmatprep.subr.bf16.mxu1 %v5557_v37 }
  0xc0   :  { %4952 = vmatpush3.bf16.msra.mxu1 %v5558_v40 }
  0xc1   :  { %4953 = vmatprep.subr.bf16.mxu1 %v5573_v42  ;;  %v6527_v42 = vld [vmem:[%s7374_s2] ss:$0 sm:$0xff] }
  0xc2   :  { %3030 = vmatmul.mubr.bf16.gmra.mxu1 %v5548_v39  ;;  %3159 = vmatmul.mubr.bf16.vlgmr.msra.gmra.mxu0 %v5544_v38 }
  0xc3   :  { %5044 = vmatpush3.bf16.msra.mxu0 %v5550_v41  ;;  %3037 = vmatprep.mubr.bf16.mxu1 %v5551_v43 }
  0xc4   :  { %3166 = vmatprep.mubr.bf16.mxu0 %v5553_v44  ;;  %5045 = vmatprep.subr.bf16.mxu0 %v5559_v45  ;;  %v5597_v45 = vld [vmem:[%s7373_s0 + $0x408] ss:$72 sps:$4 sm:$0xff]  }
  0xc5   :  { %4954 = vmatpush3.bf16.msra.mxu1 %v5574_v46 }
  0xc6   :  { %4955 = vmatprep.subr.bf16.mxu1 %v5583_v47 }
  0xc7   :  { %5046 = vmatpush3.bf16.msra.mxu0 %v5560_v48  ;;  %v5598_v48 = vld [vmem:[%s7373_s0 + $0x380] ss:$72 sps:$4 sm:$0xff]  }
  0xc8   :  { %5047 = vmatprep.subr.bf16.mxu0 %v5575_v51  ;;  %v5603_v51 = vld [vmem:[%s7373_s0 + $0x49c] ss:$72 sps:$4 sm:$0xff]  }
  0xc9   :  { %4956 = vmatpush3.bf16.msra.mxu1 %v5584_v53  ;;  %v5605_v53 = vld [vmem:[%s7373_s0 + $0x414] ss:$72 sps:$4 sm:$0xff]  }
  0xca   :  { %3038 = vmatmul.mubr.bf16.gmra.mxu1 %v5555_v49  ;;  %3167 = vmatmul.mubr.bf16.gmra.mxu0 %v5556_v50 }
  0xcb   :  { %3045 = vmatprep.mubr.bf16.mxu1 %v5561_v52  ;;  %3174 = vmatprep.mubr.bf16.mxu0 %v5563_v54 }
  0xcc   :  { %5048 = vmatpush3.bf16.msra.mxu0 %v5576_v55  ;;  %4957 = vmatprep.subr.bf16.mxu1 %v5599_v57 }
  0xcd   :  { %5049 = vmatprep.subr.bf16.mxu0 %v5589_v56  ;;  %4958 = vmatpush3.bf16.msra.mxu1 %v5600_v58 }
  0xce   :  { %4959 = vmatprep.subr.bf16.mxu1 %v5615_v59 }
  0xd0   :  { %5050 = vmatpush3.bf16.msra.mxu0 %v5592_v60 }
  0xd1   :  { %5051 = vmatprep.subr.bf16.mxu0 %v5601_v63  ;;  %4960 = vmatpush3.bf16.msra.mxu1 %v5616_v1  ;;  %v5607_v63 = vld [vmem:[%s7373_s0 + $0x498] ss:$72 sps:$4 sm:$0xff]  }
  0xd2   :  { %3046 = vmatmul.mubr.bf16.gmra.mxu1 %v5565_v61  ;;  %3175 = vmatmul.mubr.bf16.gmra.mxu0 %v5566_v62 }
  0xd3   :  { %3053 = vmatprep.mubr.bf16.mxu1 %v5567_v0  ;;  %3182 = vmatprep.mubr.bf16.mxu0 %v5569_v2  ;;  %v5608_v2 = vld [vmem:[%s7373_s0 + $0x410] ss:$72 sps:$4 sm:$0xff]  }
  0xd4   :  { %5052 = vmatpush3.bf16.msra.mxu0 %v5602_v3  ;;  %4961 = vmatprep.subr.bf16.mxu1 %v5625_v4 }
  0xd5   :  { %5053 = vmatprep.subr.bf16.mxu0 %v5617_v5  ;;  %4962 = vmatpush3.bf16.msra.mxu1 %v5626_v6  ;;  %v5611_v5 = vld [vmem:[%s7373_s0 + $0x52c] ss:$72 sps:$4 sm:$0xff]  }
  0xd6   :  { %4963 = vmatprep.subr.bf16.mxu1 %v5641_v7  ;;  %v5614_v7 = vld [vmem:[%s7373_s0 + $0x4a4] ss:$72 sps:$4 sm:$0xff]  }
  0xd8   :  { %5054 = vmatpush3.bf16.msra.mxu0 %v5618_v8 }
  0xd9   :  { %5055 = vmatprep.subr.bf16.mxu0 %v5627_v11  ;;  %4964 = vmatpush3.bf16.msra.mxu1 %v5642_v12 }
  0xda   :  { %3054 = vmatmul.mubr.bf16.gmra.mxu1 %v5571_v9  ;;  %3183 = vmatmul.mubr.bf16.gmra.mxu0 %v5572_v10 }
  0xdb   :  { %3061 = vmatprep.mubr.bf16.mxu1 %v5577_v13  ;;  %3190 = vmatprep.mubr.bf16.mxu0 %v5579_v14 }
  0xdc   :  { %5056 = vmatpush3.bf16.msra.mxu0 %v5634_v15  ;;  %5137 = vmatprep.subr.bf16.mxu1 %v5651_v16 }
  0xdd   :  { %5057 = vmatprep.subr.bf16.mxu0 %v5643_v17  ;;  %v5609_v17 = vld [vmem:[%s7373_s0 + $0x528] ss:$72 sps:$4 sm:$0xff]  }
  0xe0   :  { %5058 = vmatpush3.bf16.msra.mxu0 %v5644_v20  ;;  %v5612_v20 = vld [vmem:[%s7373_s0 + $0x4a0] ss:$72 sps:$4 sm:$0xff]  }
  0xe1   :  { %5231 = vmatprep.subr.bf16.mxu0 %v5659_v21 }
  0xe2   :  { %v4495_v24 = vpop.f32.mrf.mxu0  ;;  %v4537_v25 = vpop.f32.mrf.mxu1  ;;  %3062 = vmatmul.mubr.bf16.gmra.mxu1 %v5581_v18  ;;  %3191 = vmatmul.mubr.bf16.gmra.mxu0 %v5582_v19 }
  0xe3   :  { %3069 = vmatprep.mubr.bf16.mxu1 %v5585_v22  ;;  %3198 = vmatprep.mubr.bf16.mxu0 %v5587_v23  ;;  %v5621_v23 = vld [vmem:[%s7373_s0 + $0x5bc] ss:$72 sps:$4 sm:$0xff]  }
  0xe4   :  { %v4496_v26 = vpop.f32.mrf.mxu0  ;;  %v4538_v27 = vpop.f32.mrf.mxu1 }
  0xe5   :  { %v6507_v29 = vadd.f32 %v4496_v26, %v4495_v24  ;;  %v6509_v30 = vadd.f32 %v4538_v27, %v4537_v25  ;;  %v5624_v25 = vld [vmem:[%s7373_s0 + $0x534] ss:$72 sps:$4 sm:$0xff]  }
  0xe6   :  { %v4498_v32 = vpop.f32.mrf.mxu0  ;;  %v4540_v33 = vpop.f32.mrf.mxu1 }
  0xe8   :  { %v4499_v36 = vpop.f32.mrf.mxu0  ;;  %v4541_v37 = vpop.f32.mrf.mxu1 }
  0xe9   :  { %v6520_v38 = vadd.f32 %v4499_v36, %v4498_v32  ;;  %v6522_v39 = vadd.f32 %v4541_v37, %v4540_v33  ;;  %v5619_v37 = vld [vmem:[%s7373_s0 + $0x5b8] ss:$72 sps:$4 sm:$0xff]  }
  0xea   :  { %v4501_v40 = vpop.f32.mrf.mxu0  ;;  %v4543_v41 = vpop.f32.mrf.mxu1  ;;  %3070 = vmatmul.mubr.bf16.gmra.mxu1 %v5590_v28  ;;  %3199 = vmatmul.mubr.bf16.gmra.mxu0 %v5591_v31 }
  0xeb   :  { %3077 = vmatprep.mubr.bf16.mxu1 %v5593_v34  ;;  %3206 = vmatprep.mubr.bf16.mxu0 %v5595_v35 }
  0xec   :  { %v4502_v43 = vpop.f32.mrf.mxu0  ;;  %v4544_v44 = vpop.f32.mrf.mxu1 }
  0xed   :  { %v6532_v46 = vadd.f32 %v4502_v43, %v4501_v40  ;;  %v4545_v47 = vadd.f32 %v4544_v44, %v4543_v41  ;;  %v5622_v43 = vld [vmem:[%s7373_s0 + $0x530] ss:$72 sps:$4 sm:$0xff]  }
  0xee   :  { %v4504_v49 = vpop.f32.mrf.mxu0  ;;  %v4546_v50 = vpop.f32.mrf.mxu1 }
  0xef   :  { %v6541_v52 = vadd.f32 %v4545_v47, %v6527_v42  ;;  %v5630_v47 = vld [vmem:[%s7373_s0 + $0x64c] ss:$72 sps:$4 sm:$0xff]  }
  0xf0   :  { %v4505_v54 = vpop.f32.mrf.mxu0  ;;  %v4547_v55 = vpop.f32.mrf.mxu1 }
  0xf1   :  { %v6546_v56 = vadd.f32 %v4505_v54, %v4504_v49  ;;  %v4548_v57 = vadd.f32 %v4547_v55, %v4546_v50  ;;  %v5633_v49 = vld [vmem:[%s7373_s0 + $0x5c4] ss:$72 sps:$4 sm:$0xff]  }
  0xf2   :  { %v4507_v58 = vpop.f32.mrf.mxu0  ;;  %v4549_v59 = vpop.f32.mrf.mxu1  ;;  %3078 = vmatmul.mubr.bf16.gmra.mxu1 %v5597_v45  ;;  %3207 = vmatmul.mubr.bf16.gmra.mxu0 %v5598_v48 }
  0xf3   :  { %v6549_v60 = vadd.f32 %v4548_v57, %v6527_v42  ;;  %3085 = vmatprep.mubr.bf16.mxu1 %v5603_v51  ;;  %3214 = vmatprep.mubr.bf16.mxu0 %v5605_v53 }
  0xf4   :  { %v4508_v61 = vpop.f32.mrf.mxu0  ;;  %v4550_v62 = vpop.f32.mrf.mxu1 }
  0xf5   :  { %v6554_v0 = vadd.f32 %v4508_v61, %v4507_v58  ;;  %v4551_v1 = vadd.f32 %v4550_v62, %v4549_v59  ;;  %v5628_v62 = vld [vmem:[%s7373_s0 + $0x648] ss:$72 sps:$4 sm:$0xff]  }
  0xf6   :  { %v4510_v3 = vpop.f32.mrf.mxu0  ;;  %v4552_v4 = vpop.f32.mrf.mxu1 }
  0xf7   :  { %v6563_v6 = vadd.f32 %v4551_v1, %v6527_v42 }
  0xf8   :  { %v4511_v8 = vpop.f32.mrf.mxu0  ;;  %v4553_v9 = vpop.f32.mrf.mxu1 }
  0xf9   :  { %v6568_v10 = vadd.f32 %v4511_v8, %v4510_v3  ;;  %v4554_v11 = vadd.f32 %v4553_v9, %v4552_v4  ;;  %v5640_v8 = vld [vmem:[%s7373_s0 + $0x654] ss:$72 sps:$4 sm:$0xff]  }
  0xfa   :  { %v4513_v12 = vpop.f32.mrf.mxu0  ;;  %v4555_v13 = vpop.f32.mrf.mxu1  ;;  %3086 = vmatmul.mubr.bf16.gmra.mxu1 %v5607_v63  ;;  %3215 = vmatmul.mubr.bf16.gmra.mxu0 %v5608_v2  ;;  %v5631_v63 = vld [vmem:[%s7373_s0 + $0x5c0] ss:$72 sps:$4 sm:$0xff]  }
  0xfb   :  { %v6571_v14 = vadd.f32 %v4554_v11, %v6527_v42  ;;  %3093 = vmatprep.mubr.bf16.mxu1 %v5611_v5  ;;  %3222 = vmatprep.mubr.bf16.mxu0 %v5614_v7  ;;  %v5637_v7 = vld [vmem:[%s7373_s0 + $0x6dc] ss:$72 sps:$4 sm:$0xff]  }
  0xfc   :  { %v4514_v15 = vpop.f32.mrf.mxu0  ;;  %v4556_v16 = vpop.f32.mrf.mxu1 }
  0xfd   :  { %v6576_v18 = vadd.f32 %v4514_v15, %v4513_v12  ;;  %v4557_v19 = vadd.f32 %v4556_v16, %v4555_v13 }
  0xfe   :  { %v4516_v21 = vpop.f32.mrf.mxu0  ;;  %v4558_v22 = vpop.f32.mrf.mxu1 }
  0xff   :  { %v6585_v24 = vadd.f32 %v4557_v19, %v6527_v42 }
 0x100   :  { %v4517_v26 = vpop.f32.mrf.mxu0  ;;  %v4559_v27 = vpop.f32.mrf.mxu1 }
 0x101   :  { %v6590_v28 = vadd.f32 %v4517_v26, %v4516_v21  ;;  %v4560_v31 = vadd.f32 %v4559_v27, %v4558_v22  ;;  %v5635_v21 = vld [vmem:[%s7373_s0 + $0x6d8] ss:$72 sps:$4 sm:$0xff]  }
 0x102   :  { %v4519_v32 = vpop.f32.mrf.mxu0  ;;  %v4561_v33 = vpop.f32.mrf.mxu1  ;;  %3094 = vmatmul.mubr.bf16.gmra.mxu1 %v5609_v17  ;;  %3223 = vmatmul.mubr.bf16.gmra.mxu0 %v5612_v20  ;;  %v5638_v22 = vld [vmem:[%s7373_s0 + $0x650] ss:$72 sps:$4 sm:$0xff]  }
 0x103   :  { %v6593_v34 = vadd.f32 %v4560_v31, %v6527_v42  ;;  %3101 = vmatprep.mubr.bf16.mxu1 %v5621_v23  ;;  %3230 = vmatprep.mubr.bf16.mxu0 %v5624_v25  ;;  %v2613_v23 = vadd.f32 %v6507_v29, %v6527_v42 }
 0x104   :  { %v4520_v35 = vpop.f32.mrf.mxu0  ;;  %v4562_v36 = vpop.f32.mrf.mxu1 }
 0x105   :  { %v6598_v40 = vadd.f32 %v4520_v35, %v4519_v32  ;;  %v4563_v41 = vadd.f32 %v4562_v36, %v4561_v33  ;;  %v5647_v33 = vld [vmem:[%s7373_s0 + $0x6e4] ss:$72 sps:$4 sm:$0xff]  }
 0x106   :  { %v4522_v44 = vpop.f32.mrf.mxu0  ;;  %v4564_v45 = vpop.f32.mrf.mxu1  ;;  %v5650_v35 = vld [vmem:[%s7373_s0 + $0x2c] ss:$72 sps:$4 sm:$0xff]  }
 0x107   :  { %v6607_v48 = vadd.f32 %v4563_v41, %v6527_v42  ;;  %v2616_v41 = vadd.f32 %v6520_v38, %v6527_v42  ;;  %v5645_v38 = vld [vmem:[%s7373_s0 + $0x6e0] ss:$72 sps:$4 sm:$0xff]  }
 0x108   :  { %v4523_v50 = vpop.f32.mrf.mxu0  ;;  %v4565_v51 = vpop.f32.mrf.mxu1 }
 0x109   :  { %v6612_v53 = vadd.f32 %v4523_v50, %v4522_v44  ;;  %v4566_v54 = vadd.f32 %v4565_v51, %v4564_v45  ;;  %v2621_v51 = vadd.f32 %v6532_v46, %v6527_v42  ;;  %v5657_v46 = vld [vmem:[%s7373_s0 + $0x34] ss:$72 sps:$4 sm:$0xff]  }
 0x10a   :  { %v4525_v55 = vpop.f32.mrf.mxu0  ;;  %v4567_v57 = vpop.f32.mrf.mxu1  ;;  %3102 = vmatmul.mubr.bf16.gmra.mxu1 %v5619_v37  ;;  %3231 = vmatmul.mubr.bf16.gmra.mxu0 %v5622_v43 }
 0x10b   :  { %v6615_v58 = vadd.f32 %v4566_v54, %v6527_v42  ;;  %3109 = vmatprep.mubr.bf16.mxu1 %v5630_v47  ;;  %3238 = vmatprep.mubr.bf16.mxu0 %v5633_v49 }
 0x10c   :  { %v4526_v59 = vpop.f32.mrf.mxu0  ;;  %v4568_v61 = vpop.f32.mrf.mxu1 }
 0x10d   :  { %v6623_v1 = vadd.f32 %v4526_v59, %v4525_v55  ;;  %v4569_v2 = vadd.f32 %v4568_v61, %v4567_v57  ;;  %v5648_v61 = vld [vmem:[%s7373_s0 + $0x28] ss:$72 sps:$4 sm:$0xff]  }
 0x10e   :  { %v4528_v3 = vpop.f32.mrf.mxu0  ;;  %v4570_v4 = vpop.f32.mrf.mxu1 }
 0x10f   :  { %v6626_v5 = vadd.f32 %v4569_v2, %v6527_v42  ;;  %v5654_v2 = vld [vmem:[%s7373_s0 + $0xbc] ss:$72 sps:$4 sm:$0xff]  }
 0x110   :  { %v4529_v9 = vpop.f32.mrf.mxu0  ;;  %v4571_v11 = vpop.f32.mrf.mxu1 }
 0x111   :  { %v6634_v12 = vadd.f32 %v4529_v9, %v4528_v3  ;;  %v4572_v13 = vadd.f32 %v4571_v11, %v4570_v4 }
 0x112   :  { %v4531_v15 = vpop.f32.mrf.mxu0  ;;  %v4589_v16 = vpop.f32.mrf.mxu1  ;;  %3110 = vmatmul.mubr.bf16.gmra.mxu1 %v5628_v62  ;;  %3239 = vmatmul.mubr.bf16.gmra.mxu0 %v5631_v63 }
 0x113   :  { %v6637_v17 = vadd.f32 %v4572_v13, %v6527_v42  ;;  %3117 = vmatprep.mubr.bf16.mxu1 %v5637_v7  ;;  %3246 = vmatprep.mubr.bf16.mxu0 %v5640_v8  ;;  %v5658_v7 = vld [vmem:[%s7372_s1 + $0x3b8] sm:$0xff]   ;;  %v2624_v8 = vadd.f32 %v6546_v56, %v6527_v42  ;;  %v5667_v13 = vld [vmem:[%s7372_s1 + $0x3f0] sm:$0xff]  }
 0x114   :  { %v4532_v19 = vpop.f32.mrf.mxu0  ;;  %v4590_v20 = vpop.f32.mrf.mxu1  ;;  %v5668_v56 = vld [vmem:[%s7372_s1 + $0x3b0] sm:$0xff]  }
 0x115   :  { %v6647_v25 = vadd.f32 %v4532_v19, %v4531_v15  ;;  %v4591_v26 = vadd.f32 %v4590_v20, %v4589_v16 }
 0x116   :  { %v4534_v27 = vpop.f32.mrf.mxu0  ;;  %v4592_v31 = vpop.f32.mrf.mxu1 }
 0x117   :  { %v2750_v32 = vadd.f32 %v4591_v26, %v2613_v23  ;;  %v2629_v23 = vadd.f32 %v6554_v0, %v6527_v42  ;;  %v5660_v0 = vld [vmem:[%s7372_s1 + $0x438] sm:$0xff]  }
 0x118   :  { %v4535_v36 = vpop.f32.mrf.mxu0  ;;  %v4593_v37 = vpop.f32.mrf.mxu1 }
 0x119   :  { %v6657_v29 = vadd.f32 %v4535_v36, %v4534_v27  ;;  %v4594_v43 = vadd.f32 %v4593_v37, %v4592_v31  ;;  %v5683_v31 = vld [vmem:[%s7372_s1 + $0x3e8] sm:$0xff]   ;;  %v5655_v36 = vld [vmem:[%s7373_s0 + $0x30] ss:$72 sps:$4 sm:$0xff]  }
 0x11a   :  { %v4595_v44 = vpop.f32.mrf.mxu1  ;;  %v4683_v45 = vpop.f32.mrf.mxu0  ;;  %3118 = vmatmul.mubr.bf16.gmra.mxu1 %v5635_v21  ;;  %3247 = vmatmul.mubr.bf16.gmra.mxu0 %v5638_v22 }
 0x11b   :  { %v2753_v47 = vadd.f32 %v4594_v43, %v2616_v41  ;;  %3254 = vmatprep.mubr.bf16.mxu0 %v5647_v33  ;;  %3295 = vmatprep.mubr.bf16.mxu1 %v5650_v35  ;;  %v5652_v35 = vld [vmem:[%s7373_s0 + $0xb8] ss:$72 sps:$4 sm:$0xff]   ;;  %v5663_v43 = vld [vmem:[%s7373_s0 + $0x14c] ss:$72 sps:$4 sm:$0xff]  }
 0x11c   :  { %v4596_v49 = vpop.f32.mrf.mxu1  ;;  %v4684_v50 = vpop.f32.mrf.mxu0 }
 0x11d   :  { %v4597_v54 = vadd.f32 %v4596_v49, %v4595_v44  ;;  %v4685_v55 = vadd.f32 %v4684_v50, %v4683_v45  ;;  %v5669_v49 = vld [vmem:[%s7372_s1 + $0x470] sm:$0xff]   ;;  %v2632_v50 = vadd.f32 %v6568_v10, %v6527_v42 }
 0x11e   :  { %v4598_v57 = vpop.f32.mrf.mxu1  ;;  %v4686_v59 = vpop.f32.mrf.mxu0  ;;  %v5670_v10 = vld [vmem:[%s7372_s1 + $0x430] sm:$0xff]  }
 0x11f   :  { %v2758_v62 = vadd.f32 %v4597_v54, %v2621_v51  ;;  %v6667_v63 = vadd.f32 %v4685_v55, %v2750_v32  ;;  %v5684_v55 = vld [vmem:[%s7372_s1 + $0x3a8] sm:$0xff]  }
 0x120   :  { %v4599_v3 = vpop.f32.mrf.mxu1  ;;  %v4687_v4 = vpop.f32.mrf.mxu0 }
 0x121   :  { %v4600_v9 = vadd.f32 %v4599_v3, %v4598_v57  ;;  %v4688_v11 = vadd.f32 %v4687_v4, %v4686_v59  ;;  %v5685_v3 = vld [vmem:[%s7372_s1 + $0x468] sm:$0xff]   ;;  %v2637_v4 = vadd.f32 %v6576_v18, %v6527_v42 }
 0x122   :  { %v4601_v15 = vpop.f32.mrf.mxu1  ;;  %v4689_v16 = vpop.f32.mrf.mxu0  ;;  %3255 = vmatmul.mubr.bf16.gmra.mxu0 %v5645_v38  ;;  %3296 = vmatmul.mubr.bf16.vlgmr.msra.gmra.mxu1 %v5648_v61  ;;  %v5693_v38 = vld [vmem:[%s7372_s1 + $0x3e0] sm:$0xff]  }
 0x123   :  { %v2761_v19 = vadd.f32 %v4600_v9, %v2624_v8  ;;  %v6683_v20 = vadd.f32 %v4688_v11, %v2753_v47  ;;  %3303 = vmatprep.mubr.bf16.mxu1 %v5654_v2  ;;  %3432 = vmatprep.mubr.bf16.mxu0 %v5657_v46  ;;  %v5666_v47 = vld [vmem:[%s7373_s0 + $0xc4] ss:$72 sps:$4 sm:$0xff]  }
 0x124   :  { %v4602_v21 = vpop.f32.mrf.mxu1  ;;  %v4690_v22 = vpop.f32.mrf.mxu0  ;;  %5138 = vmatpush3.bf16.msra.mxu1 %v5658_v7  ;;  %v5694_v9 = vld [vmem:[%s7372_s1 + $0x3a0] sm:$0xff]  }
 0x125   :  { %v4603_v26 = vadd.f32 %v4602_v21, %v4601_v15  ;;  %v4691_v27 = vadd.f32 %v4690_v22, %v4689_v16  ;;  %5139 = vmatprep.subr.bf16.mxu1 %v5667_v13  ;;  %v5661_v15 = vld [vmem:[%s7373_s0 + $0x148] ss:$72 sps:$4 sm:$0xff]   ;;  %v5673_v21 = vld [vmem:[%s7373_s0 + $0x1dc] ss:$72 sps:$4 sm:$0xff]  }
 0x126   :  { %v4604_v32 = vpop.f32.mrf.mxu1  ;;  %v4692_v33 = vpop.f32.mrf.mxu0  ;;  %v5664_v16 = vld [vmem:[%s7373_s0 + $0xc0] ss:$72 sps:$4 sm:$0xff]   ;;  %v5676_v22 = vld [vmem:[%s7373_s0 + $0x154] ss:$72 sps:$4 sm:$0xff]  }
 0x127   :  { %v2766_v37 = vadd.f32 %v4603_v26, %v2629_v23  ;;  %v6699_v41 = vadd.f32 %v4691_v27, %v2758_v62  ;;  %v5686_v26 = vld [vmem:[%s7372_s1 + $0x428] sm:$0xff]   ;;  %v5709_v27 = vld [vmem:[%s7372_s1 + $0x3d8] sm:$0xff]  }
 0x128   :  { %v4605_v44 = vpop.f32.mrf.mxu1  ;;  %v4693_v45 = vpop.f32.mrf.mxu0  ;;  %5140 = vmatpush3.bf16.msra.mxu1 %v5668_v56 }
 0x129   :  { %v4606_v51 = vadd.f32 %v4605_v44, %v4604_v32  ;;  %v4694_v54 = vadd.f32 %v4693_v45, %v4692_v33  ;;  %5141 = vmatprep.subr.bf16.mxu1 %v5683_v31  ;;  %v2640_v31 = vadd.f32 %v6590_v28, %v6527_v42 }
 0x12a   :  { %v4607_v57 = vpop.f32.mrf.mxu1  ;;  %v4695_v59 = vpop.f32.mrf.mxu0  ;;  %3304 = vmatmul.mubr.bf16.gmra.mxu1 %v5652_v35  ;;  %3433 = vmatmul.mubr.bf16.vlgmr.msra.gmra.mxu0 %v5655_v36  ;;  %v5701_v35 = vld [vmem:[%s7372_s1 + $0x460] sm:$0xff]   ;;  %v5710_v36 = vld [vmem:[%s7372_s1 + $0x398] sm:$0xff]  }
 0x12b   :  { %v2769_v61 = vadd.f32 %v4606_v51, %v2632_v50  ;;  %v6721_v62 = vadd.f32 %v4694_v54, %v2761_v19  ;;  %5232 = vmatpush3.bf16.msra.mxu0 %v5660_v0  ;;  %3311 = vmatprep.mubr.bf16.mxu1 %v5663_v43  ;;  %v5725_v43 = vld [vmem:[%s7372_s1 + $0x3d0] sm:$0xff]   ;;  %v2645_v50 = vadd.f32 %v6598_v40, %v6527_v42 }
 0x12c   :  { %v4608_v2 = vpop.f32.mrf.mxu1  ;;  %v4696_v46 = vpop.f32.mrf.mxu0  ;;  %3440 = vmatprep.mubr.bf16.mxu0 %v5666_v47  ;;  %5233 = vmatprep.subr.bf16.mxu0 %v5669_v49  ;;  %v5702_v49 = vld [vmem:[%s7372_s1 + $0x420] sm:$0xff]   ;;  %v5674_v40 = vld [vmem:[%s7373_s0 + $0x150] ss:$72 sps:$4 sm:$0xff]  }
 0x12d   :  { %v4609_v7 = vadd.f32 %v4608_v2, %v4607_v57  ;;  %v4697_v8 = vadd.f32 %v4696_v46, %v4695_v59  ;;  %5142 = vmatpush3.bf16.msra.mxu1 %v5684_v55  ;;  %v5711_v55 = vld [vmem:[%s7372_s1 + $0x458] sm:$0xff]   ;;  %v5726_v57 = vld [vmem:[%s7372_s1 + $0x390] sm:$0xff]  }
 0x12e   :  { %v4610_v11 = vpop.f32.mrf.mxu1  ;;  %v4698_v13 = vpop.f32.mrf.mxu0  ;;  %5143 = vmatprep.subr.bf16.mxu1 %v5693_v38  ;;  %v5679_v46 = vld [vmem:[%s7373_s0 + $0x26c] ss:$72 sps:$4 sm:$0xff]  }
 0x12f   :  { %v2774_v19 = vadd.f32 %v4609_v7, %v2637_v4  ;;  %v6740_v18 = vadd.f32 %v4697_v8, %v2766_v37  ;;  %5234 = vmatpush3.bf16.msra.mxu0 %v5670_v10  ;;  %v5712_v8 = vld [vmem:[%s7372_s1 + $0x418] sm:$0xff]  }
 0x130   :  { %v4611_v56 = vpop.f32.mrf.mxu1  ;;  %v4699_v23 = vpop.f32.mrf.mxu0  ;;  %5235 = vmatprep.subr.bf16.mxu0 %v5685_v3  ;;  %v5682_v3 = vld [vmem:[%s7373_s0 + $0x1e4] ss:$72 sps:$4 sm:$0xff]  }
 0x131   :  { %v4612_v32 = vadd.f32 %v4611_v56, %v4610_v11  ;;  %v4700_v33 = vadd.f32 %v4699_v23, %v4698_v13  ;;  %5144 = vmatpush3.bf16.msra.mxu1 %v5694_v9  ;;  %v5735_v9 = vld [vmem:[%s7372_s1 + $0x3c8] sm:$0xff]   ;;  %v2648_v11 = vadd.f32 %v6612_v53, %v6527_v42  ;;  %v5751_v53 = vld [vmem:[%s7372_s1 + $0x3c0] sm:$0xff]  }
 0x132   :  { %v4613_v37 = vpop.f32.mrf.mxu1  ;;  %v4701_v0 = vpop.f32.mrf.mxu0  ;;  %3312 = vmatmul.mubr.bf16.gmra.mxu1 %v5661_v15  ;;  %3441 = vmatmul.mubr.bf16.gmra.mxu0 %v5664_v16  ;;  %v5727_v16 = vld [vmem:[%s7372_s1 + $0x450] sm:$0xff]  }
 0x133   :  { %v2777_v28 = vadd.f32 %v4612_v32, %v2640_v31  ;;  %v6765_v44 = vadd.f32 %v4700_v33, %v2769_v61  ;;  %3319 = vmatprep.mubr.bf16.mxu1 %v5673_v21  ;;  %3448 = vmatprep.mubr.bf16.mxu0 %v5676_v22  ;;  %v5671_v61 = vld [vmem:[%s7373_s0 + $0x1d8] ss:$72 sps:$4 sm:$0xff]   ;;  %v5728_v31 = vld [vmem:[%s7372_s1 + $0x410] sm:$0xff]   ;;  %v2653_v32 = vadd.f32 %v6623_v1, %v6527_v42 }
 0x134   :  { %v4614_v45 = vpop.f32.mrf.mxu1  ;;  %v4702_v47 = vpop.f32.mrf.mxu0  ;;  %5236 = vmatpush3.bf16.msra.mxu0 %v5686_v26  ;;  %5145 = vmatprep.subr.bf16.mxu1 %v5709_v27  ;;  %v5680_v1 = vld [vmem:[%s7373_s0 + $0x1e0] ss:$72 sps:$4 sm:$0xff]  }
 0x135   :  { %v4615_v51 = vadd.f32 %v4614_v45, %v4613_v37  ;;  %v4703_v54 = vadd.f32 %v4702_v47, %v4701_v0  ;;  %5237 = vmatprep.subr.bf16.mxu0 %v5701_v35  ;;  %5146 = vmatpush3.bf16.msra.mxu1 %v5710_v36  ;;  %v5737_v36 = vld [vmem:[%s7372_s1 + $0x448] sm:$0xff]   ;;  %v5752_v37 = vld [vmem:[%s7372_s1 + $0x380] sm:$0xff]  }
 0x136   :  { %v4616_v59 = vpop.f32.mrf.mxu1  ;;  %v4704_v38 = vpop.f32.mrf.mxu0  ;;  %5147 = vmatprep.subr.bf16.mxu1 %v5725_v43 }
 0x137   :  { %v2782_v10 = vadd.f32 %v4615_v51, %v2645_v50  ;;  %v6784_v2 = vadd.f32 %v4703_v54, %v2774_v19  ;;  %v5736_v19 = vld [vmem:[%s7372_s1 + $0x388] sm:$0xff]   ;;  %v5692_v50 = vld [vmem:[%s7373_s0 + $0x274] ss:$72 sps:$4 sm:$0xff]  }
 0x138   :  { %v4617_v4 = vpop.f32.mrf.mxu1  ;;  %v4705_v7 = vpop.f32.mrf.mxu0  ;;  %5238 = vmatpush3.bf16.msra.mxu0 %v5702_v49  ;;  %v5689_v49 = vld [vmem:[%s7373_s0 + $0x2fc] ss:$72 sps:$4 sm:$0xff]  }
 0x139   :  { %v4618_v13 = vadd.f32 %v4617_v4, %v4616_v59  ;;  %v4706_v15 = vadd.f32 %v4705_v7, %v4704_v38  ;;  %5239 = vmatprep.subr.bf16.mxu0 %v5711_v55  ;;  %5148 = vmatpush3.bf16.msra.mxu1 %v5726_v57  ;;  %v5744_v55 = vld [vmem:[%s7372_s1 + $0x408] sm:$0xff]   ;;  %v2656_v57 = vadd.f32 %v6634_v12, %v6527_v42  ;;  %v5754_v12 = vld [vmem:[%s7372_s1 + $0x400] sm:$0xff]  }
 0x13a   :  { %v4619_v21 = vpop.f32.mrf.mxu1  ;;  %v4707_v22 = vpop.f32.mrf.mxu0  ;;  %3320 = vmatmul.mubr.bf16.gmra.mxu1 %v5671_v61  ;;  %3449 = vmatmul.mubr.bf16.gmra.mxu0 %v5674_v40  ;;  %v5753_v61 = vld [vmem:[%s7372_s1 + $0x440] sm:$0xff]  }
 0x13b   :  { %v2785_v56 = vadd.f32 %v4618_v13, %v2648_v11  ;;  %v6809_v23 = vadd.f32 %v4706_v15, %v2777_v28  ;;  %3327 = vmatprep.mubr.bf16.mxu1 %v5679_v46  ;;  %3456 = vmatprep.mubr.bf16.mxu0 %v5682_v3  ;;  %v5677_v28 = vld [vmem:[%s7373_s0 + $0x268] ss:$72 sps:$4 sm:$0xff]  }
 0x13c   :  { %v4620_v26 = vpop.f32.mrf.mxu1  ;;  %v4708_v27 = vpop.f32.mrf.mxu0  ;;  %5240 = vmatpush3.bf16.msra.mxu0 %v5712_v8  ;;  %5149 = vmatprep.subr.bf16.mxu1 %v5735_v9  ;;  %v2661_v8 = vadd.f32 %v6647_v25, %v6527_v42  ;;  %v5697_v25 = vld [vmem:[%s7373_s0 + $0x38c] ss:$72 sps:$4 sm:$0xff]  }
 0x13d   :  { %v4621_v33 = vadd.f32 %v4620_v26, %v4619_v21  ;;  %v4709_v35 = vadd.f32 %v4708_v27, %v4707_v22  ;;  %5241 = vmatprep.subr.bf16.mxu0 %v5727_v16  ;;  %5150 = vmatpush3.bf16.msra.mxu1 %v5736_v19  ;;  %v5687_v16 = vld [vmem:[%s7373_s0 + $0x2f8] ss:$72 sps:$4 sm:$0xff]   ;;  %v2664_v27 = vadd.f32 %v6657_v29, %v6527_v42 }
 0x13e   :  { %v4622_v0 = vpop.f32.mrf.mxu1  ;;  %v4710_v43 = vpop.f32.mrf.mxu0  ;;  %5151 = vmatprep.subr.bf16.mxu1 %v5751_v53  ;;  %v5690_v19 = vld [vmem:[%s7373_s0 + $0x270] ss:$72 sps:$4 sm:$0xff]   ;;  %v5700_v53 = vld [vmem:[%s7373_s0 + $0x304] ss:$72 sps:$4 sm:$0xff]  }
 0x13f   :  { %v2790_v45 = vadd.f32 %v4621_v33, %v2653_v32  ;;  %v6828_v47 = vadd.f32 %v4709_v35, %v2782_v10 }
 0x140   :  { %v4623_v51 = vpop.f32.mrf.mxu1  ;;  %v4711_v54 = vpop.f32.mrf.mxu0  ;;  %5242 = vmatpush3.bf16.msra.mxu0 %v5728_v31 }
 0x141   :  { %v4624_v59 = vadd.f32 %v4623_v51, %v4622_v0  ;;  %v4712_v38 = vadd.f32 %v4711_v54, %v4710_v43  ;;  %5243 = vmatprep.subr.bf16.mxu0 %v5737_v36  ;;  %5152 = vmatpush3.bf16.msra.mxu1 %v5752_v37  ;;  %v5698_v51 = vld [vmem:[%s7373_s0 + $0x300] ss:$72 sps:$4 sm:$0xff]  }
 0x142   :  { %v4625_v40 = vpop.f32.mrf.mxu1  ;;  %v4713_v10 = vpop.f32.mrf.mxu0  ;;  %3328 = vmatmul.mubr.bf16.gmra.mxu1 %v5677_v28  ;;  %3457 = vmatmul.mubr.bf16.gmra.mxu0 %v5680_v1  ;;  %v2669_v28 = vadd.f32 %v6509_v30, %v6527_v42  ;;  %v5708_v30 = vld [vmem:[%s7373_s0 + $0x394] ss:$72 sps:$4 sm:$0xff]  }
 0x143   :  { %v2793_v46 = vadd.f32 %v4624_v59, %v2656_v57  ;;  %v6844_v3 = vadd.f32 %v4712_v38, %v2785_v56  ;;  %3335 = vmatprep.mubr.bf16.mxu1 %v5689_v49  ;;  %3464 = vmatprep.mubr.bf16.mxu0 %v5692_v50  ;;  %v5695_v50 = vld [vmem:[%s7373_s0 + $0x388] ss:$72 sps:$4 sm:$0xff]   ;;  %v5705_v57 = vld [vmem:[%s7373_s0 + $0x41c] ss:$72 sps:$4 sm:$0xff]  }
 0x144   :  { %v4626_v4 = vpop.f32.mrf.mxu1  ;;  %v4714_v7 = vpop.f32.mrf.mxu0  ;;  %5244 = vmatpush3.bf16.msra.mxu0 %v5744_v55 }
 0x145   :  { %v4627_v9 = vadd.f32 %v4626_v4, %v4625_v40  ;;  %v4715_v11 = vadd.f32 %v4714_v7, %v4713_v10  ;;  %5245 = vmatprep.subr.bf16.mxu0 %v5753_v61  ;;  %v2672_v61 = vadd.f32 %v6522_v39, %v6527_v42  ;;  %v5703_v39 = vld [vmem:[%s7373_s0 + $0x418] ss:$72 sps:$4 sm:$0xff]  }
 0x146   :  { %v4628_v13 = vpop.f32.mrf.mxu1  ;;  %v4716_v15 = vpop.f32.mrf.mxu0  ;;  %v5706_v42 = vld [vmem:[%s7373_s0 + $0x390] ss:$72 sps:$4 sm:$0xff]  }
 0x147   :  { %v2798_v21 = vadd.f32 %v4627_v9, %v2661_v8  ;;  %v6857_v22 = vadd.f32 %v4715_v11, %v2790_v45 }
 0x148   :  { %v4629_v56 = vpop.f32.mrf.mxu1  ;;  %v4717_v26 = vpop.f32.mrf.mxu0  ;;  %5246 = vmatpush3.bf16.msra.mxu0 %v5754_v12 }
 0x149   :  { %v4630_v31 = vadd.f32 %v4629_v56, %v4628_v13  ;;  %v4718_v32 = vadd.f32 %v4717_v26, %v4716_v15 }
 0x14a   :  { %v4631_v33 = vpop.f32.mrf.mxu1  ;;  %v4719_v35 = vpop.f32.mrf.mxu0  ;;  %3336 = vmatmul.mubr.bf16.gmra.mxu1 %v5687_v16  ;;  %3465 = vmatmul.mubr.bf16.gmra.mxu0 %v5690_v19 }
 0x14b   :  { %v2801_v36 = vadd.f32 %v4630_v31, %v2664_v27  ;;  %v6867_v37 = vadd.f32 %v4718_v32, %v2793_v46  ;;  %3343 = vmatprep.mubr.bf16.mxu1 %v5697_v25  ;;  %3472 = vmatprep.mubr.bf16.mxu0 %v5700_v53  ;;  %v5715_v25 = vld [vmem:[%s7373_s0 + $0x4ac] ss:$72 sps:$4 sm:$0xff]  }
 0x14c   :  { %v4632_v0 = vpop.f32.mrf.mxu1  ;;  %v4720_v43 = vpop.f32.mrf.mxu0  ;;  %v5718_v53 = vld [vmem:[%s7373_s0 + $0x424] ss:$72 sps:$4 sm:$0xff]  }
 0x14d   :  { %v4633_v1 = vadd.f32 %v4632_v0, %v4631_v33  ;;  %v4721_v45 = vadd.f32 %v4720_v43, %v4719_v35 }
 0x14e   :  { %v4634_v49 = vpop.f32.mrf.mxu1  ;;  %v4722_v29 = vpop.f32.mrf.mxu0 }
 0x14f   :  { %v2806_v54 = vadd.f32 %v4633_v1, %v2669_v28  ;;  %v6877_v55 = vadd.f32 %v4721_v45, %v2798_v21 }
 0x150   :  { %v4635_v59 = vpop.f32.mrf.mxu1  ;;  %v4723_v38 = vpop.f32.mrf.mxu0 }
 0x151   :  { %v4636_v40 = vadd.f32 %v4635_v59, %v4634_v49  ;;  %v4724_v10 = vadd.f32 %v4723_v38, %v4722_v29  ;;  %v5713_v49 = vld [vmem:[%s7373_s0 + $0x4a8] ss:$72 sps:$4 sm:$0xff]  }
 0x152   :  { %v4637_v46 = vpop.f32.mrf.mxu1  ;;  %v4725_v4 = vpop.f32.mrf.mxu0  ;;  %3344 = vmatmul.mubr.bf16.gmra.mxu1 %v5695_v50  ;;  %3473 = vmatmul.mubr.bf16.gmra.mxu0 %v5698_v51  ;;  %v5716_v29 = vld [vmem:[%s7373_s0 + $0x420] ss:$72 sps:$4 sm:$0xff]   ;;  %v5721_v51 = vld [vmem:[%s7373_s0 + $0x53c] ss:$72 sps:$4 sm:$0xff]  }
 0x153   :  { %v2809_v7 = vadd.f32 %v4636_v40, %v2672_v61  ;;  %v6887_v12 = vadd.f32 %v4724_v10, %v2801_v36  ;;  %3351 = vmatprep.mubr.bf16.mxu1 %v5705_v57  ;;  %3480 = vmatprep.mubr.bf16.mxu0 %v5708_v30 }
 0x154   :  { %v4638_v8 = vpop.f32.mrf.mxu1  ;;  %v4726_v9 = vpop.f32.mrf.mxu0 }
 0x155   :  { %v4639_v11 = vadd.f32 %v4638_v8, %v4637_v46  ;;  %v4727_v13 = vadd.f32 %v4726_v9, %v4725_v4 }
 0x156   :  { %v4640_v15 = vpop.f32.mrf.mxu1  ;;  %v4728_v16 = vpop.f32.mrf.mxu0 }
 0x157   :  { %v2814_v19 = vadd.f32 %v4639_v11, %v6541_v52  ;;  %v6896_v21 = vadd.f32 %v4727_v13, %v2806_v54  ;;  %v5724_v54 = vld [vmem:[%s7373_s0 + $0x4b4] ss:$72 sps:$4 sm:$0xff]   ;;  %v5719_v13 = vld [vmem:[%s7373_s0 + $0x538] ss:$72 sps:$4 sm:$0xff]  }
 0x158   :  { %v4641_v56 = vpop.f32.mrf.mxu1  ;;  %v4729_v26 = vpop.f32.mrf.mxu0 }
 0x159   :  { %v4642_v27 = vadd.f32 %v4641_v56, %v4640_v15  ;;  %v4730_v31 = vadd.f32 %v4729_v26, %v4728_v16  ;;  %v5722_v15 = vld [vmem:[%s7373_s0 + $0x4b0] ss:$72 sps:$4 sm:$0xff]  }
 0x15a   :  { %v4643_v32 = vpop.f32.mrf.mxu1  ;;  %v4731_v33 = vpop.f32.mrf.mxu0  ;;  %3352 = vmatmul.mubr.bf16.gmra.mxu1 %v5703_v39  ;;  %3481 = vmatmul.mubr.bf16.gmra.mxu0 %v5706_v42  ;;  %v5731_v39 = vld [vmem:[%s7373_s0 + $0x5cc] ss:$72 sps:$4 sm:$0xff]  }
 0x15b   :  { %v2817_v52 = vadd.f32 %v4642_v27, %v6549_v60  ;;  %v6905_v35 = vadd.f32 %v4730_v31, %v2809_v7  ;;  %3359 = vmatprep.mubr.bf16.mxu1 %v5715_v25  ;;  %3488 = vmatprep.mubr.bf16.mxu0 %v5718_v53  ;;  %v5734_v42 = vld [vmem:[%s7373_s0 + $0x544] ss:$72 sps:$4 sm:$0xff]  }
 0x15c   :  { %v4644_v36 = vpop.f32.mrf.mxu1  ;;  %v4732_v0 = vpop.f32.mrf.mxu0 }
 0x15d   :  { %v4645_v43 = vadd.f32 %v4644_v36, %v4643_v32  ;;  %v4733_v28 = vadd.f32 %v4732_v0, %v4731_v33 }
 0x15e   :  { %v4646_v1 = vpop.f32.mrf.mxu1  ;;  %v4734_v45 = vpop.f32.mrf.mxu0 }
 0x15f   :  { %v2822_v60 = vadd.f32 %v4645_v43, %v6563_v6  ;;  %v6914_v50 = vadd.f32 %v4733_v28, %v2814_v19  ;;  %v5729_v28 = vld [vmem:[%s7373_s0 + $0x5c8] ss:$72 sps:$4 sm:$0xff]  }
 0x160   :  { %v4647_v57 = vpop.f32.mrf.mxu1  ;;  %v4735_v30 = vpop.f32.mrf.mxu0 }
 0x161   :  { %v4648_v59 = vadd.f32 %v4647_v57, %v4646_v1  ;;  %v4736_v38 = vadd.f32 %v4735_v30, %v4734_v45  ;;  %v5732_v1 = vld [vmem:[%s7373_s0 + $0x540] ss:$72 sps:$4 sm:$0xff]  }
 0x162   :  { %v4649_v61 = vpop.f32.mrf.mxu1  ;;  %v4737_v40 = vpop.f32.mrf.mxu0  ;;  %3360 = vmatmul.mubr.bf16.gmra.mxu1 %v5713_v49  ;;  %3489 = vmatmul.mubr.bf16.gmra.mxu0 %v5716_v29  ;;  %v5740_v49 = vld [vmem:[%s7373_s0 + $0x65c] ss:$72 sps:$4 sm:$0xff]  }
 0x163   :  { %v2825_v6 = vadd.f32 %v4648_v59, %v6571_v14  ;;  %v6923_v10 = vadd.f32 %v4736_v38, %v2817_v52  ;;  %3367 = vmatprep.mubr.bf16.mxu1 %v5721_v51  ;;  %3496 = vmatprep.mubr.bf16.mxu0 %v5724_v54  ;;  %v5743_v29 = vld [vmem:[%s7373_s0 + $0x5d4] ss:$72 sps:$4 sm:$0xff]  }
 0x164   :  { %v4650_v46 = vpop.f32.mrf.mxu1  ;;  %v4738_v4 = vpop.f32.mrf.mxu0 }
 0x165   :  { %v4651_v7 = vadd.f32 %v4650_v46, %v4649_v61  ;;  %v4739_v8 = vadd.f32 %v4738_v4, %v4737_v40 }
 0x166   :  { %v4652_v9 = vpop.f32.mrf.mxu1  ;;  %v4740_v11 = vpop.f32.mrf.mxu0 }
 0x167   :  { %v2830_v14 = vadd.f32 %v4651_v7, %v6585_v24  ;;  %v6932_v16 = vadd.f32 %v4739_v8, %v2822_v60  ;;  %v5738_v8 = vld [vmem:[%s7373_s0 + $0x658] ss:$72 sps:$4 sm:$0xff]  }
 0x168   :  { %v4653_v19 = vpop.f32.mrf.mxu1  ;;  %v4741_v25 = vpop.f32.mrf.mxu0 }
 0x169   :  { %v4654_v53 = vadd.f32 %v4653_v19, %v4652_v9  ;;  %v4742_v56 = vadd.f32 %v4741_v25, %v4740_v11  ;;  %v5741_v9 = vld [vmem:[%s7373_s0 + $0x5d0] ss:$72 sps:$4 sm:$0xff]  }
 0x16a   :  { %v4655_v26 = vpop.f32.mrf.mxu1  ;;  %v4743_v27 = vpop.f32.mrf.mxu0  ;;  %3368 = vmatmul.mubr.bf16.gmra.mxu1 %v5719_v13  ;;  %3497 = vmatmul.mubr.bf16.gmra.mxu0 %v5722_v15  ;;  %v5747_v13 = vld [vmem:[%s7373_s0 + $0x6ec] ss:$72 sps:$4 sm:$0xff]  }
 0x16b   :  { %v2833_v24 = vadd.f32 %v4654_v53, %v6593_v34  ;;  %v6941_v31 = vadd.f32 %v4742_v56, %v2825_v6  ;;  %3375 = vmatprep.mubr.bf16.mxu1 %v5731_v39  ;;  %3504 = vmatprep.mubr.bf16.mxu0 %v5734_v42  ;;  %v5750_v15 = vld [vmem:[%s7373_s0 + $0x664] ss:$72 sps:$4 sm:$0xff]  }
 0x16c   :  { %v4656_v32 = vpop.f32.mrf.mxu1  ;;  %v4744_v33 = vpop.f32.mrf.mxu0 }
 0x16d   :  { %v4657_v52 = vadd.f32 %v4656_v32, %v4655_v26  ;;  %v4745_v36 = vadd.f32 %v4744_v33, %v4743_v27 }
 0x16e   :  { %v4658_v0 = vpop.f32.mrf.mxu1  ;;  %v4746_v43 = vpop.f32.mrf.mxu0 }
 0x16f   :  { %v2838_v34 = vadd.f32 %v4657_v52, %v6607_v48  ;;  %v6950_v45 = vadd.f32 %v4745_v36, %v2830_v14  ;;  %v5745_v36 = vld [vmem:[%s7373_s0 + $0x6e8] ss:$72 sps:$4 sm:$0xff]  }
 0x170   :  { %v4659_v60 = vpop.f32.mrf.mxu1  ;;  %v4747_v51 = vpop.f32.mrf.mxu0 }
 0x171   :  { %v4660_v54 = vadd.f32 %v4659_v60, %v4658_v0  ;;  %v4748_v57 = vadd.f32 %v4747_v51, %v4746_v43  ;;  %v5748_v0 = vld [vmem:[%s7373_s0 + $0x660] ss:$72 sps:$4 sm:$0xff]  }
 0x172   :  { %v4661_v30 = vpop.f32.mrf.mxu1  ;;  %v4749_v59 = vpop.f32.mrf.mxu0  ;;  %3376 = vmatmul.mubr.bf16.gmra.mxu1 %v5729_v28  ;;  %3505 = vmatmul.mubr.bf16.gmra.mxu0 %v5732_v1  ;;  %v5757_v28 = vld [vmem:[%s7373_s0 + $0x6f4] ss:$72 sps:$4 sm:$0xff]  }
 0x173   :  { %v2841_v48 = vadd.f32 %v4660_v54, %v6615_v58  ;;  %v6959_v38 = vadd.f32 %v4748_v57, %v2833_v24  ;;  %3383 = vmatprep.mubr.bf16.mxu1 %v5740_v49  ;;  %3512 = vmatprep.mubr.bf16.mxu0 %v5743_v29  ;;  %v5760_v1 = vld [vmem:[%s7373_s0 + $0x3c] ss:$72 sps:$4 sm:$0xff]  }
 0x174   :  { %v4662_v61 = vpop.f32.mrf.mxu1  ;;  %v4750_v40 = vpop.f32.mrf.mxu0 }
 0x175   :  { %v4663_v6 = vadd.f32 %v4662_v61, %v4661_v30  ;;  %v4751_v46 = vadd.f32 %v4750_v40, %v4749_v59 }
 0x176   :  { %v4664_v4 = vpop.f32.mrf.mxu1  ;;  %v4752_v7 = vpop.f32.mrf.mxu0 }
 0x177   :  { %v2846_v58 = vadd.f32 %v4663_v6, %v6626_v5  ;;  %v6968_v11 = vadd.f32 %v4751_v46, %v2838_v34  ;;  %v5755_v46 = vld [vmem:[%s7373_s0 + $0x6f0] ss:$72 sps:$4 sm:$0xff]  }
 0x178   :  { %v4665_v14 = vpop.f32.mrf.mxu1  ;;  %v4753_v39 = vpop.f32.mrf.mxu0 }
 0x179   :  { %v4666_v42 = vadd.f32 %v4665_v14, %v4664_v4  ;;  %v4754_v19 = vadd.f32 %v4753_v39, %v4752_v7  ;;  %v5758_v4 = vld [vmem:[%s7373_s0 + $0x38] ss:$72 sps:$4 sm:$0xff]  }
 0x17a   :  { %v4755_v25 = vpop.f32.mrf.mxu0  ;;  %v4777_v53 = vpop.f32.mrf.mxu1  ;;  %3384 = vmatmul.mubr.bf16.gmra.mxu1 %v5738_v8  ;;  %3513 = vmatmul.mubr.bf16.gmra.mxu0 %v5741_v9  ;;  %v5766_v9 = vld [vmem:[%s7373_s0 + $0x44] ss:$72 sps:$4 sm:$0xff]  }
 0x17b   :  { %v2849_v5 = vadd.f32 %v4666_v42, %v6637_v17  ;;  %v6977_v56 = vadd.f32 %v4754_v19, %v2841_v48  ;;  %3391 = vmatprep.mubr.bf16.mxu1 %v5747_v13  ;;  %3520 = vmatprep.mubr.bf16.mxu0 %v5750_v15 }
 0x17c   :  { %v4756_v26 = vpop.f32.mrf.mxu0  ;;  %v4778_v27 = vpop.f32.mrf.mxu1 }
 0x17d   :  { %v4757_v24 = vadd.f32 %v4756_v26, %v4755_v25  ;;  %v4779_v32 = vadd.f32 %v4778_v27, %v4777_v53 }
 0x17e   :  { %v4758_v33 = vpop.f32.mrf.mxu0  ;;  %v4780_v52 = vpop.f32.mrf.mxu1 }
 0x17f   :  { %v6985_v43 = vadd.f32 %v4757_v24, %v2846_v58  ;;  %v3024_v17 = vadd.f32 %v4779_v32, %v6667_v63  ;;  %v5761_v32 = vld [vmem:[%s7373_s0 + $0xc8] ss:$72 sps:$4 sm:$0xff]  }
 0x180   :  { %v4759_v34 = vpop.f32.mrf.mxu0  ;;  %v4781_v49 = vpop.f32.mrf.mxu1 }
 0x181   :  { %v4760_v29 = vadd.f32 %v4759_v34, %v4758_v33  ;;  %v4782_v60 = vadd.f32 %v4781_v49, %v4780_v52  ;;  %v5764_v33 = vld [vmem:[%s7373_s0 + $0x40] ss:$72 sps:$4 sm:$0xff]  }
 0x182   :  { %v4783_v51 = vpop.f32.mrf.mxu1  ;;  %v4871_v54 = vpop.f32.mrf.mxu0  ;;  %3392 = vmatmul.mubr.bf16.gmra.mxu1 %v5745_v36  ;;  %3521 = vmatmul.mubr.bf16.gmra.mxu0 %v5748_v0  ;;  %v5769_v36 = vld [vmem:[%s7373_s0 + $0x15c] ss:$72 sps:$4 sm:$0xff]  }
 0x183   :  { %v6994_v57 = vadd.f32 %v4760_v29, %v2849_v5  ;;  %v3027_v63 = vadd.f32 %v4782_v60, %v6683_v20  ;;  %3528 = vmatprep.mubr.bf16.mxu0 %v5757_v28  ;;  %3569 = vmatprep.mubr.bf16.mxu1 %v5760_v1  ;;  %v5763_v20 = vld [vmem:[%s7373_s0 + $0xcc] ss:$72 sps:$4 sm:$0xff]  }
 0x184   :  { %v4784_v30 = vpop.f32.mrf.mxu1  ;;  %v4872_v59 = vpop.f32.mrf.mxu0  ;;  %v5772_v0 = vld [vmem:[%s7373_s0 + $0xd4] ss:$72 sps:$4 sm:$0xff]  }
 0x185   :  { %v4785_v48 = vadd.f32 %v4784_v30, %v4783_v51  ;;  %v4873_v61 = vadd.f32 %v4872_v59, %v4871_v54 }
 0x186   :  { %v4786_v40 = vpop.f32.mrf.mxu1  ;;  %v4874_v6 = vpop.f32.mrf.mxu0 }
 0x187   :  { %v3032_v7 = vadd.f32 %v4785_v48, %v6699_v41  ;;  %v7004_v8 = vadd.f32 %v4873_v61, %v3024_v17  ;;  %v5767_v61 = vld [vmem:[%s7373_s0 + $0x158] ss:$72 sps:$4 sm:$0xff]  }
 0x188   :  { %v4787_v58 = vpop.f32.mrf.mxu1  ;;  %v4875_v13 = vpop.f32.mrf.mxu0 }
 0x189   :  { %v4788_v15 = vadd.f32 %v4787_v58, %v4786_v40  ;;  %v4876_v14 = vadd.f32 %v4875_v13, %v4874_v6  ;;  %v5770_v40 = vld [vmem:[%s7373_s0 + $0xd0] ss:$72 sps:$4 sm:$0xff]  }
 0x18a   :  { %v4789_v39 = vpop.f32.mrf.mxu1  ;;  %v4877_v42 = vpop.f32.mrf.mxu0  ;;  %3529 = vmatmul.mubr.bf16.gmra.mxu0 %v5755_v46  ;;  %3570 = vmatmul.mubr.bf16.vlgmr.msra.gmra.mxu1 %v5758_v4  ;;  %v5775_v46 = vld [vmem:[%s7373_s0 + $0x1ec] ss:$72 sps:$4 sm:$0xff]  }
 0x18b   :  { %v3035_v41 = vadd.f32 %v4788_v15, %v6721_v62  ;;  %v7013_v19 = vadd.f32 %v4876_v14, %v3027_v63  ;;  %3577 = vmatprep.mubr.bf16.mxu1 %v5763_v20  ;;  %3706 = vmatprep.mubr.bf16.mxu0 %v5766_v9  ;;  %v5778_v4 = vld [vmem:[%s7373_s0 + $0x164] ss:$72 sps:$4 sm:$0xff]  }
 0x18c   :  { %v4790_v25 = vpop.f32.mrf.mxu1  ;;  %v4878_v53 = vpop.f32.mrf.mxu0 }
 0x18d   :  { %v4791_v5 = vadd.f32 %v4790_v25, %v4789_v39  ;;  %v4879_v26 = vadd.f32 %v4878_v53, %v4877_v42 }
 0x18e   :  { %v4792_v27 = vpop.f32.mrf.mxu1  ;;  %v4880_v24 = vpop.f32.mrf.mxu0 }
 0x18f   :  { %v3040_v62 = vadd.f32 %v4791_v5, %v6740_v18  ;;  %v7022_v52 = vadd.f32 %v4879_v26, %v3032_v7  ;;  %v5773_v26 = vld [vmem:[%s7373_s0 + $0x1e8] ss:$72 sps:$4 sm:$0xff]  }
 0x190   :  { %v4793_v17 = vpop.f32.mrf.mxu1  ;;  %v4881_v28 = vpop.f32.mrf.mxu0 }
 0x191   :  { %v4794_v1 = vadd.f32 %v4793_v17, %v4792_v27  ;;  %v4882_v34 = vadd.f32 %v4881_v28, %v4880_v24  ;;  %v5776_v27 = vld [vmem:[%s7373_s0 + $0x160] ss:$72 sps:$4 sm:$0xff]  }
 0x192   :  { %v4795_v49 = vpop.f32.mrf.mxu1  ;;  %v4883_v29 = vpop.f32.mrf.mxu0  ;;  %3578 = vmatmul.mubr.bf16.gmra.mxu1 %v5761_v32  ;;  %3707 = vmatmul.mubr.bf16.vlgmr.msra.gmra.mxu0 %v5764_v33  ;;  %v5781_v32 = vld [vmem:[%s7373_s0 + $0x27c] ss:$72 sps:$4 sm:$0xff]  }
 0x193   :  { %v3043_v18 = vadd.f32 %v4794_v1, %v6765_v44  ;;  %v7031_v60 = vadd.f32 %v4882_v34, %v3035_v41  ;;  %3585 = vmatprep.mubr.bf16.mxu1 %v5769_v36  ;;  %3714 = vmatprep.mubr.bf16.mxu0 %v5772_v0  ;;  %v5784_v33 = vld [vmem:[%s7373_s0 + $0x1f4] ss:$72 sps:$4 sm:$0xff]  }
 0x194   :  { %v4796_v51 = vpop.f32.mrf.mxu1  ;;  %v4884_v54 = vpop.f32.mrf.mxu0 }
 0x195   :  { %v4797_v63 = vadd.f32 %v4796_v51, %v4795_v49  ;;  %v4885_v30 = vadd.f32 %v4884_v54, %v4883_v29 }
 0x196   :  { %v4798_v59 = vpop.f32.mrf.mxu1  ;;  %v4886_v48 = vpop.f32.mrf.mxu0 }
 0x197   :  { %v3048_v44 = vadd.f32 %v4797_v63, %v6784_v2  ;;  %v7040_v6 = vadd.f32 %v4885_v30, %v3040_v62  ;;  %v5779_v30 = vld [vmem:[%s7373_s0 + $0x278] ss:$72 sps:$4 sm:$0xff]  }
 0x198   :  { %v4799_v7 = vpop.f32.mrf.mxu1  ;;  %v4887_v20 = vpop.f32.mrf.mxu0 }
 0x199   :  { %v4800_v9 = vadd.f32 %v4799_v7, %v4798_v59  ;;  %v4888_v58 = vadd.f32 %v4887_v20, %v4886_v48  ;;  %v5782_v59 = vld [vmem:[%s7373_s0 + $0x1f0] ss:$72 sps:$4 sm:$0xff]  }
 0x19a   :  { %v4801_v13 = vpop.f32.mrf.mxu1  ;;  %v4889_v15 = vpop.f32.mrf.mxu0  ;;  %3586 = vmatmul.mubr.bf16.gmra.mxu1 %v5767_v61  ;;  %3715 = vmatmul.mubr.bf16.gmra.mxu0 %v5770_v40  ;;  %v5787_v61 = vld [vmem:[%s7373_s0 + $0x30c] ss:$72 sps:$4 sm:$0xff]  }
 0x19b   :  { %v3051_v2 = vadd.f32 %v4800_v9, %v6809_v23  ;;  %v7049_v14 = vadd.f32 %v4888_v58, %v3043_v18  ;;  %3593 = vmatprep.mubr.bf16.mxu1 %v5775_v46  ;;  %3722 = vmatprep.mubr.bf16.mxu0 %v5778_v4  ;;  %v5790_v40 = vld [vmem:[%s7373_s0 + $0x284] ss:$72 sps:$4 sm:$0xff]  }
 0x19c   :  { %v4802_v39 = vpop.f32.mrf.mxu1  ;;  %v4890_v42 = vpop.f32.mrf.mxu0 }
 0x19d   :  { %v4803_v41 = vadd.f32 %v4802_v39, %v4801_v13  ;;  %v4891_v25 = vadd.f32 %v4890_v42, %v4889_v15 }
 0x19e   :  { %v4804_v53 = vpop.f32.mrf.mxu1  ;;  %v4892_v5 = vpop.f32.mrf.mxu0 }
 0x19f   :  { %v3056_v23 = vadd.f32 %v4803_v41, %v6828_v47  ;;  %v7058_v24 = vadd.f32 %v4891_v25, %v3048_v44  ;;  %v5785_v25 = vld [vmem:[%s7373_s0 + $0x308] ss:$72 sps:$4 sm:$0xff]  }
 0x1a0   :  { %v4805_v62 = vpop.f32.mrf.mxu1  ;;  %v4893_v36 = vpop.f32.mrf.mxu0 }
 0x1a1   :  { %v4806_v0 = vadd.f32 %v4805_v62, %v4804_v53  ;;  %v4894_v17 = vadd.f32 %v4893_v36, %v4892_v5  ;;  %v5788_v53 = vld [vmem:[%s7373_s0 + $0x280] ss:$72 sps:$4 sm:$0xff]  }
 0x1a2   :  { %v4807_v28 = vpop.f32.mrf.mxu1  ;;  %v4895_v1 = vpop.f32.mrf.mxu0  ;;  %3594 = vmatmul.mubr.bf16.gmra.mxu1 %v5773_v26  ;;  %3723 = vmatmul.mubr.bf16.gmra.mxu0 %v5776_v27  ;;  %v5793_v26 = vld [vmem:[%s7373_s0 + $0x39c] ss:$72 sps:$4 sm:$0xff]  }
 0x1a3   :  { %v3059_v47 = vadd.f32 %v4806_v0, %v6844_v3  ;;  %v7067_v34 = vadd.f32 %v4894_v17, %v3051_v2  ;;  %3601 = vmatprep.mubr.bf16.mxu1 %v5781_v32  ;;  %3730 = vmatprep.mubr.bf16.mxu0 %v5784_v33  ;;  %v5796_v27 = vld [vmem:[%s7373_s0 + $0x314] ss:$72 sps:$4 sm:$0xff]  }
 0x1a4   :  { %v4808_v49 = vpop.f32.mrf.mxu1  ;;  %v4896_v29 = vpop.f32.mrf.mxu0 }
 0x1a5   :  { %v4809_v18 = vadd.f32 %v4808_v49, %v4807_v28  ;;  %v4897_v51 = vadd.f32 %v4896_v29, %v4895_v1 }
 0x1a6   :  { %v4810_v54 = vpop.f32.mrf.mxu1  ;;  %v4898_v63 = vpop.f32.mrf.mxu0 }
 0x1a7   :  { %v3064_v3 = vadd.f32 %v4809_v18, %v6857_v22  ;;  %v7076_v48 = vadd.f32 %v4897_v51, %v3056_v23  ;;  %v5791_v51 = vld [vmem:[%s7373_s0 + $0x398] ss:$72 sps:$4 sm:$0xff]  }
 0x1a8   :  { %v4811_v44 = vpop.f32.mrf.mxu1  ;;  %v4899_v46 = vpop.f32.mrf.mxu0 }
 0x1a9   :  { %v4812_v4 = vadd.f32 %v4811_v44, %v4810_v54  ;;  %v4900_v7 = vadd.f32 %v4899_v46, %v4898_v63  ;;  %v5794_v54 = vld [vmem:[%s7373_s0 + $0x310] ss:$72 sps:$4 sm:$0xff]  }
 0x1aa   :  { %v4813_v20 = vpop.f32.mrf.mxu1  ;;  %v4901_v9 = vpop.f32.mrf.mxu0  ;;  %3602 = vmatmul.mubr.bf16.gmra.mxu1 %v5779_v30  ;;  %3731 = vmatmul.mubr.bf16.gmra.mxu0 %v5782_v59  ;;  %v5799_v30 = vld [vmem:[%s7373_s0 + $0x42c] ss:$72 sps:$4 sm:$0xff]  }
 0x1ab   :  { %v3067_v22 = vadd.f32 %v4812_v4, %v6867_v37  ;;  %v7085_v58 = vadd.f32 %v4900_v7, %v3059_v47  ;;  %3609 = vmatprep.mubr.bf16.mxu1 %v5787_v61  ;;  %3738 = vmatprep.mubr.bf16.mxu0 %v5790_v40  ;;  %v5802_v59 = vld [vmem:[%s7373_s0 + $0x3a4] ss:$72 sps:$4 sm:$0xff]  }
 0x1ac   :  { %v4814_v13 = vpop.f32.mrf.mxu1  ;;  %v4902_v15 = vpop.f32.mrf.mxu0 }
 0x1ad   :  { %v4815_v2 = vadd.f32 %v4814_v13, %v4813_v20  ;;  %v4903_v39 = vadd.f32 %v4902_v15, %v4901_v9 }
 0x1ae   :  { %v4816_v42 = vpop.f32.mrf.mxu1  ;;  %v4904_v41 = vpop.f32.mrf.mxu0 }
 0x1af   :  { %v3072_v37 = vadd.f32 %v4815_v2, %v6877_v55  ;;  %v7094_v5 = vadd.f32 %v4903_v39, %v3064_v3  ;;  %v5797_v39 = vld [vmem:[%s7373_s0 + $0x428] ss:$72 sps:$4 sm:$0xff]  }
 0x1b0   :  { %v4817_v23 = vpop.f32.mrf.mxu1  ;;  %v4905_v32 = vpop.f32.mrf.mxu0 }
 0x1b1   :  { %v4818_v33 = vadd.f32 %v4817_v23, %v4816_v42  ;;  %v4906_v62 = vadd.f32 %v4905_v32, %v4904_v41  ;;  %v5800_v42 = vld [vmem:[%s7373_s0 + $0x3a0] ss:$72 sps:$4 sm:$0xff]  }
 0x1b2   :  { %v4819_v36 = vpop.f32.mrf.mxu1  ;;  %v4907_v0 = vpop.f32.mrf.mxu0  ;;  %3610 = vmatmul.mubr.bf16.gmra.mxu1 %v5785_v25  ;;  %3739 = vmatmul.mubr.bf16.gmra.mxu0 %v5788_v53  ;;  %v5805_v25 = vld [vmem:[%s7373_s0 + $0x4bc] ss:$72 sps:$4 sm:$0xff]  }
 0x1b3   :  { %v3075_v55 = vadd.f32 %v4818_v33, %v6887_v12  ;;  %v7103_v17 = vadd.f32 %v4906_v62, %v3067_v22  ;;  %3617 = vmatprep.mubr.bf16.mxu1 %v5793_v26  ;;  %3746 = vmatprep.mubr.bf16.mxu0 %v5796_v27  ;;  %v5808_v53 = vld [vmem:[%s7373_s0 + $0x434] ss:$72 sps:$4 sm:$0xff]  }
 0x1b4   :  { %v4820_v28 = vpop.f32.mrf.mxu1  ;;  %v4908_v1 = vpop.f32.mrf.mxu0 }
 0x1b5   :  { %v4821_v47 = vadd.f32 %v4820_v28, %v4819_v36  ;;  %v4909_v49 = vadd.f32 %v4908_v1, %v4907_v0 }
 0x1b6   :  { %v4822_v29 = vpop.f32.mrf.mxu1  ;;  %v4910_v18 = vpop.f32.mrf.mxu0 }
 0x1b7   :  { %v3080_v12 = vadd.f32 %v4821_v47, %v6896_v21  ;;  %v7112_v63 = vadd.f32 %v4909_v49, %v3072_v37  ;;  %v5803_v49 = vld [vmem:[%s7373_s0 + $0x4b8] ss:$72 sps:$4 sm:$0xff]  }
 0x1b8   :  { %v4823_v3 = vpop.f32.mrf.mxu1  ;;  %v4911_v61 = vpop.f32.mrf.mxu0 }
 0x1b9   :  { %v4824_v40 = vadd.f32 %v4823_v3, %v4822_v29  ;;  %v4912_v44 = vadd.f32 %v4911_v61, %v4910_v18  ;;  %v5806_v29 = vld [vmem:[%s7373_s0 + $0x430] ss:$72 sps:$4 sm:$0xff]  }
 0x1ba   :  { %v4825_v46 = vpop.f32.mrf.mxu1  ;;  %v4913_v4 = vpop.f32.mrf.mxu0  ;;  %3618 = vmatmul.mubr.bf16.gmra.mxu1 %v5791_v51  ;;  %3747 = vmatmul.mubr.bf16.gmra.mxu0 %v5794_v54  ;;  %v5811_v51 = vld [vmem:[%s7373_s0 + $0x54c] ss:$72 sps:$4 sm:$0xff]  }
 0x1bb   :  { %v3083_v21 = vadd.f32 %v4824_v40, %v6905_v35  ;;  %v7121_v7 = vadd.f32 %v4912_v44, %v3075_v55  ;;  %3625 = vmatprep.mubr.bf16.mxu1 %v5799_v30  ;;  %3754 = vmatprep.mubr.bf16.mxu0 %v5802_v59  ;;  %v5814_v54 = vld [vmem:[%s7373_s0 + $0x4c4] ss:$72 sps:$4 sm:$0xff]  }
 0x1bc   :  { %v4826_v20 = vpop.f32.mrf.mxu1  ;;  %v4914_v9 = vpop.f32.mrf.mxu0 }
 0x1bd   :  { %v4827_v22 = vadd.f32 %v4826_v20, %v4825_v46  ;;  %v4915_v13 = vadd.f32 %v4914_v9, %v4913_v4 }
 0x1be   :  { %v4828_v15 = vpop.f32.mrf.mxu1  ;;  %v4916_v2 = vpop.f32.mrf.mxu0 }
 0x1bf   :  { %v3088_v35 = vadd.f32 %v4827_v22, %v6914_v50  ;;  %v7130_v41 = vadd.f32 %v4915_v13, %v3080_v12  ;;  %v5809_v13 = vld [vmem:[%s7373_s0 + $0x548] ss:$72 sps:$4 sm:$0xff]  }
 0x1c0   :  { %v4829_v37 = vpop.f32.mrf.mxu1  ;;  %v4917_v26 = vpop.f32.mrf.mxu0 }
 0x1c1   :  { %v4830_v27 = vadd.f32 %v4829_v37, %v4828_v15  ;;  %v4918_v23 = vadd.f32 %v4917_v26, %v4916_v2  ;;  %v5812_v15 = vld [vmem:[%s7373_s0 + $0x4c0] ss:$72 sps:$4 sm:$0xff]  }
 0x1c2   :  { %v4831_v32 = vpop.f32.mrf.mxu1  ;;  %v4919_v33 = vpop.f32.mrf.mxu0  ;;  %3626 = vmatmul.mubr.bf16.gmra.mxu1 %v5797_v39  ;;  %3755 = vmatmul.mubr.bf16.gmra.mxu0 %v5800_v42  ;;  %v5817_v39 = vld [vmem:[%s7373_s0 + $0x5dc] ss:$72 sps:$4 sm:$0xff]  }
 0x1c3   :  { %v3091_v50 = vadd.f32 %v4830_v27, %v6923_v10  ;;  %v7139_v62 = vadd.f32 %v4918_v23, %v3083_v21  ;;  %3633 = vmatprep.mubr.bf16.mxu1 %v5805_v25  ;;  %3762 = vmatprep.mubr.bf16.mxu0 %v5808_v53  ;;  %v5820_v42 = vld [vmem:[%s7373_s0 + $0x554] ss:$72 sps:$4 sm:$0xff]  }
 0x1c4   :  { %v4832_v36 = vpop.f32.mrf.mxu1  ;;  %v4920_v0 = vpop.f32.mrf.mxu0 }
 0x1c5   :  { %v4833_v55 = vadd.f32 %v4832_v36, %v4831_v32  ;;  %v4921_v28 = vadd.f32 %v4920_v0, %v4919_v33 }
 0x1c6   :  { %v4834_v1 = vpop.f32.mrf.mxu1  ;;  %v4922_v47 = vpop.f32.mrf.mxu0 }
 0x1c7   :  { %v3096_v10 = vadd.f32 %v4833_v55, %v6932_v16  ;;  %v7148_v18 = vadd.f32 %v4921_v28, %v3088_v35  ;;  %v5815_v28 = vld [vmem:[%s7373_s0 + $0x5d8] ss:$72 sps:$4 sm:$0xff]  }
 0x1c8   :  { %v4835_v12 = vpop.f32.mrf.mxu1  ;;  %v4923_v30 = vpop.f32.mrf.mxu0 }
 0x1c9   :  { %v4836_v59 = vadd.f32 %v4835_v12, %v4834_v1  ;;  %v4924_v3 = vadd.f32 %v4923_v30, %v4922_v47  ;;  %v5818_v1 = vld [vmem:[%s7373_s0 + $0x550] ss:$72 sps:$4 sm:$0xff]  }
 0x1ca   :  { %v4837_v61 = vpop.f32.mrf.mxu1  ;;  %v4925_v40 = vpop.f32.mrf.mxu0  ;;  %3634 = vmatmul.mubr.bf16.gmra.mxu1 %v5803_v49  ;;  %3763 = vmatmul.mubr.bf16.gmra.mxu0 %v5806_v29  ;;  %v5823_v49 = vld [vmem:[%s7373_s0 + $0x66c] ss:$72 sps:$4 sm:$0xff]  }
 0x1cb   :  { %v3099_v16 = vadd.f32 %v4836_v59, %v6941_v31  ;;  %v7157_v44 = vadd.f32 %v4924_v3, %v3091_v50  ;;  %3641 = vmatprep.mubr.bf16.mxu1 %v5811_v51  ;;  %3770 = vmatprep.mubr.bf16.mxu0 %v5814_v54  ;;  %v5826_v29 = vld [vmem:[%s7373_s0 + $0x5e4] ss:$72 sps:$4 sm:$0xff]  }
 0x1cc   :  { %v4838_v46 = vpop.f32.mrf.mxu1  ;;  %v4926_v4 = vpop.f32.mrf.mxu0 }
 0x1cd   :  { %v4839_v21 = vadd.f32 %v4838_v46, %v4837_v61  ;;  %v4927_v20 = vadd.f32 %v4926_v4, %v4925_v40 }
 0x1ce   :  { %v4840_v9 = vpop.f32.mrf.mxu1  ;;  %v4928_v22 = vpop.f32.mrf.mxu0 }
 0x1cf   :  { %v3104_v31 = vadd.f32 %v4839_v21, %v6950_v45  ;;  %v7166_v2 = vadd.f32 %v4927_v20, %v3096_v10  ;;  %v5821_v20 = vld [vmem:[%s7373_s0 + $0x668] ss:$72 sps:$4 sm:$0xff]  }
 0x1d0   :  { %v4841_v35 = vpop.f32.mrf.mxu1  ;;  %v4929_v25 = vpop.f32.mrf.mxu0 }
 0x1d1   :  { %v4842_v53 = vadd.f32 %v4841_v35, %v4840_v9  ;;  %v4930_v37 = vadd.f32 %v4929_v25, %v4928_v22  ;;  %v5824_v9 = vld [vmem:[%s7373_s0 + $0x5e0] ss:$72 sps:$4 sm:$0xff]  }
 0x1d2   :  { %v4843_v26 = vpop.f32.mrf.mxu1  ;;  %v4931_v27 = vpop.f32.mrf.mxu0  ;;  %3642 = vmatmul.mubr.bf16.gmra.mxu1 %v5809_v13  ;;  %3771 = vmatmul.mubr.bf16.gmra.mxu0 %v5812_v15  ;;  %v5829_v13 = vld [vmem:[%s7373_s0 + $0x6fc] ss:$72 sps:$4 sm:$0xff]  }
 0x1d3   :  { %v3107_v45 = vadd.f32 %v4842_v53, %v6959_v38  ;;  %v7175_v23 = vadd.f32 %v4930_v37, %v3099_v16  ;;  %3649 = vmatprep.mubr.bf16.mxu1 %v5817_v39  ;;  %3778 = vmatprep.mubr.bf16.mxu0 %v5820_v42  ;;  %v5832_v15 = vld [vmem:[%s7373_s0 + $0x674] ss:$72 sps:$4 sm:$0xff]  }
 0x1d4   :  { %v4844_v32 = vpop.f32.mrf.mxu1  ;;  %v4932_v33 = vpop.f32.mrf.mxu0 }
 0x1d5   :  { %v4845_v50 = vadd.f32 %v4844_v32, %v4843_v26  ;;  %v4933_v36 = vadd.f32 %v4932_v33, %v4931_v27 }
 0x1d6   :  { %v4846_v0 = vpop.f32.mrf.mxu1  ;;  %v4934_v55 = vpop.f32.mrf.mxu0 }
 0x1d7   :  { %v3112_v38 = vadd.f32 %v4845_v50, %v6968_v11  ;;  %v7184_v47 = vadd.f32 %v4933_v36, %v3104_v31  ;;  %v5827_v36 = vld [vmem:[%s7373_s0 + $0x6f8] ss:$72 sps:$4 sm:$0xff]  }
 0x1d8   :  { %v4847_v10 = vpop.f32.mrf.mxu1  ;;  %v4935_v51 = vpop.f32.mrf.mxu0 }
 0x1d9   :  { %v4848_v54 = vadd.f32 %v4847_v10, %v4846_v0  ;;  %v4936_v12 = vadd.f32 %v4935_v51, %v4934_v55  ;;  %v5830_v0 = vld [vmem:[%s7373_s0 + $0x670] ss:$72 sps:$4 sm:$0xff]  }
 0x1da   :  { %v4849_v30 = vpop.f32.mrf.mxu1  ;;  %v4937_v59 = vpop.f32.mrf.mxu0  ;;  %3650 = vmatmul.mubr.bf16.gmra.mxu1 %v5815_v28  ;;  %3779 = vmatmul.mubr.bf16.gmra.mxu0 %v5818_v1  ;;  %v5835_v28 = vld [vmem:[%s7373_s0 + $0x704] ss:$72 sps:$4 sm:$0xff]  }
 0x1db   :  { %v3115_v11 = vadd.f32 %v4848_v54, %v6977_v56  ;;  %v7193_v3 = vadd.f32 %v4936_v12, %v3107_v45  ;;  %3657 = vmatprep.mubr.bf16.mxu1 %v5823_v49  ;;  %3786 = vmatprep.mubr.bf16.mxu0 %v5826_v29 }
 0x1dc   :  { %v4850_v61 = vpop.f32.mrf.mxu1  ;;  %v4938_v40 = vpop.f32.mrf.mxu0 }
 0x1dd   :  { %v4851_v16 = vadd.f32 %v4850_v61, %v4849_v30  ;;  %v4939_v46 = vadd.f32 %v4938_v40, %v4937_v59 }
 0x1de   :  { %v4852_v4 = vpop.f32.mrf.mxu1  ;;  %v4940_v21 = vpop.f32.mrf.mxu0 }
 0x1df   :  { %v3120_v56 = vadd.f32 %v4851_v16, %v6985_v43  ;;  %v7202_v22 = vadd.f32 %v4939_v46, %v3112_v38  ;;  %v5833_v16 = vld [vmem:[%s7373_s0 + $0x700] ss:$72 sps:$4 sm:$0xff]  }
 0x1e0   :  { %v4853_v31 = vpop.f32.mrf.mxu1  ;;  %v4941_v39 = vpop.f32.mrf.mxu0 }
 0x1e1   :  { %v4854_v42 = vadd.f32 %v4853_v31, %v4852_v4  ;;  %v4942_v35 = vadd.f32 %v4941_v39, %v4940_v21 }
 0x1e2   :  { %v4943_v25 = vpop.f32.mrf.mxu0  ;;  %v4965_v53 = vpop.f32.mrf.mxu1  ;;  %3658 = vmatmul.mubr.bf16.gmra.mxu1 %v5821_v20  ;;  %3787 = vmatmul.mubr.bf16.gmra.mxu0 %v5824_v9 }
 0x1e3   :  { %v3123_v43 = vadd.f32 %v4854_v42, %v6994_v57  ;;  %v7211_v37 = vadd.f32 %v4942_v35, %v3115_v11  ;;  %3665 = vmatprep.mubr.bf16.mxu1 %v5829_v13  ;;  %3794 = vmatprep.mubr.bf16.mxu0 %v5832_v15 }
 0x1e4   :  { %v4944_v26 = vpop.f32.mrf.mxu0  ;;  %v4966_v27 = vpop.f32.mrf.mxu1 }
 0x1e5   :  { %v4945_v45 = vadd.f32 %v4944_v26, %v4943_v25  ;;  %v4967_v32 = vadd.f32 %v4966_v27, %v4965_v53 }
 0x1e6   :  { %v4946_v33 = vpop.f32.mrf.mxu0  ;;  %v4968_v50 = vpop.f32.mrf.mxu1 }
 0x1e7   :  { %v7219_v55 = vadd.f32 %v4945_v45, %v3120_v56  ;;  %v3298_v57 = vadd.f32 %v4967_v32, %v7004_v8 }
 0x1e8   :  { %v4947_v1 = vpop.f32.mrf.mxu0  ;;  %v4969_v38 = vpop.f32.mrf.mxu1 }
 0x1e9   :  { %v4948_v49 = vadd.f32 %v4947_v1, %v4946_v33  ;;  %v4970_v29 = vadd.f32 %v4969_v38, %v4968_v50 }
 0x1ea   :  { %v4971_v10 = vpop.f32.mrf.mxu1  ;;  %v5059_v51 = vpop.f32.mrf.mxu0  ;;  %3666 = vmatmul.mubr.bf16.gmra.mxu1 %v5827_v36  ;;  %3795 = vmatmul.mubr.bf16.gmra.mxu0 %v5830_v0 }
 0x1eb   :  { %v7225_v54 = vadd.f32 %v4948_v49, %v3123_v43  ;;  %v3301_v12 = vadd.f32 %v4970_v29, %v7013_v19  ;;  %3802 = vmatprep.mubr.bf16.mxu0 %v5835_v28 }
 0x1ec   :  { %v4972_v30 = vpop.f32.mrf.mxu1  ;;  %v5060_v59 = vpop.f32.mrf.mxu0 }
 0x1ed   :  { %v4973_v8 = vadd.f32 %v4972_v30, %v4971_v10  ;;  %v5061_v11 = vadd.f32 %v5060_v59, %v5059_v51 }
 0x1ee   :  { %v4974_v61 = vpop.f32.mrf.mxu1  ;;  %v5062_v40 = vpop.f32.mrf.mxu0 }
 0x1ef   :  { %v3306_v46 = vadd.f32 %v4973_v8, %v7022_v52  ;;  %v7232_v4 = vadd.f32 %v5061_v11, %v3298_v57 }
 0x1f0   :  { %v4975_v21 = vpop.f32.mrf.mxu1  ;;  %v5063_v20 = vpop.f32.mrf.mxu0 }
 0x1f1   :  { %v4976_v9 = vadd.f32 %v4975_v21, %v4974_v61  ;;  %v5064_v56 = vadd.f32 %v5063_v20, %v5062_v40 }
 0x1f2   :  { %v4977_v19 = vpop.f32.mrf.mxu1  ;;  %v5065_v13 = vpop.f32.mrf.mxu0  ;;  %3803 = vmatmul.mubr.bf16.gmra.mxu0 %v5833_v16 }
 0x1f3   :  { %v3309_v15 = vadd.f32 %v4976_v9, %v7031_v60  ;;  %v7235_v31 = vadd.f32 %v5064_v56, %v3301_v12 }
 0x1f4   :  { %v4978_v39 = vpop.f32.mrf.mxu1  ;;  %v5066_v42 = vpop.f32.mrf.mxu0 }
 0x1f5   :  { %v4979_v35 = vadd.f32 %v4978_v39, %v4977_v19  ;;  %v5067_v25 = vadd.f32 %v5066_v42, %v5065_v13 }
 0x1f6   :  { %v4980_v53 = vpop.f32.mrf.mxu1  ;;  %v5068_v43 = vpop.f32.mrf.mxu0 }
 0x1f7   :  { %v3314_v52 = vadd.f32 %v4979_v35, %v7040_v6  ;;  %v7238_v26 = vadd.f32 %v5067_v25, %v3306_v46 }
 0x1f8   :  { %v4981_v27 = vpop.f32.mrf.mxu1  ;;  %v5069_v45 = vpop.f32.mrf.mxu0 }
 0x1f9   :  { %v4982_v32 = vadd.f32 %v4981_v27, %v4980_v53  ;;  %v5070_v33 = vadd.f32 %v5069_v45, %v5068_v43 }
 0x1fa   :  { %v4983_v50 = vpop.f32.mrf.mxu1  ;;  %v5071_v36 = vpop.f32.mrf.mxu0 }
 0x1fb   :  { %v3317_v60 = vadd.f32 %v4982_v32, %v7049_v14  ;;  %v7241_v0 = vadd.f32 %v5070_v33, %v3309_v15 }
 0x1fc   :  { %v4984_v57 = vpop.f32.mrf.mxu1  ;;  %v5072_v28 = vpop.f32.mrf.mxu0 }
 0x1fd   :  { %v4985_v1 = vadd.f32 %v4984_v57, %v4983_v50  ;;  %v5073_v38 = vadd.f32 %v5072_v28, %v5071_v36 }
 0x1fe   :  { %v4986_v49 = vpop.f32.mrf.mxu1  ;;  %v5074_v29 = vpop.f32.mrf.mxu0 }
 0x1ff   :  { %v3322_v6 = vadd.f32 %v4985_v1, %v7058_v24  ;;  %v7244_v10 = vadd.f32 %v5073_v38, %v3314_v52 }
 0x200   :  { %v4987_v51 = vpop.f32.mrf.mxu1  ;;  %v5075_v12 = vpop.f32.mrf.mxu0 }
 0x201   :  { %v4988_v30 = vadd.f32 %v4987_v51, %v4986_v49  ;;  %v5076_v59 = vadd.f32 %v5075_v12, %v5074_v29 }
 0x202   :  { %v4989_v8 = vpop.f32.mrf.mxu1  ;;  %v5077_v11 = vpop.f32.mrf.mxu0 }
 0x203   :  { %v3325_v14 = vadd.f32 %v4988_v30, %v7067_v34  ;;  %v7247_v61 = vadd.f32 %v5076_v59, %v3317_v60 }
 0x204   :  { %v4990_v40 = vpop.f32.mrf.mxu1  ;;  %v5078_v16 = vpop.f32.mrf.mxu0 }
 0x205   :  { %v4991_v46 = vadd.f32 %v4990_v40, %v4989_v8  ;;  %v5079_v21 = vadd.f32 %v5078_v16, %v5077_v11 }
 0x206   :  { %v4992_v20 = vpop.f32.mrf.mxu1  ;;  %v5080_v9 = vpop.f32.mrf.mxu0 }
 0x207   :  { %v3330_v24 = vadd.f32 %v4991_v46, %v7076_v48  ;;  %v7250_v56 = vadd.f32 %v5079_v21, %v3322_v6 }
 0x208   :  { %v4993_v19 = vpop.f32.mrf.mxu1  ;;  %v5081_v13 = vpop.f32.mrf.mxu0 }
 0x209   :  { %v4994_v15 = vadd.f32 %v4993_v19, %v4992_v20  ;;  %v5082_v39 = vadd.f32 %v5081_v13, %v5080_v9 }
 0x20a   :  { %v4995_v42 = vpop.f32.mrf.mxu1  ;;  %v5083_v35 = vpop.f32.mrf.mxu0 }
 0x20b   :  { %v3333_v34 = vadd.f32 %v4994_v15, %v7085_v58  ;;  %v7253_v25 = vadd.f32 %v5082_v39, %v3325_v14 }
 0x20c   :  { %v4996_v53 = vpop.f32.mrf.mxu1  ;;  %v5084_v43 = vpop.f32.mrf.mxu0 }
 0x20d   :  { %v4997_v52 = vadd.f32 %v4996_v53, %v4995_v42  ;;  %v5085_v27 = vadd.f32 %v5084_v43, %v5083_v35 }
 0x20e   :  { %v4998_v45 = vpop.f32.mrf.mxu1  ;;  %v5086_v32 = vpop.f32.mrf.mxu0 }
 0x20f   :  { %v3338_v48 = vadd.f32 %v4997_v52, %v7094_v5  ;;  %v7256_v33 = vadd.f32 %v5085_v27, %v3330_v24 }
 0x210   :  { %v4999_v50 = vpop.f32.mrf.mxu1  ;;  %v5087_v36 = vpop.f32.mrf.mxu0 }
 0x211   :  { %v5000_v60 = vadd.f32 %v4999_v50, %v4998_v45  ;;  %v5088_v57 = vadd.f32 %v5087_v36, %v5086_v32 }
 0x212   :  { %v5001_v28 = vpop.f32.mrf.mxu1  ;;  %v5089_v1 = vpop.f32.mrf.mxu0 }
 0x213   :  { %v3341_v58 = vadd.f32 %v5000_v60, %v7103_v17  ;;  %v7259_v38 = vadd.f32 %v5088_v57, %v3333_v34 }
 0x214   :  { %v5002_v49 = vpop.f32.mrf.mxu1  ;;  %v5090_v29 = vpop.f32.mrf.mxu0 }
 0x215   :  { %v5003_v6 = vadd.f32 %v5002_v49, %v5001_v28  ;;  %v5091_v51 = vadd.f32 %v5090_v29, %v5089_v1 }
 0x216   :  { %v5004_v12 = vpop.f32.mrf.mxu1  ;;  %v5092_v30 = vpop.f32.mrf.mxu0 }
 0x217   :  { %v3346_v5 = vadd.f32 %v5003_v6, %v7112_v63  ;;  %v7262_v59 = vadd.f32 %v5091_v51, %v3338_v48 }
 0x218   :  { %v5005_v8 = vpop.f32.mrf.mxu1  ;;  %v5093_v11 = vpop.f32.mrf.mxu0 }
 0x219   :  { %v5006_v14 = vadd.f32 %v5005_v8, %v5004_v12  ;;  %v5094_v40 = vadd.f32 %v5093_v11, %v5092_v30 }
 0x21a   :  { %v5007_v16 = vpop.f32.mrf.mxu1  ;;  %v5095_v46 = vpop.f32.mrf.mxu0 }
 0x21b   :  { %v3349_v17 = vadd.f32 %v5006_v14, %v7121_v7  ;;  %v7265_v21 = vadd.f32 %v5094_v40, %v3341_v58 }
 0x21c   :  { %v5008_v20 = vpop.f32.mrf.mxu1  ;;  %v5096_v9 = vpop.f32.mrf.mxu0 }
 0x21d   :  { %v5009_v24 = vadd.f32 %v5008_v20, %v5007_v16  ;;  %v5097_v19 = vadd.f32 %v5096_v9, %v5095_v46 }
 0x21e   :  { %v5010_v13 = vpop.f32.mrf.mxu1  ;;  %v5098_v15 = vpop.f32.mrf.mxu0 }
 0x21f   :  { %v3354_v63 = vadd.f32 %v5009_v24, %v7130_v41  ;;  %v7268_v39 = vadd.f32 %v5097_v19, %v3346_v5 }
 0x220   :  { %v5011_v42 = vpop.f32.mrf.mxu1  ;;  %v5099_v35 = vpop.f32.mrf.mxu0 }
 0x221   :  { %v5012_v34 = vadd.f32 %v5011_v42, %v5010_v13  ;;  %v5100_v53 = vadd.f32 %v5099_v35, %v5098_v15 }
 0x222   :  { %v5013_v43 = vpop.f32.mrf.mxu1  ;;  %v5101_v52 = vpop.f32.mrf.mxu0 }
 0x223   :  { %v3357_v7 = vadd.f32 %v5012_v34, %v7139_v62  ;;  %v7271_v27 = vadd.f32 %v5100_v53, %v3349_v17 }
 0x224   :  { %v5014_v45 = vpop.f32.mrf.mxu1  ;;  %v5102_v32 = vpop.f32.mrf.mxu0 }
 0x225   :  { %v5015_v48 = vadd.f32 %v5014_v45, %v5013_v43  ;;  %v5103_v50 = vadd.f32 %v5102_v32, %v5101_v52 }
 0x226   :  { %v5016_v36 = vpop.f32.mrf.mxu1  ;;  %v5104_v60 = vpop.f32.mrf.mxu0 }
 0x227   :  { %v3362_v41 = vadd.f32 %v5015_v48, %v7148_v18  ;;  %v7274_v57 = vadd.f32 %v5103_v50, %v3354_v63 }
 0x228   :  { %v5017_v28 = vpop.f32.mrf.mxu1  ;;  %v5105_v1 = vpop.f32.mrf.mxu0 }
 0x229   :  { %v5018_v58 = vadd.f32 %v5017_v28, %v5016_v36  ;;  %v5106_v49 = vadd.f32 %v5105_v1, %v5104_v60 }
 0x22a   :  { %v5019_v29 = vpop.f32.mrf.mxu1  ;;  %v5107_v6 = vpop.f32.mrf.mxu0 }
 0x22b   :  { %v3365_v62 = vadd.f32 %v5018_v58, %v7157_v44  ;;  %v7277_v51 = vadd.f32 %v5106_v49, %v3357_v7 }
 0x22c   :  { %v5020_v12 = vpop.f32.mrf.mxu1  ;;  %v5108_v30 = vpop.f32.mrf.mxu0 }
 0x22d   :  { %v5021_v5 = vadd.f32 %v5020_v12, %v5019_v29  ;;  %v5109_v8 = vadd.f32 %v5108_v30, %v5107_v6 }
 0x22e   :  { %v5022_v11 = vpop.f32.mrf.mxu1  ;;  %v5110_v14 = vpop.f32.mrf.mxu0 }
 0x22f   :  { %v3370_v18 = vadd.f32 %v5021_v5, %v7166_v2  ;;  %v7280_v40 = vadd.f32 %v5109_v8, %v3362_v41 }
 0x230   :  { %v5023_v16 = vpop.f32.mrf.mxu1  ;;  %v5111_v46 = vpop.f32.mrf.mxu0 }
 0x231   :  { %v5024_v17 = vadd.f32 %v5023_v16, %v5022_v11  ;;  %v5112_v20 = vadd.f32 %v5111_v46, %v5110_v14 }
 0x232   :  { %v5025_v9 = vpop.f32.mrf.mxu1  ;;  %v5113_v24 = vpop.f32.mrf.mxu0 }
 0x233   :  { %v3373_v44 = vadd.f32 %v5024_v17, %v7175_v23  ;;  %v7283_v19 = vadd.f32 %v5112_v20, %v3365_v62 }
 0x234   :  { %v5026_v13 = vpop.f32.mrf.mxu1  ;;  %v5114_v15 = vpop.f32.mrf.mxu0 }
 0x235   :  { %v5027_v63 = vadd.f32 %v5026_v13, %v5025_v9  ;;  %v5115_v42 = vadd.f32 %v5114_v15, %v5113_v24 }
 0x236   :  { %v5028_v35 = vpop.f32.mrf.mxu1  ;;  %v5116_v34 = vpop.f32.mrf.mxu0 }
 0x237   :  { %v3378_v2 = vadd.f32 %v5027_v63, %v7184_v47  ;;  %v7286_v53 = vadd.f32 %v5115_v42, %v3370_v18 }
 0x238   :  { %v5029_v43 = vpop.f32.mrf.mxu1  ;;  %v5117_v52 = vpop.f32.mrf.mxu0 }
 0x239   :  { %v5030_v7 = vadd.f32 %v5029_v43, %v5028_v35  ;;  %v5118_v45 = vadd.f32 %v5117_v52, %v5116_v34 }
 0x23a   :  { %v5031_v32 = vpop.f32.mrf.mxu1  ;;  %v5119_v48 = vpop.f32.mrf.mxu0 }
 0x23b   :  { %v3381_v23 = vadd.f32 %v5030_v7, %v7193_v3  ;;  %v7289_v50 = vadd.f32 %v5118_v45, %v3373_v44 }
 0x23c   :  { %v5032_v36 = vpop.f32.mrf.mxu1  ;;  %v5120_v60 = vpop.f32.mrf.mxu0 }
 0x23d   :  { %v5033_v41 = vadd.f32 %v5032_v36, %v5031_v32  ;;  %v5121_v28 = vadd.f32 %v5120_v60, %v5119_v48 }
 0x23e   :  { %v5034_v1 = vpop.f32.mrf.mxu1  ;;  %v5122_v58 = vpop.f32.mrf.mxu0 }
 0x23f   :  { %v3386_v47 = vadd.f32 %v5033_v41, %v7202_v22  ;;  %v7292_v49 = vadd.f32 %v5121_v28, %v3378_v2 }
 0x240   :  { %v5035_v29 = vpop.f32.mrf.mxu1  ;;  %v5123_v6 = vpop.f32.mrf.mxu0 }
 0x241   :  { %v5036_v62 = vadd.f32 %v5035_v29, %v5034_v1  ;;  %v5124_v12 = vadd.f32 %v5123_v6, %v5122_v58 }
 0x242   :  { %v5037_v30 = vpop.f32.mrf.mxu1  ;;  %v5125_v5 = vpop.f32.mrf.mxu0 }
 0x243   :  { %v3389_v3 = vadd.f32 %v5036_v62, %v7211_v37  ;;  %v7295_v8 = vadd.f32 %v5124_v12, %v3381_v23 }
 0x244   :  { %v5038_v11 = vpop.f32.mrf.mxu1  ;;  %v5126_v14 = vpop.f32.mrf.mxu0 }
 0x245   :  { %v5039_v18 = vadd.f32 %v5038_v11, %v5037_v30  ;;  %v5127_v16 = vadd.f32 %v5126_v14, %v5125_v5 }
 0x246   :  { %v5040_v46 = vpop.f32.mrf.mxu1  ;;  %v5128_v17 = vpop.f32.mrf.mxu0 }
 0x247   :  { %v3394_v22 = vadd.f32 %v5039_v18, %v7219_v55  ;;  %v7298_v20 = vadd.f32 %v5127_v16, %v3386_v47 }
 0x248   :  { %v5041_v9 = vpop.f32.mrf.mxu1  ;;  %v5129_v24 = vpop.f32.mrf.mxu0 }
 0x249   :  { %v5042_v44 = vadd.f32 %v5041_v9, %v5040_v46  ;;  %v5130_v13 = vadd.f32 %v5129_v24, %v5128_v17 }
 0x24a   :  { %v5131_v15 = vpop.f32.mrf.mxu0  ;;  %v5153_v63 = vpop.f32.mrf.mxu1 }
 0x24b   :  { %v3397_v37 = vadd.f32 %v5042_v44, %v7225_v54  ;;  %v7301_v42 = vadd.f32 %v5130_v13, %v3389_v3 }
 0x24c   :  { %v5132_v35 = vpop.f32.mrf.mxu0  ;;  %v5154_v34 = vpop.f32.mrf.mxu1 }
 0x24d   :  { %v5133_v2 = vadd.f32 %v5132_v35, %v5131_v15  ;;  %v5155_v36 = vadd.f32 %v5154_v34, %v5153_v63 }
 0x24e   :  { %v5134_v43 = vpop.f32.mrf.mxu0  ;;  %v5156_v52 = vpop.f32.mrf.mxu1 }
 0x24f   :  { %v7303_v7 = vadd.f32 %v5133_v2, %v3394_v22  ;;  %v3572_v29 = vadd.f32 %v5155_v36, %v7232_v4 }
 0x250   :  { %v5135_v55 = vpop.f32.mrf.mxu0  ;;  %v5157_v45 = vpop.f32.mrf.mxu1 }
 0x251   :  { %v5136_v32 = vadd.f32 %v5135_v55, %v5134_v43  ;;  %v5158_v54 = vadd.f32 %v5157_v45, %v5156_v52 }
 0x252   :  { %v5159_v48 = vpop.f32.mrf.mxu1  ;;  %v5247_v23 = vpop.f32.mrf.mxu0 }
 0x253   :  { %v7305_v60 = vadd.f32 %v5136_v32, %v3397_v37  ;;  %v3575_v12 = vadd.f32 %v5158_v54, %v7235_v31 }
 0x254   :  { %v5160_v41 = vpop.f32.mrf.mxu1  ;;  %v5248_v28 = vpop.f32.mrf.mxu0 }
 0x255   :  { %v5249_v1 = vadd.f32 %v5248_v28, %v5247_v23  ;;  %v5161_v14 = vadd.f32 %v5160_v41, %v5159_v48 }
 0x256   :  { %v5162_v58 = vpop.f32.mrf.mxu1  ;;  %v5250_v47 = vpop.f32.mrf.mxu0 }
 0x257   :  { %v3709_v30 = vadd.f32 %v5249_v1, %v3572_v29  ;;  %v3580_v4 = vadd.f32 %v5161_v14, %v7238_v26 }
 0x258   :  { %v5163_v6 = vpop.f32.mrf.mxu1  ;;  %v5251_v62 = vpop.f32.mrf.mxu0 }
 0x259   :  { %v5252_v5 = vadd.f32 %v5251_v62, %v5250_v47  ;;  %v3811_v17 = vmax.f32 %v3709_v30, 0.0  ;;  %v5164_v22 = vadd.f32 %v5163_v6, %v5162_v58 }
 0x25a   :  { %v5165_v3 = vpop.f32.mrf.mxu1  ;;  %v5253_v11 = vpop.f32.mrf.mxu0 }
 0x25b   :  { %v3712_v18 = vadd.f32 %v5252_v5, %v3575_v12  ;;  %v3583_v31 = vadd.f32 %v5164_v22, %v7241_v0 }
 0x25c   :  { %v5166_v16 = vpop.f32.mrf.mxu1  ;;  %v5254_v46 = vpop.f32.mrf.mxu0 }
 0x25d   :  { %v3812_v9 = vmax.f32 %v3712_v18, 0.0  ;;  %v5255_v24 = vadd.f32 %v5254_v46, %v5253_v11  ;;  %v5167_v52 = vadd.f32 %v5166_v16, %v5165_v3 }
 0x25e   :  { %v5168_v44 = vpop.f32.mrf.mxu1  ;;  %v5256_v13 = vpop.f32.mrf.mxu0 }
 0x25f   :  { %v4405_v15 = vpack.c.bf16 %v3812_v9, %v3811_v17  ;;  %v3717_v35 = vadd.f32 %v5255_v24, %v3580_v4  ;;  %v3588_v0 = vadd.f32 %v5167_v52, %v7244_v10 }
 0x260   :  { %v5169_v63 = vpop.f32.mrf.mxu1  ;;  %v5257_v37 = vpop.f32.mrf.mxu0 }
 0x261   :  { %4406 = vst [vmem:[%s7375_s3] sm:$0xff] %v4405_v15   ;;  %v5258_v34 = vadd.f32 %v5257_v37, %v5256_v13  ;;  %v3813_v48 = vmax.f32 %v3717_v35, 0.0  ;;  %v5170_v23 = vadd.f32 %v5169_v63, %v5168_v44 }
 0x262   :  { %v5171_v2 = vpop.f32.mrf.mxu1  ;;  %v5259_v43 = vpop.f32.mrf.mxu0 }
 0x263   :  { %v3720_v55 = vadd.f32 %v5258_v34, %v3583_v31  ;;  %v3591_v47 = vadd.f32 %v5170_v23, %v7247_v61 }
 0x264   :  { %v5172_v45 = vpop.f32.mrf.mxu1  ;;  %v5260_v32 = vpop.f32.mrf.mxu0 }
 0x265   :  { %v3814_v26 = vmax.f32 %v3720_v55, 0.0  ;;  %v5261_v36 = vadd.f32 %v5260_v32, %v5259_v43  ;;  %v5173_v30 = vadd.f32 %v5172_v45, %v5171_v2 }
 0x266   :  { %v5174_v41 = vpop.f32.mrf.mxu1  ;;  %v5262_v28 = vpop.f32.mrf.mxu0 }
 0x267   :  { %v4410_v54 = vpack.c.bf16 %v3814_v26, %v3813_v48  ;;  %v3725_v29 = vadd.f32 %v5261_v36, %v3588_v0  ;;  %v3596_v61 = vadd.f32 %v5173_v30, %v7250_v56 }
 0x268   :  { %v5175_v1 = vpop.f32.mrf.mxu1  ;;  %v5263_v58 = vpop.f32.mrf.mxu0 }
 0x269   :  { %4467 = vst [vmem:[%s7375_s3 + $0x8] sm:$0xff] %v4410_v54   ;;  %v5264_v6 = vadd.f32 %v5263_v58, %v5262_v28  ;;  %v3815_v14 = vmax.f32 %v3725_v29, 0.0  ;;  %v5176_v18 = vadd.f32 %v5175_v1, %v5174_v41 }
 0x26a   :  { %v5177_v62 = vpop.f32.mrf.mxu1  ;;  %v5265_v12 = vpop.f32.mrf.mxu0 }
 0x26b   :  { %v3728_v5 = vadd.f32 %v5264_v6, %v3591_v47  ;;  %v3599_v44 = vadd.f32 %v5176_v18, %v7253_v25 }
 0x26c   :  { %v5178_v3 = vpop.f32.mrf.mxu1  ;;  %v5266_v11 = vpop.f32.mrf.mxu0 }
 0x26d   :  { %v3816_v10 = vmax.f32 %v3728_v5, 0.0  ;;  %v5267_v16 = vadd.f32 %v5266_v11, %v5265_v12  ;;  %v5179_v37 = vadd.f32 %v5178_v3, %v5177_v62 }
 0x26e   :  { %v5180_v46 = vpop.f32.mrf.mxu1  ;;  %v5268_v17 = vpop.f32.mrf.mxu0 }
 0x26f   :  { %v4415_v22 = vpack.c.bf16 %v3816_v10, %v3815_v14  ;;  %v3733_v13 = vadd.f32 %v5267_v16, %v3596_v61  ;;  %v3604_v25 = vadd.f32 %v5179_v37, %v7256_v33 }
 0x270   :  { %v5181_v9 = vpop.f32.mrf.mxu1  ;;  %v5269_v24 = vpop.f32.mrf.mxu0 }
 0x271   :  { %4468 = vst [vmem:[%s7375_s3 + $0x10] sm:$0xff] %v4415_v22   ;;  %v5270_v4 = vadd.f32 %v5269_v24, %v5268_v17  ;;  %v3817_v2 = vmax.f32 %v3733_v13, 0.0  ;;  %v5182_v43 = vadd.f32 %v5181_v9, %v5180_v46 }
 0x272   :  { %v5183_v15 = vpop.f32.mrf.mxu1  ;;  %v5271_v63 = vpop.f32.mrf.mxu0 }
 0x273   :  { %v3736_v31 = vadd.f32 %v5270_v4, %v3599_v44  ;;  %v3607_v26 = vadd.f32 %v5182_v43, %v7259_v38 }
 0x274   :  { %v5184_v35 = vpop.f32.mrf.mxu1  ;;  %v5272_v34 = vpop.f32.mrf.mxu0 }
 0x275   :  { %v3818_v56 = vmax.f32 %v3736_v31, 0.0  ;;  %v5273_v52 = vadd.f32 %v5272_v34, %v5271_v63  ;;  %v5185_v54 = vadd.f32 %v5184_v35, %v5183_v15 }
 0x276   :  { %v5186_v55 = vpop.f32.mrf.mxu1  ;;  %v5274_v45 = vpop.f32.mrf.mxu0 }
 0x277   :  { %v4420_v32 = vpack.c.bf16 %v3818_v56, %v3817_v2  ;;  %v3741_v36 = vadd.f32 %v5273_v52, %v3604_v25  ;;  %v3612_v38 = vadd.f32 %v5185_v54, %v7262_v59 }
 0x278   :  { %v5187_v48 = vpop.f32.mrf.mxu1  ;;  %v5275_v23 = vpop.f32.mrf.mxu0 }
 0x279   :  { %4469 = vst [vmem:[%s7375_s3 + $0x18] sm:$0xff] %v4420_v32   ;;  %v5276_v41 = vadd.f32 %v5275_v23, %v5274_v45  ;;  %v3819_v29 = vmax.f32 %v3741_v36, 0.0  ;;  %v5188_v6 = vadd.f32 %v5187_v48, %v5186_v55 }
 0x27a   :  { %v5189_v28 = vpop.f32.mrf.mxu1  ;;  %v5277_v0 = vpop.f32.mrf.mxu0 }
 0x27b   :  { %v3744_v1 = vadd.f32 %v5276_v41, %v3607_v26  ;;  %v3615_v14 = vadd.f32 %v5188_v6, %v7265_v21 }
 0x27c   :  { %v5190_v58 = vpop.f32.mrf.mxu1  ;;  %v5278_v47 = vpop.f32.mrf.mxu0 }
 0x27d   :  { %v3820_v33 = vmax.f32 %v3744_v1, 0.0  ;;  %v5279_v62 = vadd.f32 %v5278_v47, %v5277_v0  ;;  %v5191_v17 = vadd.f32 %v5190_v58, %v5189_v28 }
 0x27e   :  { %v5192_v12 = vpop.f32.mrf.mxu1  ;;  %v5280_v30 = vpop.f32.mrf.mxu0 }
 0x27f   :  { %v4425_v5 = vpack.c.bf16 %v3820_v33, %v3819_v29  ;;  %v3749_v18 = vadd.f32 %v5279_v62, %v3612_v38  ;;  %v3620_v21 = vadd.f32 %v5191_v17, %v7268_v39 }
 0x280   :  { %v5193_v3 = vpop.f32.mrf.mxu1  ;;  %v5281_v11 = vpop.f32.mrf.mxu0 }
 0x281   :  { %4470 = vst [vmem:[%s7375_s3 + $0x20] sm:$0xff] %v4425_v5   ;;  %v5282_v10 = vadd.f32 %v5281_v11, %v5280_v30  ;;  %v3821_v24 = vmax.f32 %v3749_v18, 0.0  ;;  %v5194_v44 = vadd.f32 %v5193_v3, %v5192_v12 }
 0x282   :  { %v5195_v16 = vpop.f32.mrf.mxu1  ;;  %v5283_v46 = vpop.f32.mrf.mxu0 }
 0x283   :  { %v3752_v61 = vadd.f32 %v5282_v10, %v3615_v14  ;;  %v3623_v35 = vadd.f32 %v5194_v44, %v7271_v27 }
 0x284   :  { %v5196_v22 = vpop.f32.mrf.mxu1  ;;  %v5284_v9 = vpop.f32.mrf.mxu0 }
 0x285   :  { %v3822_v59 = vmax.f32 %v3752_v61, 0.0  ;;  %v5285_v13 = vadd.f32 %v5284_v9, %v5283_v46  ;;  %v5197_v52 = vadd.f32 %v5196_v22, %v5195_v16 }
 0x286   :  { %v5198_v4 = vpop.f32.mrf.mxu1  ;;  %v5286_v15 = vpop.f32.mrf.mxu0 }
 0x287   :  { %v4430_v63 = vpack.c.bf16 %v3822_v59, %v3821_v24  ;;  %v3757_v34 = vadd.f32 %v5285_v13, %v3620_v21  ;;  %v3628_v27 = vadd.f32 %v5197_v52, %v7274_v57 }
 0x288   :  { %v5199_v37 = vpop.f32.mrf.mxu1  ;;  %v5287_v31 = vpop.f32.mrf.mxu0 }
 0x289   :  { %4471 = vst [vmem:[%s7375_s3 + $0x28] sm:$0xff] %v4430_v63   ;;  %v5288_v2 = vadd.f32 %v5287_v31, %v5286_v15  ;;  %v3823_v32 = vmax.f32 %v3757_v34, 0.0  ;;  %v5200_v48 = vadd.f32 %v5199_v37, %v5198_v4 }
 0x28a   :  { %v5201_v43 = vpop.f32.mrf.mxu1  ;;  %v5289_v56 = vpop.f32.mrf.mxu0 }
 0x28b   :  { %v3760_v55 = vadd.f32 %v5288_v2, %v3623_v35  ;;  %v3631_v54 = vadd.f32 %v5200_v48, %v7277_v51 }
 0x28c   :  { %v5202_v45 = vpop.f32.mrf.mxu1  ;;  %v5290_v25 = vpop.f32.mrf.mxu0 }
 0x28d   :  { %v3824_v39 = vmax.f32 %v3760_v55, 0.0  ;;  %v5291_v23 = vadd.f32 %v5290_v25, %v5289_v56  ;;  %v5203_v6 = vadd.f32 %v5202_v45, %v5201_v43 }
 0x28e   :  { %v5204_v26 = vpop.f32.mrf.mxu1  ;;  %v5292_v36 = vpop.f32.mrf.mxu0 }
 0x28f   :  { %v4435_v41 = vpack.c.bf16 %v3824_v39, %v3823_v32  ;;  %v3765_v1 = vadd.f32 %v5291_v23, %v3628_v27  ;;  %v3636_v51 = vadd.f32 %v5203_v6, %v7280_v40 }
 0x290   :  { %v5205_v28 = vpop.f32.mrf.mxu1  ;;  %v5293_v0 = vpop.f32.mrf.mxu0 }
 0x291   :  { %4472 = vst [vmem:[%s7375_s3 + $0x30] sm:$0xff] %v4435_v41   ;;  %v5294_v58 = vadd.f32 %v5293_v0, %v5292_v36  ;;  %v3825_v30 = vmax.f32 %v3765_v1, 0.0  ;;  %v5206_v38 = vadd.f32 %v5205_v28, %v5204_v26 }
 0x292   :  { %v5207_v47 = vpop.f32.mrf.mxu1  ;;  %v5295_v29 = vpop.f32.mrf.mxu0 }
 0x293   :  { %v3768_v33 = vadd.f32 %v5294_v58, %v3631_v54  ;;  %v3639_v16 = vadd.f32 %v5206_v38, %v7283_v19 }
 0x294   :  { %v5208_v62 = vpop.f32.mrf.mxu1  ;;  %v5296_v12 = vpop.f32.mrf.mxu0 }
 0x295   :  { %v3826_v57 = vmax.f32 %v3768_v33, 0.0  ;;  %v5297_v5 = vadd.f32 %v5296_v12, %v5295_v29  ;;  %v5209_v9 = vadd.f32 %v5208_v62, %v5207_v47 }
 0x296   :  { %v5210_v3 = vpop.f32.mrf.mxu1  ;;  %v5298_v11 = vpop.f32.mrf.mxu0 }
 0x297   :  { %v4440_v14 = vpack.c.bf16 %v3826_v57, %v3825_v30  ;;  %v3773_v46 = vadd.f32 %v5297_v5, %v3636_v51  ;;  %v3644_v19 = vadd.f32 %v5209_v9, %v7286_v53 }
 0x298   :  { %v5211_v18 = vpop.f32.mrf.mxu1  ;;  %v5299_v10 = vpop.f32.mrf.mxu0 }
 0x299   :  { %4473 = vst [vmem:[%s7375_s3 + $0x38] sm:$0xff] %v4440_v14   ;;  %v5300_v17 = vadd.f32 %v5299_v10, %v5298_v11  ;;  %v3827_v13 = vmax.f32 %v3773_v46, 0.0  ;;  %v5212_v4 = vadd.f32 %v5211_v18, %v5210_v3 }
 0x29a   :  { %v5213_v61 = vpop.f32.mrf.mxu1  ;;  %v5301_v22 = vpop.f32.mrf.mxu0 }
 0x29b   :  { %v3776_v24 = vadd.f32 %v5300_v17, %v3639_v16  ;;  %v3647_v34 = vadd.f32 %v5212_v4, %v7289_v50 }
 0x29c   :  { %v5214_v44 = vpop.f32.mrf.mxu1  ;;  %v5302_v59 = vpop.f32.mrf.mxu0 }
 0x29d   :  { %v3828_v40 = vmax.f32 %v3776_v24, 0.0  ;;  %v5303_v15 = vadd.f32 %v5302_v59, %v5301_v22  ;;  %v5215_v55 = vadd.f32 %v5214_v44, %v5213_v61 }
 0x29e   :  { %v5216_v21 = vpop.f32.mrf.mxu1  ;;  %v5304_v63 = vpop.f32.mrf.mxu0 }
 0x29f   :  { %v4445_v37 = vpack.c.bf16 %v3828_v40, %v3827_v13  ;;  %v3781_v2 = vadd.f32 %v5303_v15, %v3644_v19  ;;  %v3652_v50 = vadd.f32 %v5215_v55, %v7292_v49 }
 0x2a0   :  { %v5217_v31 = vpop.f32.mrf.mxu1  ;;  %v5305_v35 = vpop.f32.mrf.mxu0 }
 0x2a1   :  { %4474 = vst [vmem:[%s7375_s3 + $0x40] sm:$0xff] %v4445_v37   ;;  %v5306_v43 = vadd.f32 %v5305_v35, %v5304_v63  ;;  %v3829_v48 = vmax.f32 %v3781_v2, 0.0  ;;  %v5218_v39 = vadd.f32 %v5217_v31, %v5216_v21 }
 0x2a2   :  { %v5219_v56 = vpop.f32.mrf.mxu1  ;;  %v5307_v52 = vpop.f32.mrf.mxu0 }
 0x2a3   :  { %v3784_v45 = vadd.f32 %v5306_v43, %v3647_v34  ;;  %v3655_v0 = vadd.f32 %v5218_v39, %v7295_v8 }
 0x2a4   :  { %v5220_v25 = vpop.f32.mrf.mxu1  ;;  %v5308_v32 = vpop.f32.mrf.mxu0 }
 0x2a5   :  { %v3830_v53 = vmax.f32 %v3784_v45, 0.0  ;;  %v5309_v23 = vadd.f32 %v5308_v32, %v5307_v52  ;;  %v5221_v29 = vadd.f32 %v5220_v25, %v5219_v56 }
 0x2a6   :  { %v5222_v26 = vpop.f32.mrf.mxu1  ;;  %v5310_v36 = vpop.f32.mrf.mxu0 }
 0x2a7   :  { %v4450_v27 = vpack.c.bf16 %v3830_v53, %v3829_v48  ;;  %v3789_v54 = vadd.f32 %v5309_v23, %v3652_v50  ;;  %v3660_v8 = vadd.f32 %v5221_v29, %v7298_v20 }
 0x2a8   :  { %v5223_v41 = vpop.f32.mrf.mxu1  ;;  %v5311_v28 = vpop.f32.mrf.mxu0 }
 0x2a9   :  { %4475 = vst [vmem:[%s7375_s3 + $0x48] sm:$0xff] %v4450_v27   ;;  %v5312_v1 = vadd.f32 %v5311_v28, %v5310_v36  ;;  %v3831_v12 = vmax.f32 %v3789_v54, 0.0  ;;  %v5224_v30 = vadd.f32 %v5223_v41, %v5222_v26 }
 0x2aa   :  { %v5225_v58 = vpop.f32.mrf.mxu1  ;;  %v5313_v47 = vpop.f32.mrf.mxu0 }
 0x2ab   :  { %v3792_v6 = vadd.f32 %v5312_v1, %v3655_v0  ;;  %v3663_v51 = vadd.f32 %v5224_v30, %v7301_v42 }
 0x2ac   :  { %v5226_v33 = vpop.f32.mrf.mxu1  ;;  %v5314_v62 = vpop.f32.mrf.mxu0 }
 0x2ad   :  { %v3832_v49 = vmax.f32 %v3792_v6, 0.0  ;;  %v5315_v38 = vadd.f32 %v5314_v62, %v5313_v47  ;;  %v5227_v46 = vadd.f32 %v5226_v33, %v5225_v58 }
 0x2ae   :  { %v5228_v57 = vpop.f32.mrf.mxu1  ;;  %v5316_v5 = vpop.f32.mrf.mxu0 }
 0x2af   :  { %v4455_v3 = vpack.c.bf16 %v3832_v49, %v3831_v12  ;;  %v3797_v14 = vadd.f32 %v5315_v38, %v3660_v8  ;;  %v3668_v59 = vadd.f32 %v5227_v46, %v7303_v7 }
 0x2b0   :  { %v5317_v11 = vpop.f32.mrf.mxu0  ;;  %v5229_v10 = vpop.f32.mrf.mxu1 }
 0x2b1   :  { %4476 = vst [vmem:[%s7375_s3 + $0x50] sm:$0xff] %v4455_v3   ;;  %v5318_v18 = vadd.f32 %v5317_v11, %v5316_v5  ;;  %v3833_v22 = vmax.f32 %v3797_v14, 0.0  ;;  %v5230_v9 = vadd.f32 %v5229_v10, %v5228_v57 }
 0x2b2   :  { %v5319_v16 = vpop.f32.mrf.mxu0 }
 0x2b3   :  { %v3800_v17 = vadd.f32 %v5318_v18, %v3663_v51  ;;  %v3671_v4 = vadd.f32 %v5230_v9, %v7305_v60 }
 0x2b4   :  { %v5320_v61 = vpop.f32.mrf.mxu0 }
 0x2b5   :  { %v3834_v24 = vmax.f32 %v3800_v17, 0.0  ;;  %v5321_v44 = vadd.f32 %v5320_v61, %v5319_v16 }
 0x2b6   :  { %v5322_v20 = vpop.f32.mrf.mxu0 }
 0x2b7   :  { %v4460_v13 = vpack.c.bf16 %v3834_v24, %v3833_v22  ;;  %v3805_v40 = vadd.f32 %v5321_v44, %v3668_v59 }
 0x2b8   :  { %v5323_v42 = vpop.f32.mrf.mxu0 }
 0x2b9   :  { %4477 = vst [vmem:[%s7375_s3 + $0x58] sm:$0xff] %v4460_v13   ;;  %v5324_v15 = vadd.f32 %v5323_v42, %v5322_v20  ;;  %v3835_v63 = vmax.f32 %v3805_v40, 0.0 }
 0x2bb   :  { %v3808_v21 = vadd.f32 %v5324_v15, %v3671_v4 }
 0x2bd   :  { %v3836_v19 = vmax.f32 %v3808_v21, 0.0 }
 0x2bf   :  { %v4465_v37 = vpack.c.bf16 %v3836_v19, %v3835_v63 }
 0x2c1   :  { %4478 = vst [vmem:[%s7375_s3 + $0x60] sm:$0xff] %v4465_v37  }

// kernel: cnn_forward.6
= control target key start
LH: loop header
LB: loop body
LE: loop exit
PB: predicated region body
PF: predicated region fallthrough
CT: control target
= control target key end

     0   :  { %s4460_s1 = inlined_call_operand.vmem [shape: bf16[3200,128], index: 1, kind: input, shape index: {}]   ;;  %s4461_s0 = inlined_call_operand.vmem [shape: bf16[32,3200], index: 0, kind: input, shape index: {}]   ;;  %s4462_s2 = inlined_call_operand.vmem [shape: f32[1,128], index: 2, kind: input, shape index: {}]   ;;  %s4463_s3 = inlined_call_operand.vmem [shape: bf16[32,128], index: 3, kind: output, shape index: {}]  }
   0x1   :  { %v3227_v0 = vld [vmem:[%s4460_s1 + $0x78] sm:$0xff]   ;;  %v3231_v4 = vld [vmem:[%s4460_s1 + $0x70] sm:$0xff]   ;;  %v3235_v8 = vld [vmem:[%s4460_s1 + $0x68] sm:$0xff]  }
   0x2   :  { %v3228_v1 = vld [vmem:[%s4460_s1 + $0x38] sm:$0xff]   ;;  %2861 = vmatprep.subr.bf16.mxu0 %v3227_v0  ;;  %v3232_v5 = vld [vmem:[%s4460_s1 + $0x30] sm:$0xff]   ;;  %v3236_v9 = vld [vmem:[%s4460_s1 + $0x28] sm:$0xff]  }
   0x3   :  { %v3229_v2 = vld [vmem:[%s4460_s1 + $0xf8] sm:$0xff]   ;;  %2862 = vmatpush3.bf16.msra.mxu0 %v3228_v1  ;;  %v3233_v6 = vld [vmem:[%s4460_s1 + $0xf0] sm:$0xff]   ;;  %v3237_v10 = vld [vmem:[%s4460_s1 + $0xe8] sm:$0xff]  }
   0x4   :  { %v3230_v3 = vld [vmem:[%s4460_s1 + $0xb8] sm:$0xff]   ;;  %2889 = vmatprep.subr.bf16.mxu1 %v3229_v2  ;;  %2863 = vmatprep.subr.bf16.mxu0 %v3231_v4  ;;  %v3234_v7 = vld [vmem:[%s4460_s1 + $0xb0] sm:$0xff]   ;;  %v3238_v11 = vld [vmem:[%s4460_s1 + $0xa8] sm:$0xff]  }
   0x5   :  { %2890 = vmatpush3.bf16.msra.mxu1 %v3230_v3  ;;  %v3239_v12 = vld [vmem:[%s4460_s1 + $0x60] sm:$0xff]   ;;  %v3243_v16 = vld [vmem:[%s4460_s1 + $0x58] sm:$0xff]   ;;  %v3247_v20 = vld [vmem:[%s4460_s1 + $0x50] sm:$0xff]  }
   0x6   :  { %2891 = vmatprep.subr.bf16.mxu1 %v3233_v6  ;;  %v3240_v13 = vld [vmem:[%s4460_s1 + $0x20] sm:$0xff]   ;;  %v3244_v17 = vld [vmem:[%s4460_s1 + $0x18] sm:$0xff]   ;;  %v3248_v21 = vld [vmem:[%s4460_s1 + $0x10] sm:$0xff]  }
   0x7   :  { %2864 = vmatpush3.bf16.msra.mxu0 %v3232_v5  ;;  %v3241_v14 = vld [vmem:[%s4460_s1 + $0xe0] sm:$0xff]   ;;  %v3245_v18 = vld [vmem:[%s4460_s1 + $0xd8] sm:$0xff]   ;;  %v3249_v22 = vld [vmem:[%s4460_s1 + $0xd0] sm:$0xff]  }
   0x8   :  { %2865 = vmatprep.subr.bf16.mxu0 %v3235_v8  ;;  %v3242_v15 = vld [vmem:[%s4460_s1 + $0xa0] sm:$0xff]   ;;  %v3246_v19 = vld [vmem:[%s4460_s1 + $0x98] sm:$0xff]   ;;  %v3250_v23 = vld [vmem:[%s4460_s1 + $0x90] sm:$0xff]  }
   0x9   :  { %2892 = vmatpush3.bf16.msra.mxu1 %v3234_v7  ;;  %v3251_v24 = vld [vmem:[%s4460_s1 + $0x48] sm:$0xff]   ;;  %v3255_v28 = vld [vmem:[%s4460_s1 + $0x40] sm:$0xff]   ;;  %v3262_v34 = vld [vmem:[%s4460_s1 + $0x178] sm:$0xff]  }
   0xa   :  { %2893 = vmatprep.subr.bf16.mxu1 %v3237_v10  ;;  %v3252_v25 = vld [vmem:[%s4460_s1 + $0x8] sm:$0xff]   ;;  %v3256_v29 = vld [vmem:[%s4460_s1] sm:$0xff]   ;;  %v3266_v37 = vld [vmem:[%s4460_s1 + $0x138] sm:$0xff]  }
   0xb   :  { %2866 = vmatpush3.bf16.msra.mxu0 %v3236_v9  ;;  %v3253_v26 = vld [vmem:[%s4460_s1 + $0xc8] sm:$0xff]   ;;  %v3257_v30 = vld [vmem:[%s4460_s1 + $0xc0] sm:$0xff]   ;;  %v3267_v38 = vld [vmem:[%s4460_s1 + $0x1f8] sm:$0xff]  }
   0xc   :  { %2867 = vmatprep.subr.bf16.mxu0 %v3239_v12  ;;  %v3254_v27 = vld [vmem:[%s4460_s1 + $0x88] sm:$0xff]   ;;  %v3258_v31 = vld [vmem:[%s4461_s0] ss:$100 sps:$4 sm:$0xff]   ;;  %v3268_v39 = vld [vmem:[%s4460_s1 + $0x1b8] sm:$0xff]  }
   0xd   :  { %2894 = vmatpush3.bf16.msra.mxu1 %v3238_v11  ;;  %v3260_v32 = vld [vmem:[%s4461_s0 + $0x4] ss:$100 sps:$4 sm:$0xff]   ;;  %v3265_v36 = vld [vmem:[%s4461_s0 + $0xc] ss:$100 sps:$4 sm:$0xff]   ;;  %v3281_v52 = vld [vmem:[%s4460_s1 + $0x158] sm:$0xff]  }
   0xe   :  { %2895 = vmatprep.subr.bf16.mxu1 %v3241_v14  ;;  %v3261_v33 = vld [vmem:[%s4460_s1 + $0x80] sm:$0xff]   ;;  %1958 = vmatprep.mubr.bf16.mxu0 %v3260_v32  ;;  %v3263_v35 = vld [vmem:[%s4461_s0 + $0x8] ss:$100 sps:$4 sm:$0xff]   ;;  %v3269_v40 = vld [vmem:[%s4460_s1 + $0x170] sm:$0xff]  }
   0xf   :  { %2868 = vmatpush3.bf16.msra.mxu0 %v3240_v13  ;;  %2007 = vmatprep.mubr.bf16.mxu1 %v3265_v36  ;;  %v3270_v41 = vld [vmem:[%s4460_s1 + $0x130] sm:$0xff]   ;;  %v3273_v44 = vld [vmem:[%s4460_s1 + $0x168] sm:$0xff]   ;;  %v3277_v48 = vld [vmem:[%s4460_s1 + $0x160] sm:$0xff]  }
  0x10   :  { %2869 = vmatprep.subr.bf16.mxu0 %v3243_v16  ;;  %v3271_v42 = vld [vmem:[%s4460_s1 + $0x1f0] sm:$0xff]   ;;  %v3274_v45 = vld [vmem:[%s4460_s1 + $0x128] sm:$0xff]   ;;  %v3278_v49 = vld [vmem:[%s4460_s1 + $0x120] sm:$0xff]  }
  0x11   :  { %2896 = vmatpush3.bf16.msra.mxu1 %v3242_v15  ;;  %v3272_v43 = vld [vmem:[%s4460_s1 + $0x1b0] sm:$0xff]   ;;  %v3275_v46 = vld [vmem:[%s4460_s1 + $0x1e8] sm:$0xff]   ;;  %v3279_v50 = vld [vmem:[%s4460_s1 + $0x1e0] sm:$0xff]  }
  0x12   :  { %2897 = vmatprep.subr.bf16.mxu1 %v3245_v18  ;;  %v3276_v47 = vld [vmem:[%s4460_s1 + $0x1a8] sm:$0xff]   ;;  %v3280_v51 = vld [vmem:[%s4460_s1 + $0x1a0] sm:$0xff]   ;;  %v3282_v53 = vld [vmem:[%s4460_s1 + $0x118] sm:$0xff]  }
  0x13   :  { %2870 = vmatpush3.bf16.msra.mxu0 %v3244_v17  ;;  %v3283_v54 = vld [vmem:[%s4461_s0 + $0xcc] ss:$100 sps:$4 sm:$0xff]   ;;  %v3285_v55 = vld [vmem:[%s4460_s1 + $0x1d8] sm:$0xff]   ;;  %v3299_v4 = vld [vmem:[%s4460_s1 + $0x140] sm:$0xff]  }
  0x14   :  { %2871 = vmatprep.subr.bf16.mxu0 %v3247_v20  ;;  %v3286_v56 = vld [vmem:[%s4461_s0 + $0xc8] ss:$100 sps:$4 sm:$0xff]   ;;  %v3287_v57 = vld [vmem:[%s4460_s1 + $0x198] sm:$0xff]   ;;  %v3290_v59 = vld [vmem:[%s4460_s1 + $0x150] sm:$0xff]  }
  0x15   :  { %2898 = vmatpush3.bf16.msra.mxu1 %v3246_v19  ;;  %v3288_v58 = vld [vmem:[%s4461_s0 + $0xd4] ss:$100 sps:$4 sm:$0xff]   ;;  %v3295_v0 = vld [vmem:[%s4460_s1 + $0x148] sm:$0xff]   ;;  %v3300_v5 = vld [vmem:[%s4460_s1 + $0x100] sm:$0xff]  }
  0x16   :  { %2899 = vmatprep.subr.bf16.mxu1 %v3249_v22  ;;  %v3291_v60 = vld [vmem:[%s4461_s0 + $0xd0] ss:$100 sps:$4 sm:$0xff]   ;;  %v3296_v1 = vld [vmem:[%s4460_s1 + $0x108] sm:$0xff]   ;;  %v3301_v6 = vld [vmem:[%s4460_s1 + $0x1c0] sm:$0xff]  }
  0x17   :  { %2872 = vmatpush3.bf16.msra.mxu0 %v3248_v21  ;;  %v3292_v61 = vld [vmem:[%s4460_s1 + $0x110] sm:$0xff]   ;;  %v3297_v2 = vld [vmem:[%s4460_s1 + $0x1c8] sm:$0xff]   ;;  %v3305_v9 = vld [vmem:[%s4460_s1 + $0x180] sm:$0xff]  }
  0x18   :  { %2873 = vmatprep.subr.bf16.mxu0 %v3251_v24  ;;  %v3293_v62 = vld [vmem:[%s4460_s1 + $0x1d0] sm:$0xff]   ;;  %v3298_v3 = vld [vmem:[%s4460_s1 + $0x188] sm:$0xff]   ;;  %v3306_v10 = vld [vmem:[%s4460_s1 + $0x278] sm:$0xff]  }
  0x19   :  { %2900 = vmatpush3.bf16.msra.mxu1 %v3250_v23  ;;  %v3294_v63 = vld [vmem:[%s4460_s1 + $0x190] sm:$0xff]   ;;  %v3307_v11 = vld [vmem:[%s4461_s0 + $0x18] ss:$100 sps:$4 sm:$0xff]   ;;  %v3320_v22 = vld [vmem:[%s4460_s1 + $0x268] sm:$0xff]  }
  0x1a   :  { %2901 = vmatprep.subr.bf16.mxu1 %v3253_v26  ;;  %v3302_v7 = vld [vmem:[%s4461_s0 + $0x10] ss:$100 sps:$4 sm:$0xff]   ;;  %v3309_v12 = vld [vmem:[%s4461_s0 + $0x1c] ss:$100 sps:$4 sm:$0xff]   ;;  %v3321_v23 = vld [vmem:[%s4461_s0 + $0xe4] ss:$100 sps:$4 sm:$0xff]  }
  0x1b   :  { %2874 = vmatpush3.bf16.msra.mxu0 %v3252_v25  ;;  %v3304_v8 = vld [vmem:[%s4461_s0 + $0x14] ss:$100 sps:$4 sm:$0xff]   ;;  %v3316_v19 = vld [vmem:[%s4461_s0 + $0xdc] ss:$100 sps:$4 sm:$0xff]   ;;  %v3323_v24 = vld [vmem:[%s4460_s1 + $0x228] sm:$0xff]  }
  0x1c   :  { %2875 = vmatprep.subr.bf16.mxu0 %v3255_v28  ;;  %v3310_v13 = vld [vmem:[%s4460_s1 + $0x238] sm:$0xff]   ;;  %v3313_v16 = vld [vmem:[%s4460_s1 + $0x270] sm:$0xff]   ;;  %v3324_v25 = vld [vmem:[%s4461_s0 + $0xe0] ss:$100 sps:$4 sm:$0xff]  }
  0x1d   :  { %2902 = vmatpush3.bf16.msra.mxu1 %v3254_v27  ;;  %v3311_v14 = vld [vmem:[%s4460_s1 + $0x2f8] sm:$0xff]   ;;  %v3314_v17 = vld [vmem:[%s4460_s1 + $0x230] sm:$0xff]   ;;  %v3325_v26 = vld [vmem:[%s4460_s1 + $0x2e8] sm:$0xff]  }
  0x1e   :  { %2903 = vmatprep.subr.bf16.mxu1 %v3257_v30  ;;  %v3312_v15 = vld [vmem:[%s4460_s1 + $0x2b8] sm:$0xff]   ;;  %v3315_v18 = vld [vmem:[%s4460_s1 + $0x2f0] sm:$0xff]   ;;  %v3326_v27 = vld [vmem:[%s4460_s1 + $0x2a8] sm:$0xff]  }
  0x1f   :  { %2876 = vmatpush3.bf16.msra.mxu0 %v3256_v29  ;;  %v3318_v20 = vld [vmem:[%s4460_s1 + $0x2b0] sm:$0xff]   ;;  %v3319_v21 = vld [vmem:[%s4461_s0 + $0xd8] ss:$100 sps:$4 sm:$0xff]   ;;  %v3327_v28 = vld [vmem:[%s4460_s1 + $0x260] sm:$0xff]  }
  0x20   :  { %2917 = vmatprep.subr.bf16.mxu0 %v3262_v34  ;;  %v3328_v29 = vld [vmem:[%s4460_s1 + $0x220] sm:$0xff]   ;;  %v3331_v32 = vld [vmem:[%s4460_s1 + $0x258] sm:$0xff]   ;;  %v3335_v36 = vld [vmem:[%s4460_s1 + $0x250] sm:$0xff]  }
  0x21   :  { %2904 = vmatpush3.bf16.msra.mxu1 %v3261_v33  ;;  %v3329_v30 = vld [vmem:[%s4460_s1 + $0x2e0] sm:$0xff]   ;;  %v3332_v33 = vld [vmem:[%s4460_s1 + $0x218] sm:$0xff]  }
  0x22   :  { %1959 = vmatmul.mubr.bf16.vlgmr.msra.gmra.mxu0 %v3258_v31  ;;  %2945 = vmatprep.subr.bf16.mxu1 %v3267_v38  ;;  %v3330_v31 = vld [vmem:[%s4460_s1 + $0x2a0] sm:$0xff]   ;;  %v3333_v34 = vld [vmem:[%s4460_s1 + $0x2d8] sm:$0xff]   ;;  %v3337_v38 = vld [vmem:[%s4460_s1 + $0x2d0] sm:$0xff]  }
  0x23   :  { %2918 = vmatpush3.bf16.msra.mxu0 %v3266_v37  ;;  %1966 = vmatprep.mubr.bf16.mxu0 %v3283_v54  ;;  %v3336_v37 = vld [vmem:[%s4460_s1 + $0x210] sm:$0xff]   ;;  %v3355_v54 = vld [vmem:[%s4460_s1 + $0x3f8] sm:$0xff]  }
  0x24   :  { %2008 = vmatmul.mubr.bf16.vlgmr.msra.gmra.mxu1 %v3263_v35  ;;  %2919 = vmatprep.subr.bf16.mxu0 %v3269_v40  ;;  %v3334_v35 = vld [vmem:[%s4460_s1 + $0x298] sm:$0xff]   ;;  %v3339_v40 = vld [vmem:[%s4460_s1 + $0x248] sm:$0xff]  }
  0x25   :  { %2946 = vmatpush3.bf16.msra.mxu1 %v3268_v39  ;;  %2015 = vmatprep.mubr.bf16.mxu1 %v3288_v58  ;;  %v3338_v39 = vld [vmem:[%s4460_s1 + $0x290] sm:$0xff]  }
  0x26   :  { %2947 = vmatprep.subr.bf16.mxu1 %v3271_v42  ;;  %v3341_v42 = vld [vmem:[%s4460_s1 + $0x2c8] sm:$0xff]   ;;  %v3359_v58 = vld [vmem:[%s4460_s1 + $0x3f0] sm:$0xff]  }
  0x27   :  { %2920 = vmatpush3.bf16.msra.mxu0 %v3270_v41  ;;  %v3340_v41 = vld [vmem:[%s4460_s1 + $0x208] sm:$0xff]  }
  0x28   :  { %2921 = vmatprep.subr.bf16.mxu0 %v3273_v44  ;;  %v3343_v44 = vld [vmem:[%s4460_s1 + $0x240] sm:$0xff]  }
  0x29   :  { %2948 = vmatpush3.bf16.msra.mxu1 %v3272_v43  ;;  %v3342_v43 = vld [vmem:[%s4460_s1 + $0x288] sm:$0xff]  }
  0x2a   :  { %2949 = vmatprep.subr.bf16.mxu1 %v3275_v46  ;;  %1967 = vmatmul.mubr.bf16.gmra.mxu0 %v3286_v56  ;;  %v3345_v46 = vld [vmem:[%s4460_s1 + $0x2c0] sm:$0xff]   ;;  %v3357_v56 = vld [vmem:[%s4460_s1 + $0x370] sm:$0xff]  }
  0x2b   :  { %2922 = vmatpush3.bf16.msra.mxu0 %v3274_v45  ;;  %2056 = vmatprep.mubr.bf16.mxu0 %v3304_v8  ;;  %v3344_v45 = vld [vmem:[%s4460_s1 + $0x200] sm:$0xff]   ;;  %v3375_v8 = vld [vmem:[%s4460_s1 + $0x358] sm:$0xff]  }
  0x2c   :  { %2923 = vmatprep.subr.bf16.mxu0 %v3277_v48  ;;  %2016 = vmatmul.mubr.bf16.gmra.mxu1 %v3291_v60  ;;  %v3348_v48 = vld [vmem:[%s4461_s0 + $0x24] ss:$100 sps:$4 sm:$0xff]   ;;  %v3362_v60 = vld [vmem:[%s4460_s1 + $0x3b0] sm:$0xff]  }
  0x2d   :  { %2950 = vmatpush3.bf16.msra.mxu1 %v3276_v47  ;;  %2105 = vmatprep.mubr.bf16.mxu1 %v3309_v12  ;;  %v3346_v47 = vld [vmem:[%s4461_s0 + $0x20] ss:$100 sps:$4 sm:$0xff]   ;;  %v3379_v12 = vld [vmem:[%s4460_s1 + $0x350] sm:$0xff]  }
  0x2e   :  { %2951 = vmatprep.subr.bf16.mxu1 %v3279_v50  ;;  %v3350_v50 = vld [vmem:[%s4460_s1 + $0x378] sm:$0xff]  }
  0x2f   :  { %2924 = vmatpush3.bf16.msra.mxu0 %v3278_v49  ;;  %v3349_v49 = vld [vmem:[%s4460_s1 + $0x280] sm:$0xff]  }
  0x30   :  { %2925 = vmatprep.subr.bf16.mxu0 %v3281_v52  ;;  %v3353_v52 = vld [vmem:[%s4461_s0 + $0x2c] ss:$100 sps:$4 sm:$0xff]  }
  0x31   :  { %2952 = vmatpush3.bf16.msra.mxu1 %v3280_v51  ;;  %v3351_v51 = vld [vmem:[%s4461_s0 + $0x28] ss:$100 sps:$4 sm:$0xff]  }
  0x32   :  { %2953 = vmatprep.subr.bf16.mxu1 %v3285_v55  ;;  %v3356_v55 = vld [vmem:[%s4460_s1 + $0x3b8] sm:$0xff]  }
  0x33   :  { %2926 = vmatpush3.bf16.msra.mxu0 %v3282_v53  ;;  %v3354_v53 = vld [vmem:[%s4460_s1 + $0x338] sm:$0xff]  }
  0x34   :  { %2927 = vmatprep.subr.bf16.mxu0 %v3290_v59  ;;  %v3360_v59 = vld [vmem:[%s4461_s0 + $0xec] ss:$100 sps:$4 sm:$0xff]  }
  0x35   :  { %2954 = vmatpush3.bf16.msra.mxu1 %v3287_v57  ;;  %v3358_v57 = vld [vmem:[%s4460_s1 + $0x330] sm:$0xff]  }
  0x36   :  { %2955 = vmatprep.subr.bf16.mxu1 %v3293_v62  ;;  %v3364_v62 = vld [vmem:[%s4460_s1 + $0x368] sm:$0xff]  }
  0x37   :  { %2928 = vmatpush3.bf16.msra.mxu0 %v3292_v61  ;;  %v3363_v61 = vld [vmem:[%s4461_s0 + $0xe8] ss:$100 sps:$4 sm:$0xff]  }
  0x38   :  { %2929 = vmatprep.subr.bf16.mxu0 %v3295_v0  ;;  %v3367_v0 = vld [vmem:[%s4460_s1 + $0x328] sm:$0xff]  }
  0x39   :  { %2956 = vmatpush3.bf16.msra.mxu1 %v3294_v63  ;;  %v3365_v63 = vld [vmem:[%s4461_s0 + $0xf4] ss:$100 sps:$4 sm:$0xff]  }
  0x3a   :  { %2957 = vmatprep.subr.bf16.mxu1 %v3297_v2  ;;  %v3369_v2 = vld [vmem:[%s4460_s1 + $0x3e8] sm:$0xff]  }
  0x3b   :  { %2930 = vmatpush3.bf16.msra.mxu0 %v3296_v1  ;;  %v3368_v1 = vld [vmem:[%s4461_s0 + $0xf0] ss:$100 sps:$4 sm:$0xff]  }
  0x3c   :  { %2931 = vmatprep.subr.bf16.mxu0 %v3299_v4  ;;  %v3371_v4 = vld [vmem:[%s4460_s1 + $0x360] sm:$0xff]  }
  0x3d   :  { %2958 = vmatpush3.bf16.msra.mxu1 %v3298_v3  ;;  %v3370_v3 = vld [vmem:[%s4460_s1 + $0x3a8] sm:$0xff]  }
  0x3e   :  { %2959 = vmatprep.subr.bf16.mxu1 %v3301_v6  ;;  %v3373_v6 = vld [vmem:[%s4460_s1 + $0x3e0] sm:$0xff]  }
  0x3f   :  { %2932 = vmatpush3.bf16.msra.mxu0 %v3300_v5  ;;  %v3372_v5 = vld [vmem:[%s4460_s1 + $0x320] sm:$0xff]  }
  0x40   :  { %2973 = vmatprep.subr.bf16.mxu0 %v3306_v10  ;;  %v3377_v10 = vld [vmem:[%s4460_s1 + $0x3d8] sm:$0xff]  }
  0x41   :  { %2960 = vmatpush3.bf16.msra.mxu1 %v3305_v9  ;;  %v3376_v9 = vld [vmem:[%s4460_s1 + $0x318] sm:$0xff]  }
  0x42   :  { %2057 = vmatmul.mubr.bf16.vlgmr.msra.gmra.mxu0 %v3302_v7  ;;  %3001 = vmatprep.subr.bf16.mxu1 %v3311_v14  ;;  %v3374_v7 = vld [vmem:[%s4460_s1 + $0x3a0] sm:$0xff]   ;;  %v3381_v14 = vld [vmem:[%s4460_s1 + $0x3d0] sm:$0xff]  }
  0x43   :  { %2974 = vmatpush3.bf16.msra.mxu0 %v3310_v13  ;;  %2064 = vmatprep.mubr.bf16.mxu0 %v3316_v19  ;;  %v3380_v13 = vld [vmem:[%s4460_s1 + $0x310] sm:$0xff]   ;;  %v3386_v19 = vld [vmem:[%s4460_s1 + $0x388] sm:$0xff]  }
  0x44   :  { %2106 = vmatmul.mubr.bf16.vlgmr.msra.gmra.mxu1 %v3307_v11  ;;  %2975 = vmatprep.subr.bf16.mxu0 %v3313_v16  ;;  %v3378_v11 = vld [vmem:[%s4460_s1 + $0x398] sm:$0xff]   ;;  %v3383_v16 = vld [vmem:[%s4460_s1 + $0x348] sm:$0xff]  }
  0x45   :  { %3002 = vmatpush3.bf16.msra.mxu1 %v3312_v15  ;;  %2113 = vmatprep.mubr.bf16.mxu1 %v3321_v23  ;;  %v3382_v15 = vld [vmem:[%s4460_s1 + $0x390] sm:$0xff]  }
  0x46   :  { %3003 = vmatprep.subr.bf16.mxu1 %v3315_v18  ;;  %v3385_v18 = vld [vmem:[%s4460_s1 + $0x3c8] sm:$0xff]   ;;  %v3390_v23 = vld [vmem:[%s4461_s0 + $0x30] ss:$100 sps:$4 sm:$0xff]  }
  0x47   :  { %2976 = vmatpush3.bf16.msra.mxu0 %v3314_v17  ;;  %v3384_v17 = vld [vmem:[%s4460_s1 + $0x308] sm:$0xff]  }
  0x48   :  { %2977 = vmatprep.subr.bf16.mxu0 %v3320_v22  ;;  %v3389_v22 = vld [vmem:[%s4460_s1 + $0x3c0] sm:$0xff]  }
  0x49   :  { %3004 = vmatpush3.bf16.msra.mxu1 %v3318_v20  ;;  %v3387_v20 = vld [vmem:[%s4460_s1 + $0x340] sm:$0xff]  }
  0x4a   :  { %2065 = vmatmul.mubr.bf16.gmra.mxu0 %v3319_v21  ;;  %3005 = vmatprep.subr.bf16.mxu1 %v3325_v26  ;;  %v3388_v21 = vld [vmem:[%s4460_s1 + $0x300] sm:$0xff]   ;;  %v3394_v26 = vld [vmem:[%s4460_s1 + $0x478] sm:$0xff]  }
  0x4b   :  { %2978 = vmatpush3.bf16.msra.mxu0 %v3323_v24  ;;  %2154 = vmatprep.mubr.bf16.mxu0 %v3348_v48  ;;  %v3392_v24 = vld [vmem:[%s4461_s0 + $0x34] ss:$100 sps:$4 sm:$0xff]  }
  0x4c   :  { %2114 = vmatmul.mubr.bf16.gmra.mxu1 %v3324_v25  ;;  %2979 = vmatprep.subr.bf16.mxu0 %v3327_v28  ;;  %v3393_v25 = vld [vmem:[%s4460_s1 + $0x380] sm:$0xff]   ;;  %v3419_v48 = vld [vmem:[%s4460_s1 + $0x458] sm:$0xff]  }
  0x4d   :  { %3006 = vmatpush3.bf16.msra.mxu1 %v3326_v27  ;;  %2203 = vmatprep.mubr.bf16.mxu1 %v3353_v52  ;;  %v3395_v27 = vld [vmem:[%s4461_s0 + $0x38] ss:$100 sps:$4 sm:$0xff]   ;;  %v3423_v52 = vld [vmem:[%s4460_s1 + $0x450] sm:$0xff]  }
  0x4e   :  { %3007 = vmatprep.subr.bf16.mxu1 %v3329_v30  ;;  %v3397_v28 = vld [vmem:[%s4461_s0 + $0x3c] ss:$100 sps:$4 sm:$0xff]  }
  0x4f   :  { %2980 = vmatpush3.bf16.msra.mxu0 %v3328_v29  ;;  %v3398_v29 = vld [vmem:[%s4460_s1 + $0x438] sm:$0xff]  }
  0x50   :  { %2981 = vmatprep.subr.bf16.mxu0 %v3331_v32  ;;  %v3399_v30 = vld [vmem:[%s4460_s1 + $0x4f8] sm:$0xff]   ;;  %v3401_v32 = vld [vmem:[%s4460_s1 + $0x470] sm:$0xff]  }
  0x51   :  { %3008 = vmatpush3.bf16.msra.mxu1 %v3330_v31  ;;  %v3400_v31 = vld [vmem:[%s4460_s1 + $0x4b8] sm:$0xff]  }
  0x52   :  { %3009 = vmatprep.subr.bf16.mxu1 %v3333_v34  ;;  %v3403_v34 = vld [vmem:[%s4460_s1 + $0x4f0] sm:$0xff]  }
  0x53   :  { %2982 = vmatpush3.bf16.msra.mxu0 %v3332_v33  ;;  %v3402_v33 = vld [vmem:[%s4460_s1 + $0x430] sm:$0xff]  }
  0x54   :  { %2983 = vmatprep.subr.bf16.mxu0 %v3335_v36  ;;  %v3406_v36 = vld [vmem:[%s4460_s1 + $0x4b0] sm:$0xff]  }
  0x55   :  { %3010 = vmatpush3.bf16.msra.mxu1 %v3334_v35  ;;  %v3404_v35 = vld [vmem:[%s4461_s0 + $0xfc] ss:$100 sps:$4 sm:$0xff]  }
  0x56   :  { %3011 = vmatprep.subr.bf16.mxu1 %v3337_v38  ;;  %v3408_v38 = vld [vmem:[%s4460_s1 + $0x468] sm:$0xff]  }
  0x57   :  { %2984 = vmatpush3.bf16.msra.mxu0 %v3336_v37  ;;  %v3407_v37 = vld [vmem:[%s4461_s0 + $0xf8] ss:$100 sps:$4 sm:$0xff]  }
  0x58   :  { %2985 = vmatprep.subr.bf16.mxu0 %v3339_v40  ;;  %v3411_v40 = vld [vmem:[%s4460_s1 + $0x428] sm:$0xff]  }
  0x59   :  { %3012 = vmatpush3.bf16.msra.mxu1 %v3338_v39  ;;  %v3409_v39 = vld [vmem:[%s4461_s0 + $0x104] ss:$100 sps:$4 sm:$0xff]  }
  0x5a   :  { %3013 = vmatprep.subr.bf16.mxu1 %v3341_v42  ;;  %v3413_v42 = vld [vmem:[%s4460_s1 + $0x4e8] sm:$0xff]  }
  0x5b   :  { %2986 = vmatpush3.bf16.msra.mxu0 %v3340_v41  ;;  %v3412_v41 = vld [vmem:[%s4461_s0 + $0x100] ss:$100 sps:$4 sm:$0xff]  }
  0x5c   :  { %2987 = vmatprep.subr.bf16.mxu0 %v3343_v44  ;;  %v3415_v44 = vld [vmem:[%s4460_s1 + $0x460] sm:$0xff]  }
  0x5d   :  { %3014 = vmatpush3.bf16.msra.mxu1 %v3342_v43  ;;  %v3414_v43 = vld [vmem:[%s4460_s1 + $0x4a8] sm:$0xff]  }
  0x5e   :  { %3015 = vmatprep.subr.bf16.mxu1 %v3345_v46  ;;  %v3417_v46 = vld [vmem:[%s4460_s1 + $0x4e0] sm:$0xff]  }
  0x5f   :  { %2988 = vmatpush3.bf16.msra.mxu0 %v3344_v45  ;;  %v3416_v45 = vld [vmem:[%s4460_s1 + $0x420] sm:$0xff]  }
  0x60   :  { %3029 = vmatprep.subr.bf16.mxu0 %v3350_v50  ;;  %v3421_v50 = vld [vmem:[%s4460_s1 + $0x4d8] sm:$0xff]  }
  0x61   :  { %3016 = vmatpush3.bf16.msra.mxu1 %v3349_v49  ;;  %v3420_v49 = vld [vmem:[%s4460_s1 + $0x418] sm:$0xff]  }
  0x62   :  { %2155 = vmatmul.mubr.bf16.vlgmr.msra.gmra.mxu0 %v3346_v47  ;;  %3057 = vmatprep.subr.bf16.mxu1 %v3355_v54  ;;  %v3418_v47 = vld [vmem:[%s4460_s1 + $0x4a0] sm:$0xff]   ;;  %v3425_v54 = vld [vmem:[%s4460_s1 + $0x4d0] sm:$0xff]  }
  0x63   :  { %3030 = vmatpush3.bf16.msra.mxu0 %v3354_v53  ;;  %2162 = vmatprep.mubr.bf16.mxu0 %v3360_v59  ;;  %v3424_v53 = vld [vmem:[%s4460_s1 + $0x410] sm:$0xff]   ;;  %v3430_v59 = vld [vmem:[%s4460_s1 + $0x488] sm:$0xff]  }
  0x64   :  { %2204 = vmatmul.mubr.bf16.vlgmr.msra.gmra.mxu1 %v3351_v51  ;;  %3031 = vmatprep.subr.bf16.mxu0 %v3357_v56  ;;  %v3422_v51 = vld [vmem:[%s4460_s1 + $0x498] sm:$0xff]   ;;  %v3427_v56 = vld [vmem:[%s4460_s1 + $0x448] sm:$0xff]  }
  0x65   :  { %3058 = vmatpush3.bf16.msra.mxu1 %v3356_v55  ;;  %2211 = vmatprep.mubr.bf16.mxu1 %v3365_v63  ;;  %v3426_v55 = vld [vmem:[%s4460_s1 + $0x490] sm:$0xff]   ;;  %v3434_v63 = vld [vmem:[%s4461_s0 + $0x40] ss:$100 sps:$4 sm:$0xff]  }
  0x66   :  { %3059 = vmatprep.subr.bf16.mxu1 %v3359_v58  ;;  %v3429_v58 = vld [vmem:[%s4460_s1 + $0x4c8] sm:$0xff]  }
  0x67   :  { %3032 = vmatpush3.bf16.msra.mxu0 %v3358_v57  ;;  %v3428_v57 = vld [vmem:[%s4460_s1 + $0x408] sm:$0xff]  }
  0x68   :  { %3033 = vmatprep.subr.bf16.mxu0 %v3364_v62  ;;  %v3433_v62 = vld [vmem:[%s4460_s1 + $0x4c0] sm:$0xff]  }
  0x69   :  { %3060 = vmatpush3.bf16.msra.mxu1 %v3362_v60  ;;  %v3431_v60 = vld [vmem:[%s4460_s1 + $0x440] sm:$0xff]  }
  0x6a   :  { %2163 = vmatmul.mubr.bf16.gmra.mxu0 %v3363_v61  ;;  %3061 = vmatprep.subr.bf16.mxu1 %v3369_v2  ;;  %v3432_v61 = vld [vmem:[%s4460_s1 + $0x400] sm:$0xff]   ;;  %v3438_v2 = vld [vmem:[%s4460_s1 + $0x578] sm:$0xff]  }
  0x6b   :  { %3034 = vmatpush3.bf16.msra.mxu0 %v3367_v0  ;;  %2252 = vmatprep.mubr.bf16.mxu0 %v3392_v24  ;;  %v3436_v0 = vld [vmem:[%s4461_s0 + $0x44] ss:$100 sps:$4 sm:$0xff]   ;;  %v3463_v24 = vld [vmem:[%s4460_s1 + $0x558] sm:$0xff]  }
  0x6c   :  { %2212 = vmatmul.mubr.bf16.gmra.mxu1 %v3368_v1  ;;  %3035 = vmatprep.subr.bf16.mxu0 %v3371_v4  ;;  %v3437_v1 = vld [vmem:[%s4460_s1 + $0x480] sm:$0xff]   ;;  %v3441_v4 = vld [vmem:[%s4461_s0 + $0x4c] ss:$100 sps:$4 sm:$0xff]  }
  0x6d   :  { %3062 = vmatpush3.bf16.msra.mxu1 %v3370_v3  ;;  %2301 = vmatprep.mubr.bf16.mxu1 %v3397_v28  ;;  %v3439_v3 = vld [vmem:[%s4461_s0 + $0x48] ss:$100 sps:$4 sm:$0xff]   ;;  %v3467_v28 = vld [vmem:[%s4460_s1 + $0x550] sm:$0xff]  }
  0x6e   :  { %3063 = vmatprep.subr.bf16.mxu1 %v3373_v6  ;;  %v3443_v6 = vld [vmem:[%s4460_s1 + $0x5f8] sm:$0xff]  }
  0x6f   :  { %3036 = vmatpush3.bf16.msra.mxu0 %v3372_v5  ;;  %v3442_v5 = vld [vmem:[%s4460_s1 + $0x538] sm:$0xff]  }
  0x70   :  { %3037 = vmatprep.subr.bf16.mxu0 %v3375_v8  ;;  %v3445_v8 = vld [vmem:[%s4460_s1 + $0x570] sm:$0xff]  }
  0x71   :  { %3064 = vmatpush3.bf16.msra.mxu1 %v3374_v7  ;;  %v3444_v7 = vld [vmem:[%s4460_s1 + $0x5b8] sm:$0xff]  }
  0x72   :  { %3065 = vmatprep.subr.bf16.mxu1 %v3377_v10  ;;  %v3447_v10 = vld [vmem:[%s4460_s1 + $0x5f0] sm:$0xff]  }
  0x73   :  { %3038 = vmatpush3.bf16.msra.mxu0 %v3376_v9  ;;  %v3446_v9 = vld [vmem:[%s4460_s1 + $0x530] sm:$0xff]  }
  0x74   :  { %3039 = vmatprep.subr.bf16.mxu0 %v3379_v12  ;;  %v3450_v12 = vld [vmem:[%s4460_s1 + $0x5b0] sm:$0xff]  }
  0x75   :  { %3066 = vmatpush3.bf16.msra.mxu1 %v3378_v11  ;;  %v3448_v11 = vld [vmem:[%s4461_s0 + $0x10c] ss:$100 sps:$4 sm:$0xff]  }
  0x76   :  { %3067 = vmatprep.subr.bf16.mxu1 %v3381_v14  ;;  %v3452_v14 = vld [vmem:[%s4460_s1 + $0x568] sm:$0xff]  }
  0x77   :  { %3040 = vmatpush3.bf16.msra.mxu0 %v3380_v13  ;;  %v3451_v13 = vld [vmem:[%s4461_s0 + $0x108] ss:$100 sps:$4 sm:$0xff]  }
  0x78   :  { %3041 = vmatprep.subr.bf16.mxu0 %v3383_v16  ;;  %v3455_v16 = vld [vmem:[%s4460_s1 + $0x528] sm:$0xff]  }
  0x79   :  { %3068 = vmatpush3.bf16.msra.mxu1 %v3382_v15  ;;  %v3453_v15 = vld [vmem:[%s4461_s0 + $0x114] ss:$100 sps:$4 sm:$0xff]  }
  0x7a   :  { %3069 = vmatprep.subr.bf16.mxu1 %v3385_v18  ;;  %v3457_v18 = vld [vmem:[%s4460_s1 + $0x5e8] sm:$0xff]  }
  0x7b   :  { %3042 = vmatpush3.bf16.msra.mxu0 %v3384_v17  ;;  %v3456_v17 = vld [vmem:[%s4461_s0 + $0x110] ss:$100 sps:$4 sm:$0xff]  }
  0x7c   :  { %3043 = vmatprep.subr.bf16.mxu0 %v3387_v20  ;;  %v3459_v20 = vld [vmem:[%s4460_s1 + $0x560] sm:$0xff]  }
  0x7d   :  { %3070 = vmatpush3.bf16.msra.mxu1 %v3386_v19  ;;  %v3458_v19 = vld [vmem:[%s4460_s1 + $0x5a8] sm:$0xff]  }
  0x7e   :  { %3071 = vmatprep.subr.bf16.mxu1 %v3389_v22  ;;  %v3461_v22 = vld [vmem:[%s4460_s1 + $0x5e0] sm:$0xff]  }
  0x7f   :  { %3044 = vmatpush3.bf16.msra.mxu0 %v3388_v21  ;;  %v3460_v21 = vld [vmem:[%s4460_s1 + $0x520] sm:$0xff]  }
  0x80   :  { %3085 = vmatprep.subr.bf16.mxu0 %v3394_v26  ;;  %v3465_v26 = vld [vmem:[%s4460_s1 + $0x5d8] sm:$0xff]  }
  0x81   :  { %3072 = vmatpush3.bf16.msra.mxu1 %v3393_v25  ;;  %v3464_v25 = vld [vmem:[%s4460_s1 + $0x518] sm:$0xff]  }
  0x82   :  { %2253 = vmatmul.mubr.bf16.vlgmr.msra.gmra.mxu0 %v3390_v23  ;;  %3113 = vmatprep.subr.bf16.mxu1 %v3399_v30  ;;  %v3462_v23 = vld [vmem:[%s4460_s1 + $0x5a0] sm:$0xff]   ;;  %v3469_v30 = vld [vmem:[%s4460_s1 + $0x5d0] sm:$0xff]  }
  0x83   :  { %3086 = vmatpush3.bf16.msra.mxu0 %v3398_v29  ;;  %2260 = vmatprep.mubr.bf16.mxu0 %v3404_v35  ;;  %v3468_v29 = vld [vmem:[%s4460_s1 + $0x510] sm:$0xff]   ;;  %v3474_v35 = vld [vmem:[%s4460_s1 + $0x588] sm:$0xff]  }
  0x84   :  { %2302 = vmatmul.mubr.bf16.vlgmr.msra.gmra.mxu1 %v3395_v27  ;;  %3087 = vmatprep.subr.bf16.mxu0 %v3401_v32  ;;  %v3466_v27 = vld [vmem:[%s4460_s1 + $0x598] sm:$0xff]   ;;  %v3471_v32 = vld [vmem:[%s4460_s1 + $0x548] sm:$0xff]  }
  0x85   :  { %3114 = vmatpush3.bf16.msra.mxu1 %v3400_v31  ;;  %2309 = vmatprep.mubr.bf16.mxu1 %v3409_v39  ;;  %v3470_v31 = vld [vmem:[%s4460_s1 + $0x590] sm:$0xff]  }
  0x86   :  { %3115 = vmatprep.subr.bf16.mxu1 %v3403_v34  ;;  %v3473_v34 = vld [vmem:[%s4460_s1 + $0x5c8] sm:$0xff]   ;;  %v3478_v39 = vld [vmem:[%s4461_s0 + $0x50] ss:$100 sps:$4 sm:$0xff]  }
  0x87   :  { %3088 = vmatpush3.bf16.msra.mxu0 %v3402_v33  ;;  %v3472_v33 = vld [vmem:[%s4460_s1 + $0x508] sm:$0xff]  }
  0x88   :  { %3089 = vmatprep.subr.bf16.mxu0 %v3408_v38  ;;  %v3477_v38 = vld [vmem:[%s4460_s1 + $0x5c0] sm:$0xff]  }
  0x89   :  { %3116 = vmatpush3.bf16.msra.mxu1 %v3406_v36  ;;  %v3475_v36 = vld [vmem:[%s4460_s1 + $0x540] sm:$0xff]  }
  0x8a   :  { %2261 = vmatmul.mubr.bf16.gmra.mxu0 %v3407_v37  ;;  %3117 = vmatprep.subr.bf16.mxu1 %v3413_v42  ;;  %v3476_v37 = vld [vmem:[%s4460_s1 + $0x500] sm:$0xff]   ;;  %v3482_v42 = vld [vmem:[%s4460_s1 + $0x638] sm:$0xff]  }
  0x8b   :  { %3090 = vmatpush3.bf16.msra.mxu0 %v3411_v40  ;;  %2350 = vmatprep.mubr.bf16.mxu0 %v3436_v0  ;;  %v3480_v40 = vld [vmem:[%s4461_s0 + $0x54] ss:$100 sps:$4 sm:$0xff]  }
  0x8c   :  { %2310 = vmatmul.mubr.bf16.gmra.mxu1 %v3412_v41  ;;  %3091 = vmatprep.subr.bf16.mxu0 %v3415_v44  ;;  %v3481_v41 = vld [vmem:[%s4460_s1 + $0x580] sm:$0xff]  }
  0x8d   :  { %3118 = vmatpush3.bf16.msra.mxu1 %v3414_v43  ;;  %2399 = vmatprep.mubr.bf16.mxu1 %v3441_v4  ;;  %v3483_v43 = vld [vmem:[%s4461_s0 + $0x58] ss:$100 sps:$4 sm:$0xff]  }
  0x8e   :  { %3119 = vmatprep.subr.bf16.mxu1 %v3417_v46  ;;  %v3485_v44 = vld [vmem:[%s4461_s0 + $0x5c] ss:$100 sps:$4 sm:$0xff]  }
  0x8f   :  { %3092 = vmatpush3.bf16.msra.mxu0 %v3416_v45  ;;  %v3486_v45 = vld [vmem:[%s4460_s1 + $0x630] sm:$0xff]   ;;  %v3487_v46 = vld [vmem:[%s4461_s0 + $0x11c] ss:$100 sps:$4 sm:$0xff]  }
  0x90   :  { %3093 = vmatprep.subr.bf16.mxu0 %v3419_v48  ;;  %v3490_v48 = vld [vmem:[%s4460_s1 + $0x628] sm:$0xff]  }
  0x91   :  { %3120 = vmatpush3.bf16.msra.mxu1 %v3418_v47  ;;  %v3489_v47 = vld [vmem:[%s4461_s0 + $0x118] ss:$100 sps:$4 sm:$0xff]  }
  0x92   :  { %3121 = vmatprep.subr.bf16.mxu1 %v3421_v50 }
  0x93   :  { %3094 = vmatpush3.bf16.msra.mxu0 %v3420_v49  ;;  %v3491_v49 = vld [vmem:[%s4461_s0 + $0x124] ss:$100 sps:$4 sm:$0xff]  }
  0x94   :  { %3095 = vmatprep.subr.bf16.mxu0 %v3423_v52  ;;  %v3493_v52 = vld [vmem:[%s4461_s0 + $0x120] ss:$100 sps:$4 sm:$0xff]  }
  0x95   :  { %3122 = vmatpush3.bf16.msra.mxu1 %v3422_v51  ;;  %v3494_v51 = vld [vmem:[%s4460_s1 + $0x620] sm:$0xff]  }
  0x96   :  { %3123 = vmatprep.subr.bf16.mxu1 %v3425_v54 }
  0x97   :  { %3096 = vmatpush3.bf16.msra.mxu0 %v3424_v53 }
  0x98   :  { %3097 = vmatprep.subr.bf16.mxu0 %v3427_v56  ;;  %v3495_v56 = vld [vmem:[%s4460_s1 + $0x618] sm:$0xff]  }
  0x99   :  { %3124 = vmatpush3.bf16.msra.mxu1 %v3426_v55 }
  0x9a   :  { %3125 = vmatprep.subr.bf16.mxu1 %v3429_v58  ;;  %v3499_v58 = vld [vmem:[%s4461_s0 + $0x60] ss:$100 sps:$4 sm:$0xff]  }
  0x9b   :  { %3098 = vmatpush3.bf16.msra.mxu0 %v3428_v57 }
  0x9c   :  { %3099 = vmatprep.subr.bf16.mxu0 %v3431_v60 }
  0x9d   :  { %3126 = vmatpush3.bf16.msra.mxu1 %v3430_v59 }
  0x9e   :  { %3127 = vmatprep.subr.bf16.mxu1 %v3433_v62  ;;  %v4262_v62 = vld [vmem:[%s4462_s2] ss:$0 sm:$0xff] }
  0x9f   :  { %3100 = vmatpush3.bf16.msra.mxu0 %v3432_v61 }
  0xa0   :  { %3141 = vmatprep.subr.bf16.mxu0 %v3438_v2  ;;  %v3496_v2 = vld [vmem:[%s4460_s1 + $0x610] sm:$0xff]  }
  0xa1   :  { %3128 = vmatpush3.bf16.msra.mxu1 %v3437_v1 }
  0xa2   :  { %2351 = vmatmul.mubr.bf16.vlgmr.msra.gmra.mxu0 %v3434_v63  ;;  %3169 = vmatprep.subr.bf16.mxu1 %v3443_v6 }
  0xa3   :  { %3142 = vmatpush3.bf16.msra.mxu0 %v3442_v5  ;;  %2358 = vmatprep.mubr.bf16.mxu0 %v3448_v11  ;;  %v3500_v11 = vld [vmem:[%s4461_s0 + $0x128] ss:$100 sps:$4 sm:$0xff]  }
  0xa4   :  { %2400 = vmatmul.mubr.bf16.vlgmr.msra.gmra.mxu1 %v3439_v3  ;;  %3143 = vmatprep.subr.bf16.mxu0 %v3445_v8  ;;  %v3497_v8 = vld [vmem:[%s4460_s1 + $0x608] sm:$0xff]  }
  0xa5   :  { %3170 = vmatpush3.bf16.msra.mxu1 %v3444_v7  ;;  %2407 = vmatprep.mubr.bf16.mxu1 %v3453_v15 }
  0xa6   :  { %3171 = vmatprep.subr.bf16.mxu1 %v3447_v10 }
  0xa7   :  { %3144 = vmatpush3.bf16.msra.mxu0 %v3446_v9  ;;  %v3498_v9 = vld [vmem:[%s4460_s1 + $0x600] sm:$0xff]  }
  0xa8   :  { %3145 = vmatprep.subr.bf16.mxu0 %v3452_v14 }
  0xa9   :  { %3172 = vmatpush3.bf16.msra.mxu1 %v3450_v12 }
  0xaa   :  { %2359 = vmatmul.mubr.bf16.gmra.mxu0 %v3451_v13  ;;  %3173 = vmatprep.subr.bf16.mxu1 %v3457_v18 }
  0xab   :  { %3146 = vmatpush3.bf16.msra.mxu0 %v3455_v16  ;;  %2448 = vmatprep.mubr.bf16.mxu0 %v3480_v40 }
  0xac   :  { %2408 = vmatmul.mubr.bf16.gmra.mxu1 %v3456_v17  ;;  %3147 = vmatprep.subr.bf16.mxu0 %v3459_v20 }
  0xad   :  { %3174 = vmatpush3.bf16.msra.mxu1 %v3458_v19  ;;  %2497 = vmatprep.mubr.bf16.mxu1 %v3485_v44 }
  0xae   :  { %3175 = vmatprep.subr.bf16.mxu1 %v3461_v22 }
  0xaf   :  { %3148 = vmatpush3.bf16.msra.mxu0 %v3460_v21 }
  0xb0   :  { %3149 = vmatprep.subr.bf16.mxu0 %v3463_v24 }
  0xb1   :  { %3176 = vmatpush3.bf16.msra.mxu1 %v3462_v23 }
  0xb2   :  { %3177 = vmatprep.subr.bf16.mxu1 %v3465_v26 }
  0xb3   :  { %3150 = vmatpush3.bf16.msra.mxu0 %v3464_v25 }
  0xb4   :  { %3151 = vmatprep.subr.bf16.mxu0 %v3467_v28 }
  0xb5   :  { %3178 = vmatpush3.bf16.msra.mxu1 %v3466_v27 }
  0xb6   :  { %3179 = vmatprep.subr.bf16.mxu1 %v3469_v30 }
  0xb7   :  { %3152 = vmatpush3.bf16.msra.mxu0 %v3468_v29 }
  0xb8   :  { %3153 = vmatprep.subr.bf16.mxu0 %v3471_v32 }
  0xb9   :  { %3180 = vmatpush3.bf16.msra.mxu1 %v3470_v31 }
  0xba   :  { %3181 = vmatprep.subr.bf16.mxu1 %v3473_v34 }
  0xbb   :  { %3154 = vmatpush3.bf16.msra.mxu0 %v3472_v33 }
  0xbc   :  { %3155 = vmatprep.subr.bf16.mxu0 %v3475_v36 }
  0xbd   :  { %3182 = vmatpush3.bf16.msra.mxu1 %v3474_v35 }
  0xbe   :  { %3183 = vmatprep.subr.bf16.mxu1 %v3477_v38 }
  0xbf   :  { %3156 = vmatpush3.bf16.msra.mxu0 %v3476_v37 }
  0xc0   :  { %3207 = vmatprep.subr.bf16.mxu0 %v3482_v42 }
  0xc1   :  { %3184 = vmatpush3.bf16.msra.mxu1 %v3481_v41 }
  0xc2   :  { %2449 = vmatmul.mubr.bf16.vlgmr.msra.gmra.mxu0 %v3478_v39 }
  0xc3   :  { %3208 = vmatpush3.bf16.msra.mxu0 %v3482_v42  ;;  %2456 = vmatprep.mubr.bf16.mxu0 %v3487_v46 }
  0xc4   :  { %2498 = vmatmul.mubr.bf16.vlgmr.msra.gmra.mxu1 %v3483_v43  ;;  %3209 = vmatprep.subr.bf16.mxu0 %v3486_v45 }
  0xc5   :  { %2505 = vmatprep.mubr.bf16.mxu1 %v3491_v49 }
  0xc7   :  { %3210 = vmatpush3.bf16.msra.mxu0 %v3486_v45 }
  0xc8   :  { %3211 = vmatprep.subr.bf16.mxu0 %v3490_v48 }
  0xca   :  { %2457 = vmatmul.mubr.bf16.gmra.mxu0 %v3489_v47 }
  0xcb   :  { %3212 = vmatpush3.bf16.msra.mxu0 %v3490_v48  ;;  %3223 = vmatprep.mubr.bf16.mxu0 %v3499_v58 }
  0xcc   :  { %3213 = vmatprep.subr.bf16.mxu0 %v3494_v51  ;;  %2506 = vmatmul.mubr.bf16.gmra.mxu1 %v3493_v52 }
  0xcf   :  { %3214 = vmatpush3.bf16.msra.mxu0 %v3494_v51 }
  0xd0   :  { %3215 = vmatprep.subr.bf16.mxu0 %v3495_v56 }
  0xd3   :  { %3216 = vmatpush3.bf16.msra.mxu0 %v3495_v56 }
  0xd4   :  { %3217 = vmatprep.subr.bf16.mxu0 %v3496_v2 }
  0xd7   :  { %3218 = vmatpush3.bf16.msra.mxu0 %v3496_v2 }
  0xd8   :  { %3219 = vmatprep.subr.bf16.mxu0 %v3497_v8 }
  0xdb   :  { %3220 = vmatpush3.bf16.msra.mxu0 %v3497_v8 }
  0xdc   :  { %3221 = vmatprep.subr.bf16.mxu0 %v3498_v9 }
  0xdf   :  { %3222 = vmatpush3.bf16.msra.mxu0 %v3498_v9 }
  0xe2   :  { %v2877_v50 = vpop.f32.mrf.mxu0  ;;  %3224 = vmatmul.mubr.bf16.vlgmr.msra.gmra.mxu0 %v3500_v11 }
  0xe4   :  { %v2878_v53 = vpop.f32.mrf.mxu0  ;;  %v2905_v55 = vpop.f32.mrf.mxu1 }
  0xe5   :  { %v2879_v54 = vadd.f32 %v2878_v53, %v2877_v50 }
  0xe6   :  { %v2880_v57 = vpop.f32.mrf.mxu0  ;;  %v2906_v59 = vpop.f32.mrf.mxu1 }
  0xe7   :  { %v2907_v60 = vadd.f32 %v2906_v59, %v2905_v55  ;;  %v1961_v1 = vadd.f32 %v2879_v54, %v4262_v62 }
  0xe8   :  { %v2881_v61 = vpop.f32.mrf.mxu0  ;;  %v2908_v0 = vpop.f32.mrf.mxu1 }
  0xe9   :  { %v2882_v63 = vadd.f32 %v2881_v61, %v2880_v57  ;;  %v2010_v5 = vadd.f32 %v2907_v60, %v1961_v1 }
  0xea   :  { %v2909_v4 = vpop.f32.mrf.mxu1  ;;  %v2883_v10 = vpop.f32.mrf.mxu0 }
  0xeb   :  { %v1964_v3 = vadd.f32 %v2882_v63, %v4262_v62  ;;  %v2910_v6 = vadd.f32 %v2909_v4, %v2908_v0 }
  0xec   :  { %v2884_v12 = vpop.f32.mrf.mxu0  ;;  %v2911_v14 = vpop.f32.mrf.mxu1 }
  0xed   :  { %v4269_v7 = vadd.f32 %v2910_v6, %v1964_v3  ;;  %v2885_v13 = vadd.f32 %v2884_v12, %v2883_v10 }
  0xee   :  { %v2912_v16 = vpop.f32.mrf.mxu1  ;;  %v4283_v19 = vpop.f32.mrf.mxu0 }
  0xef   :  { %v1969_v15 = vadd.f32 %v2885_v13, %v4262_v62  ;;  %v2913_v17 = vadd.f32 %v2912_v16, %v2911_v14 }
  0xf0   :  { %v4285_v20 = vpop.f32.mrf.mxu1  ;;  %v4287_v21 = vpop.f32.mrf.mxu0 }
  0xf1   :  { %v4281_v18 = vadd.f32 %v2913_v17, %v1969_v15 }
  0xf2   :  { %v4289_v23 = vpop.f32.mrf.mxu1 }
 0x102   :  { %v2933_v22 = vpop.f32.mrf.mxu0 }
 0x104   :  { %v2934_v24 = vpop.f32.mrf.mxu0  ;;  %v2961_v26 = vpop.f32.mrf.mxu1 }
 0x105   :  { %v2935_v25 = vadd.f32 %v2934_v24, %v2933_v22 }
 0x106   :  { %v2962_v28 = vpop.f32.mrf.mxu1  ;;  %v4293_v31 = vpop.f32.mrf.mxu0 }
 0x107   :  { %v2059_v27 = vadd.f32 %v2935_v25, %v2010_v5  ;;  %v2963_v29 = vadd.f32 %v2962_v28, %v2961_v26 }
 0x108   :  { %v4295_v32 = vpop.f32.mrf.mxu0  ;;  %v4297_v33 = vpop.f32.mrf.mxu1 }
 0x109   :  { %v4291_v30 = vadd.f32 %v2963_v29, %v2059_v27 }
 0x10a   :  { %v2939_v34 = vpop.f32.mrf.mxu0  ;;  %v4299_v35 = vpop.f32.mrf.mxu1 }
 0x10c   :  { %v2940_v36 = vpop.f32.mrf.mxu0  ;;  %v4301_v37 = vpop.f32.mrf.mxu1 }
 0x10e   :  { %v2942_v38 = vpop.f32.mrf.mxu0  ;;  %v4303_v39 = vpop.f32.mrf.mxu1 }
 0x110   :  { %v2943_v40 = vpop.f32.mrf.mxu0  ;;  %v4305_v41 = vpop.f32.mrf.mxu1 }
 0x112   :  { %v4309_v43 = vpop.f32.mrf.mxu1 }
 0x122   :  { %v4307_v42 = vpop.f32.mrf.mxu0 }
 0x124   :  { %v4311_v44 = vpop.f32.mrf.mxu0  ;;  %v4313_v45 = vpop.f32.mrf.mxu1 }
 0x126   :  { %v4315_v46 = vpop.f32.mrf.mxu0  ;;  %v4317_v47 = vpop.f32.mrf.mxu1 }
 0x128   :  { %v4319_v48 = vpop.f32.mrf.mxu0  ;;  %v4321_v49 = vpop.f32.mrf.mxu1 }
 0x12a   :  { %v2995_v50 = vpop.f32.mrf.mxu0  ;;  %v4323_v51 = vpop.f32.mrf.mxu1 }
 0x12c   :  { %v2996_v52 = vpop.f32.mrf.mxu0  ;;  %v4325_v53 = vpop.f32.mrf.mxu1 }
 0x12e   :  { %v2998_v54 = vpop.f32.mrf.mxu0  ;;  %v4327_v55 = vpop.f32.mrf.mxu1 }
 0x130   :  { %v2999_v56 = vpop.f32.mrf.mxu0  ;;  %v4329_v57 = vpop.f32.mrf.mxu1 }
 0x132   :  { %v4333_v59 = vpop.f32.mrf.mxu1 }
 0x142   :  { %v4331_v58 = vpop.f32.mrf.mxu0 }
 0x144   :  { %v4335_v60 = vpop.f32.mrf.mxu0  ;;  %v4337_v61 = vpop.f32.mrf.mxu1 }
 0x146   :  { %v4339_v63 = vpop.f32.mrf.mxu0  ;;  %v4341_v0 = vpop.f32.mrf.mxu1 }
 0x148   :  { %v4343_v1 = vpop.f32.mrf.mxu0  ;;  %v4345_v2 = vpop.f32.mrf.mxu1 }
 0x14a   :  { %v3051_v3 = vpop.f32.mrf.mxu0  ;;  %v4347_v4 = vpop.f32.mrf.mxu1 }
 0x14b   :  { %4464 = vst [vmem:[#allocation2_spill] sm:$0xff] %v4347_v4 }
 0x14c   :  { %v3052_v5 = vpop.f32.mrf.mxu0  ;;  %v4349_v6 = vpop.f32.mrf.mxu1 }
 0x14e   :  { %v3054_v8 = vpop.f32.mrf.mxu0  ;;  %v4351_v9 = vpop.f32.mrf.mxu1 }
 0x150   :  { %v3055_v10 = vpop.f32.mrf.mxu0  ;;  %v4353_v11 = vpop.f32.mrf.mxu1 }
 0x152   :  { %v4357_v13 = vpop.f32.mrf.mxu1 }
 0x162   :  { %v4355_v12 = vpop.f32.mrf.mxu0 }
 0x163   :  { %4465 = vst [vmem:[#allocation3_spill] sm:$0xff] %v4355_v12 }
 0x164   :  { %v4359_v14 = vpop.f32.mrf.mxu0  ;;  %v4361_v15 = vpop.f32.mrf.mxu1 }
 0x165   :  { %4466 = vst [vmem:[#allocation4_spill] sm:$0xff] %v4359_v14  ;;  %4467 = vst [vmem:[#allocation5_spill] sm:$0xff] %v4361_v15  ;;  %v2888_v15 = vadd.f32 %v4287_v21, %v4283_v19  ;;  %v2938_v19 = vadd.f32 %v4295_v32, %v4293_v31  ;;  %v2966_v31 = vadd.f32 %v4299_v35, %v4297_v33 }
 0x166   :  { %v4363_v16 = vpop.f32.mrf.mxu0  ;;  %v4365_v17 = vpop.f32.mrf.mxu1  ;;  %v2991_v32 = vadd.f32 %v4311_v44, %v4307_v42  ;;  %v3019_v33 = vadd.f32 %v4317_v47, %v4313_v45  ;;  %v3050_v45 = vadd.f32 %v4343_v1, %v4339_v63  ;;  %v4478_v63 = vld [vmem:[#allocation2_spill] sm:$0xff] }
 0x167   :  { %4468 = vst [vmem:[#allocation6_spill] sm:$0xff] %v4363_v16  ;;  %4469 = vst [vmem:[#allocation7_spill] sm:$0xff] %v4365_v17  ;;  %v3078_v1 = vadd.f32 %v4478_v63, %v4345_v2 }
 0x168   :  { %v4367_v22 = vpop.f32.mrf.mxu0  ;;  %v4369_v24 = vpop.f32.mrf.mxu1 }
 0x169   :  { %4470 = vst [vmem:[#allocation8_spill] sm:$0xff] %v4367_v22  ;;  %4471 = vst [vmem:[#allocation9_spill] sm:$0xff] %v4369_v24  ;;  %v1972_v24 = vadd.f32 %v2888_v15, %v4262_v62  ;;  %v2941_v22 = vadd.f32 %v2940_v36, %v2939_v34  ;;  %v2969_v62 = vadd.f32 %v4303_v39, %v4301_v37 }
 0x16a   :  { %v3107_v25 = vpop.f32.mrf.mxu0  ;;  %v4371_v26 = vpop.f32.mrf.mxu1  ;;  %v2972_v34 = vadd.f32 %v4309_v43, %v4305_v41  ;;  %v2997_v36 = vadd.f32 %v2996_v52, %v2995_v50  ;;  %v3000_v37 = vadd.f32 %v2999_v56, %v2998_v54  ;;  %v2994_v39 = vadd.f32 %v4319_v48, %v4315_v46 }
 0x16b   :  { %4472 = vst [vmem:[#allocation10_spill] sm:$0xff] %v4371_v26  ;;  %v2916_v26 = vadd.f32 %v4289_v23, %v4285_v20  ;;  %v3025_v41 = vadd.f32 %v4327_v55, %v4325_v53  ;;  %v2157_v43 = vadd.f32 %v2991_v32, %v4291_v30  ;;  %v3028_v50 = vadd.f32 %v4333_v59, %v4329_v57 }
 0x16c   :  { %v3108_v27 = vpop.f32.mrf.mxu0  ;;  %v4373_v28 = vpop.f32.mrf.mxu1  ;;  %v3053_v52 = vadd.f32 %v3052_v5, %v3051_v3  ;;  %v3022_v46 = vadd.f32 %v4323_v51, %v4321_v49  ;;  %v3047_v48 = vadd.f32 %v4335_v60, %v4331_v58  ;;  %v3056_v55 = vadd.f32 %v3055_v10, %v3054_v8  ;;  %v4479_v8 = vld [vmem:[#allocation3_spill] sm:$0xff]  ;;  %v4480_v10 = vld [vmem:[#allocation4_spill] sm:$0xff]  ;;  %v4486_v2 = vld [vmem:[#allocation5_spill] sm:$0xff] }
 0x16d   :  { %4473 = vst [vmem:[#allocation11_spill] sm:$0xff] %v4373_v28  ;;  %v2206_v30 = vadd.f32 %v3019_v33, %v2157_v43  ;;  %v3081_v57 = vadd.f32 %v4351_v9, %v4349_v6  ;;  %v3075_v49 = vadd.f32 %v4341_v0, %v4337_v61  ;;  %v3084_v58 = vadd.f32 %v4357_v13, %v4353_v11 }
 0x16e   :  { %v4375_v29 = vpop.f32.mrf.mxu0  ;;  %v4377_v12 = vpop.f32.mrf.mxu1  ;;  %v3109_v60 = vadd.f32 %v3108_v27, %v3107_v25  ;;  %v4487_v32 = vld [vmem:[#allocation7_spill] sm:$0xff] }
 0x16f   :  { %4474 = vst [vmem:[#allocation12_spill] sm:$0xff] %v4375_v29  ;;  %4475 = vst [vmem:[#allocation13_spill] sm:$0xff] %v4377_v12  ;;  %v2944_v29 = vadd.f32 %v2943_v40, %v2942_v38  ;;  %v2062_v38 = vadd.f32 %v2938_v19, %v4269_v7  ;;  %v2255_v3 = vadd.f32 %v3047_v48, %v2206_v30 }
 0x170   :  { %v3111_v16 = vpop.f32.mrf.mxu0  ;;  %v4381_v14 = vpop.f32.mrf.mxu1  ;;  %v4483_v61 = vld [vmem:[#allocation8_spill] sm:$0xff]  ;;  %v4489_v43 = vld [vmem:[#allocation9_spill] sm:$0xff] }
 0x171   :  { %4476 = vst [vmem:[#allocation14_spill] sm:$0xff] %v4381_v14  ;;  %v2021_v14 = vadd.f32 %v2916_v26, %v1972_v24  ;;  %v2111_v7 = vadd.f32 %v2966_v31, %v2062_v38  ;;  %v3103_v26 = vadd.f32 %v4480_v10, %v4479_v8 }
 0x172   :  { %v4388_v4 = vpop.f32.mrf.mxu1  ;;  %v4490_v33 = vld [vmem:[#allocation10_spill] sm:$0xff] }
 0x173   :  { %v2070_v23 = vadd.f32 %v2944_v29, %v2021_v14  ;;  %v2160_v54 = vadd.f32 %v2994_v39, %v2111_v7 }
 0x174   :  { %v4484_v11 = vld [vmem:[#allocation11_spill] sm:$0xff] }
 0x175   :  { %v2119_v14 = vadd.f32 %v2972_v34, %v2070_v23  ;;  %v2209_v59 = vadd.f32 %v3022_v46, %v2160_v54  ;;  %v2304_v23 = vadd.f32 %v3075_v49, %v2255_v3  ;;  %v4482_v34 = vld [vmem:[#allocation6_spill] sm:$0xff] }
 0x176   :  { %v4481_v9 = vld [vmem:[#allocation12_spill] sm:$0xff]  ;;  %v3106_v0 = vadd.f32 %v4483_v61, %v4482_v34  ;;  %v4485_v13 = vld [vmem:[#allocation13_spill] sm:$0xff] }
 0x177   :  { %v2168_v44 = vadd.f32 %v3000_v37, %v2119_v14  ;;  %v2258_v5 = vadd.f32 %v3050_v45, %v2209_v59  ;;  %v3137_v25 = vadd.f32 %v4485_v13, %v4484_v11  ;;  %v2353_v31 = vadd.f32 %v3103_v26, %v2304_v23 }
 0x179   :  { %v2307_v27 = vadd.f32 %v3078_v1, %v2258_v5 }
 0x17b   :  { %v2356_v7 = vadd.f32 %v3106_v0, %v2307_v27 }
 0x182   :  { %v4383_v17 = vpop.f32.mrf.mxu0 }
 0x183   :  { %4477 = vst [vmem:[#allocation15_spill] sm:$0xff] %v4383_v17  ;;  %v2067_v17 = vadd.f32 %v2941_v22, %v4281_v18 }
 0x184   :  { %v4390_v28 = vpop.f32.mrf.mxu0  ;;  %v4392_v12 = vpop.f32.mrf.mxu1 }
 0x185   :  { %v2116_v15 = vadd.f32 %v2969_v62, %v2067_v17  ;;  %v2217_v17 = vadd.f32 %v3028_v50, %v2168_v44  ;;  %v3112_v62 = vadd.f32 %v3111_v16, %v4481_v9  ;;  %v3134_v44 = vadd.f32 %v4490_v33, %v4489_v43 }
 0x186   :  { %v4396_v21 = vpop.f32.mrf.mxu0  ;;  %v4401_v20 = vpop.f32.mrf.mxu1 }
 0x187   :  { %v2165_v22 = vadd.f32 %v2997_v36, %v2116_v15  ;;  %v2266_v51 = vadd.f32 %v3056_v55, %v2217_v17  ;;  %v3131_v15 = vadd.f32 %v4487_v32, %v4486_v2 }
 0x188   :  { %v3161_v40 = vpop.f32.mrf.mxu0  ;;  %v4410_v18 = vpop.f32.mrf.mxu1 }
 0x189   :  { %v2214_v53 = vadd.f32 %v3025_v41, %v2165_v22  ;;  %v2315_v36 = vadd.f32 %v3084_v58, %v2266_v51  ;;  %v4488_v22 = vld [vmem:[#allocation14_spill] sm:$0xff]  ;;  %v2402_v48 = vadd.f32 %v3131_v15, %v2353_v31  ;;  %v3162_v30 = vadd.f32 %v3161_v40, %v4396_v21 }
 0x18a   :  { %v3163_v35 = vpop.f32.mrf.mxu0  ;;  %v3189_v42 = vpop.f32.mrf.mxu1  ;;  %v3140_v16 = vadd.f32 %v4388_v4, %v4488_v22  ;;  %v3187_v4 = vadd.f32 %v4401_v20, %v4392_v12 }
 0x18b   :  { %v2263_v24 = vadd.f32 %v3053_v52, %v2214_v53  ;;  %v2364_v14 = vadd.f32 %v3112_v62, %v2315_v36  ;;  %v4491_v52 = vld [vmem:[#allocation15_spill] sm:$0xff]  ;;  %v3190_v49 = vadd.f32 %v3189_v42, %v4410_v18 }
 0x18c   :  { %v3164_v47 = vpop.f32.mrf.mxu0  ;;  %v3191_v56 = vpop.f32.mrf.mxu1  ;;  %v3159_v54 = vadd.f32 %v4390_v28, %v4491_v52 }
 0x18d   :  { %v2312_v6 = vadd.f32 %v3081_v57, %v2263_v24  ;;  %v3165_v41 = vadd.f32 %v3164_v47, %v3163_v35  ;;  %v2413_v55 = vadd.f32 %v3140_v16, %v2364_v14  ;;  %v2405_v24 = vadd.f32 %v3134_v44, %v2356_v7 }
 0x18e   :  { %v3166_v29 = vpop.f32.mrf.mxu0  ;;  %v3192_v19 = vpop.f32.mrf.mxu1  ;;  %v2451_v57 = vadd.f32 %v3159_v54, %v2402_v48 }
 0x18f   :  { %v2361_v38 = vadd.f32 %v3109_v60, %v2312_v6  ;;  %v3193_v17 = vadd.f32 %v3192_v19, %v3191_v56  ;;  %v2454_v3 = vadd.f32 %v3162_v30, %v2405_v24 }
 0x190   :  { %v3167_v37 = vpop.f32.mrf.mxu0  ;;  %v3194_v39 = vpop.f32.mrf.mxu1  ;;  %v2500_v60 = vadd.f32 %v3187_v4, %v2451_v57 }
 0x191   :  { %v2410_v50 = vadd.f32 %v3137_v25, %v2361_v38  ;;  %v3168_v46 = vadd.f32 %v3167_v37, %v3166_v29  ;;  %v2503_v56 = vadd.f32 %v3190_v49, %v2454_v3 }
 0x192   :  { %v3195_v53 = vpop.f32.mrf.mxu1 }
 0x193   :  { %v2459_v45 = vadd.f32 %v3165_v41, %v2410_v50  ;;  %v2462_v35 = vadd.f32 %v3168_v46, %v2413_v55  ;;  %v3196_v47 = vadd.f32 %v3195_v53, %v3194_v39 }
 0x195   :  { %v2508_v28 = vadd.f32 %v3193_v17, %v2459_v45  ;;  %v2511_v5 = vadd.f32 %v3196_v47, %v2462_v35 }
 0x1a2   :  { %v3225_v59 = vpop.f32.mrf.mxu0 }
 0x1a3   :  { %v2557_v58 = vadd.f32 %v3225_v59, %v2508_v28 }
 0x1a4   :  { %v2548_v51 = vpop.f32.mrf.mxu0 }
 0x1a5   :  { %v2549_v21 = vadd.f32 %v2548_v51, %v2500_v60  ;;  %v2565_v8 = vmax.f32 %v2557_v58, 0.0 }
 0x1a6   :  { %v3226_v63 = vpop.f32.mrf.mxu0 }
 0x1a7   :  { %v2560_v40 = vadd.f32 %v3226_v63, %v2511_v5  ;;  %v2563_v12 = vmax.f32 %v2549_v21, 0.0 }
 0x1a8   :  { %v2551_v1 = vpop.f32.mrf.mxu0 }
 0x1a9   :  { %v2566_v10 = vmax.f32 %v2560_v40, 0.0  ;;  %v2552_v26 = vadd.f32 %v2551_v1, %v2503_v56 }
 0x1ab   :  { %v2858_v20 = vpack.c.bf16 %v2566_v10, %v2565_v8  ;;  %v2564_v29 = vmax.f32 %v2552_v26, 0.0 }
 0x1ad   :  { %2860 = vst [vmem:[%s4463_s3 + $0x8] sm:$0xff] %v2858_v20   ;;  %v2853_v18 = vpack.c.bf16 %v2564_v29, %v2563_v12 }
 0x1af   :  { %2854 = vst [vmem:[%s4463_s3] sm:$0xff] %v2853_v18  }

// kernel: cnn_forward.7
= control target key start
LH: loop header
LB: loop body
LE: loop exit
PB: predicated region body
PF: predicated region fallthrough
CT: control target
= control target key end

     0   :  { %vm1153_vm0 = vmmov 0   ;;  %vm859_vm1 = vcmask 80896   ;;  %s1426_s1 = inlined_call_operand.vmem [shape: bf16[1152,10], index: 1, kind: input, shape index: {}]   ;;  %s1427_s0 = inlined_call_operand.vmem [shape: bf16[16,1152], index: 0, kind: input, shape index: {}]   ;;  %s1428_s2 = inlined_call_operand.vmem [shape: f32[1,10], index: 2, kind: input, shape index: {}]   ;;  %s1429_s3 = inlined_call_operand.vmem [shape: f32[16,10], index: 3, kind: output, shape index: {}]  }
   0x1   :  { %v1067_v0 = vld [vmem:[%s1426_s1 + $0x78] sm:$0xff]   ;;  %v1071_v4 = vld [vmem:[%s1426_s1 + $0x70] sm:$0xff]   ;;  %v1075_v8 = vld [vmem:[%s1426_s1 + $0x68] sm:$0xff]  }
   0x2   :  { %v1068_v1 = vld [vmem:[%s1426_s1 + $0x38] sm:$0xff]   ;;  %948 = vmatprep.subr.bf16.mxu0 %v1067_v0  ;;  %v1072_v5 = vld [vmem:[%s1426_s1 + $0x30] sm:$0xff]   ;;  %v1076_v9 = vld [vmem:[%s1426_s1 + $0x28] sm:$0xff]  }
   0x3   :  { %v1069_v2 = vld [vmem:[%s1426_s1 + $0xf8] sm:$0xff]   ;;  %949 = vmatpush3.bf16.msra.mxu0 %v1068_v1  ;;  %v1073_v6 = vld [vmem:[%s1426_s1 + $0xf0] sm:$0xff]   ;;  %v1077_v10 = vld [vmem:[%s1426_s1 + $0xe8] sm:$0xff]  }
   0x4   :  { %v1070_v3 = vld [vmem:[%s1426_s1 + $0xb8] sm:$0xff]   ;;  %970 = vmatprep.subr.bf16.mxu1 %v1069_v2  ;;  %950 = vmatprep.subr.bf16.mxu0 %v1071_v4  ;;  %v1074_v7 = vld [vmem:[%s1426_s1 + $0xb0] sm:$0xff]   ;;  %v1078_v11 = vld [vmem:[%s1426_s1 + $0xa8] sm:$0xff]  }
   0x5   :  { %971 = vmatpush3.bf16.msra.mxu1 %v1070_v3  ;;  %v1079_v12 = vld [vmem:[%s1426_s1 + $0x60] sm:$0xff]   ;;  %v1083_v16 = vld [vmem:[%s1426_s1 + $0x58] sm:$0xff]   ;;  %v1087_v20 = vld [vmem:[%s1426_s1 + $0x50] sm:$0xff]  }
   0x6   :  { %972 = vmatprep.subr.bf16.mxu1 %v1073_v6  ;;  %v1080_v13 = vld [vmem:[%s1426_s1 + $0x20] sm:$0xff]   ;;  %v1084_v17 = vld [vmem:[%s1426_s1 + $0x18] sm:$0xff]   ;;  %v1088_v21 = vld [vmem:[%s1426_s1 + $0x10] sm:$0xff]   ;;  %v1152_v6 = vmov 0.0  }
   0x7   :  { %951 = vmatpush3.bf16.msra.mxu0 %v1072_v5  ;;  %v1081_v14 = vld [vmem:[%s1426_s1 + $0xe0] sm:$0xff]   ;;  %v1085_v18 = vld [vmem:[%s1426_s1 + $0xd8] sm:$0xff]   ;;  %v1089_v22 = vld [vmem:[%s1426_s1 + $0xd0] sm:$0xff]  }
   0x8   :  { %952 = vmatprep.subr.bf16.mxu0 %v1075_v8  ;;  %v1082_v15 = vld [vmem:[%s1426_s1 + $0xa0] sm:$0xff]   ;;  %v1086_v19 = vld [vmem:[%s1426_s1 + $0x98] sm:$0xff]   ;;  %v1090_v23 = vld [vmem:[%s1426_s1 + $0x90] sm:$0xff]  }
   0x9   :  { %973 = vmatpush3.bf16.msra.mxu1 %v1074_v7  ;;  %v1091_v24 = vld [vmem:[%s1426_s1 + $0x48] sm:$0xff]   ;;  %v1095_v28 = vld [vmem:[%s1426_s1 + $0x40] sm:$0xff]   ;;  %v1102_v34 = vld [vmem:[%s1426_s1 + $0x178] sm:$0xff]  }
   0xa   :  { %974 = vmatprep.subr.bf16.mxu1 %v1077_v10  ;;  %v1092_v25 = vld [vmem:[%s1426_s1 + $0x8] sm:$0xff]   ;;  %v1096_v29 = vld [vmem:[%s1426_s1] sm:$0xff]   ;;  %v1106_v37 = vld [vmem:[%s1426_s1 + $0x138] sm:$0xff]  }
   0xb   :  { %953 = vmatpush3.bf16.msra.mxu0 %v1076_v9  ;;  %v1093_v26 = vld [vmem:[%s1426_s1 + $0xc8] sm:$0xff]   ;;  %v1097_v30 = vld [vmem:[%s1426_s1 + $0xc0] sm:$0xff]   ;;  %v1107_v38 = vld [vmem:[%s1426_s1 + $0x1f8] sm:$0xff]  }
   0xc   :  { %954 = vmatprep.subr.bf16.mxu0 %v1079_v12  ;;  %v1094_v27 = vld [vmem:[%s1426_s1 + $0x88] sm:$0xff]   ;;  %v1098_v31 = vld [vmem:[%s1427_s0] ss:$36 sps:$4 sm:$0xff]   ;;  %v1108_v39 = vld [vmem:[%s1426_s1 + $0x1b8] sm:$0xff]  }
   0xd   :  { %975 = vmatpush3.bf16.msra.mxu1 %v1078_v11  ;;  %v1100_v32 = vld [vmem:[%s1427_s0 + $0x4] ss:$36 sps:$4 sm:$0xff]   ;;  %v1105_v36 = vld [vmem:[%s1427_s0 + $0xc] ss:$36 sps:$4 sm:$0xff]   ;;  %v1121_v52 = vld [vmem:[%s1426_s1 + $0x158] sm:$0xff]  }
   0xe   :  { %976 = vmatprep.subr.bf16.mxu1 %v1081_v14  ;;  %v1101_v33 = vld [vmem:[%s1426_s1 + $0x80] sm:$0xff]   ;;  %686 = vmatprep.mubr.bf16.mxu0 %v1100_v32  ;;  %v1103_v35 = vld [vmem:[%s1427_s0 + $0x8] ss:$36 sps:$4 sm:$0xff]   ;;  %v1109_v40 = vld [vmem:[%s1426_s1 + $0x170] sm:$0xff]  }
   0xf   :  { %955 = vmatpush3.bf16.msra.mxu0 %v1080_v13  ;;  %727 = vmatprep.mubr.bf16.mxu1 %v1105_v36  ;;  %v1110_v41 = vld [vmem:[%s1426_s1 + $0x130] sm:$0xff]   ;;  %v1113_v44 = vld [vmem:[%s1426_s1 + $0x168] sm:$0xff]   ;;  %v1117_v48 = vld [vmem:[%s1426_s1 + $0x160] sm:$0xff]  }
  0x10   :  { %956 = vmatprep.subr.bf16.mxu0 %v1083_v16  ;;  %v1111_v42 = vld [vmem:[%s1426_s1 + $0x1f0] sm:$0xff]   ;;  %v1114_v45 = vld [vmem:[%s1426_s1 + $0x128] sm:$0xff]   ;;  %v1118_v49 = vld [vmem:[%s1426_s1 + $0x120] sm:$0xff]  }
  0x11   :  { %977 = vmatpush3.bf16.msra.mxu1 %v1082_v15  ;;  %v1112_v43 = vld [vmem:[%s1426_s1 + $0x1b0] sm:$0xff]   ;;  %v1115_v46 = vld [vmem:[%s1426_s1 + $0x1e8] sm:$0xff]   ;;  %v1119_v50 = vld [vmem:[%s1426_s1 + $0x1e0] sm:$0xff]  }
  0x12   :  { %978 = vmatprep.subr.bf16.mxu1 %v1085_v18  ;;  %v1116_v47 = vld [vmem:[%s1426_s1 + $0x1a8] sm:$0xff]   ;;  %v1120_v51 = vld [vmem:[%s1426_s1 + $0x1a0] sm:$0xff]   ;;  %v1122_v53 = vld [vmem:[%s1426_s1 + $0x118] sm:$0xff]  }
  0x13   :  { %957 = vmatpush3.bf16.msra.mxu0 %v1084_v17  ;;  %v1123_v54 = vld [vmem:[%s1426_s1 + $0x1d8] sm:$0xff]   ;;  %v1125_v56 = vld [vmem:[%s1426_s1 + $0x150] sm:$0xff]   ;;  %v1129_v60 = vld [vmem:[%s1426_s1 + $0x148] sm:$0xff]  }
  0x14   :  { %958 = vmatprep.subr.bf16.mxu0 %v1087_v20  ;;  %v1124_v55 = vld [vmem:[%s1426_s1 + $0x198] sm:$0xff]   ;;  %v1126_v57 = vld [vmem:[%s1426_s1 + $0x110] sm:$0xff]   ;;  %v1130_v61 = vld [vmem:[%s1426_s1 + $0x108] sm:$0xff]  }
  0x15   :  { %979 = vmatpush3.bf16.msra.mxu1 %v1086_v19  ;;  %v1127_v58 = vld [vmem:[%s1426_s1 + $0x1d0] sm:$0xff]   ;;  %v1131_v62 = vld [vmem:[%s1426_s1 + $0x1c8] sm:$0xff]   ;;  %v1133_v0 = vld [vmem:[%s1426_s1 + $0x140] sm:$0xff]  }
  0x16   :  { %980 = vmatprep.subr.bf16.mxu1 %v1089_v22  ;;  %v1128_v59 = vld [vmem:[%s1426_s1 + $0x190] sm:$0xff]   ;;  %v1132_v63 = vld [vmem:[%s1426_s1 + $0x188] sm:$0xff]   ;;  %v1134_v1 = vld [vmem:[%s1426_s1 + $0x100] sm:$0xff]  }
  0x17   :  { %959 = vmatpush3.bf16.msra.mxu0 %v1088_v21  ;;  %v1135_v2 = vld [vmem:[%s1426_s1 + $0x1c0] sm:$0xff]   ;;  %v1136_v3 = vld [vmem:[%s1427_s0 + $0x10] ss:$36 sps:$4 sm:$0xff]   ;;  %v1140_v7 = vld [vmem:[%s1427_s0 + $0x18] ss:$36 sps:$4 sm:$0xff]  }
  0x18   :  { %960 = vmatprep.subr.bf16.mxu0 %v1091_v24  ;;  %v1138_v4 = vld [vmem:[%s1427_s0 + $0x14] ss:$36 sps:$4 sm:$0xff]   ;;  %v1139_v5 = vld [vmem:[%s1426_s1 + $0x180] sm:$0xff]   ;;  %v1145_v11 = vld [vmem:[%s1426_s1 + $0x228] sm:$0xff]  }
  0x19   :  { %981 = vmatpush3.bf16.msra.mxu1 %v1090_v23  ;;  %v1142_v8 = vld [vmem:[%s1427_s0 + $0x1c] ss:$36 sps:$4 sm:$0xff]   ;;  %v1144_v10 = vld [vmem:[%s1426_s1 + $0x230] sm:$0xff]   ;;  %v1149_v15 = vld [vmem:[%s1426_s1 + $0x208] sm:$0xff]  }
  0x1a   :  { %982 = vmatprep.subr.bf16.mxu1 %v1093_v26  ;;  %v1143_v9 = vld [vmem:[%s1426_s1 + $0x238] sm:$0xff]   ;;  %v1146_v12 = vld [vmem:[%s1426_s1 + $0x220] sm:$0xff]   ;;  %v1148_v14 = vld [vmem:[%s1426_s1 + $0x210] sm:$0xff]  }
  0x1b   :  { %961 = vmatpush3.bf16.msra.mxu0 %v1092_v25  ;;  %v1147_v13 = vld [vmem:[%s1426_s1 + $0x218] sm:$0xff]   ;;  %v1150_v16 = vld [vmem:[%s1426_s1 + $0x200] sm:$0xff]  }
  0x1c   :  { %962 = vmatprep.subr.bf16.mxu0 %v1095_v28  ;;  %v1151_v17 = vld [vmem:[%s1427_s0 + $0x20] ss:$36 sps:$4 sm:$0xff]  }
  0x1d   :  { %983 = vmatpush3.bf16.msra.mxu1 %v1094_v27 }
  0x1e   :  { %984 = vmatprep.subr.bf16.mxu1 %v1097_v30  ;;  %v866_v30 = vld [vmem:[%s1428_s2] ss:$0 sm:$0xff] }
  0x1f   :  { %963 = vmatpush3.bf16.msra.mxu0 %v1096_v29 }
  0x20   :  { %992 = vmatprep.subr.bf16.mxu0 %v1102_v34 }
  0x21   :  { %985 = vmatpush3.bf16.msra.mxu1 %v1101_v33 }
  0x22   :  { %687 = vmatmul.mubr.bf16.vlgmr.msra.gmra.mxu0 %v1098_v31  ;;  %1014 = vmatprep.subr.bf16.mxu1 %v1107_v38 }
  0x23   :  { %993 = vmatpush3.bf16.msra.mxu0 %v1106_v37  ;;  %768 = vmatprep.mubr.bf16.mxu0 %v1138_v4 }
  0x24   :  { %728 = vmatmul.mubr.bf16.vlgmr.msra.gmra.mxu1 %v1103_v35  ;;  %994 = vmatprep.subr.bf16.mxu0 %v1109_v40 }
  0x25   :  { %1015 = vmatpush3.bf16.msra.mxu1 %v1108_v39  ;;  %809 = vmatprep.mubr.bf16.mxu1 %v1142_v8 }
  0x26   :  { %1016 = vmatprep.subr.bf16.mxu1 %v1111_v42 }
  0x27   :  { %995 = vmatpush3.bf16.msra.mxu0 %v1110_v41 }
  0x28   :  { %996 = vmatprep.subr.bf16.mxu0 %v1113_v44 }
  0x29   :  { %1017 = vmatpush3.bf16.msra.mxu1 %v1112_v43 }
  0x2a   :  { %1018 = vmatprep.subr.bf16.mxu1 %v1115_v46 }
  0x2b   :  { %997 = vmatpush3.bf16.msra.mxu0 %v1114_v45 }
  0x2c   :  { %998 = vmatprep.subr.bf16.mxu0 %v1117_v48 }
  0x2d   :  { %1019 = vmatpush3.bf16.msra.mxu1 %v1116_v47 }
  0x2e   :  { %1020 = vmatprep.subr.bf16.mxu1 %v1119_v50 }
  0x2f   :  { %999 = vmatpush3.bf16.msra.mxu0 %v1118_v49 }
  0x30   :  { %1000 = vmatprep.subr.bf16.mxu0 %v1121_v52 }
  0x31   :  { %1021 = vmatpush3.bf16.msra.mxu1 %v1120_v51 }
  0x32   :  { %1022 = vmatprep.subr.bf16.mxu1 %v1123_v54 }
  0x33   :  { %1001 = vmatpush3.bf16.msra.mxu0 %v1122_v53 }
  0x34   :  { %1002 = vmatprep.subr.bf16.mxu0 %v1125_v56 }
  0x35   :  { %1023 = vmatpush3.bf16.msra.mxu1 %v1124_v55 }
  0x36   :  { %1024 = vmatprep.subr.bf16.mxu1 %v1127_v58 }
  0x37   :  { %1003 = vmatpush3.bf16.msra.mxu0 %v1126_v57 }
  0x38   :  { %1004 = vmatprep.subr.bf16.mxu0 %v1129_v60 }
  0x39   :  { %1025 = vmatpush3.bf16.msra.mxu1 %v1128_v59 }
  0x3a   :  { %1026 = vmatprep.subr.bf16.mxu1 %v1131_v62 }
  0x3b   :  { %1005 = vmatpush3.bf16.msra.mxu0 %v1130_v61 }
  0x3c   :  { %1006 = vmatprep.subr.bf16.mxu0 %v1133_v0 }
  0x3d   :  { %1027 = vmatpush3.bf16.msra.mxu1 %v1132_v63 }
  0x3e   :  { %1028 = vmatprep.subr.bf16.mxu1 %v1135_v2 }
  0x3f   :  { %1007 = vmatpush3.bf16.msra.mxu0 %v1134_v1 }
  0x40   :  { %1045 = vmatprep.subr.bf16.mxu0 %v1152_v6 }
  0x41   :  { %1029 = vmatpush3.bf16.msra.mxu1 %v1139_v5 }
  0x42   :  { %769 = vmatmul.mubr.bf16.vlgmr.msra.gmra.mxu0 %v1136_v3 }
  0x43   :  { %1061 = vmatprep.mubr.msk.bf16.mxu0 %vm1153_vm0, %v1152_v6  ;;  %1046 = vmatpush3.bf16.msra.mxu0 %v1143_v9 }
  0x44   :  { %810 = vmatmul.mubr.bf16.vlgmr.msra.gmra.mxu1 %v1140_v7  ;;  %1047 = vmatprep.subr.bf16.mxu0 %v1152_v6 }
  0x47   :  { %1048 = vmatpush3.bf16.msra.mxu0 %v1144_v10 }
  0x48   :  { %1049 = vmatprep.subr.bf16.mxu0 %v1152_v6 }
  0x4b   :  { %1050 = vmatpush3.bf16.msra.mxu0 %v1145_v11 }
  0x4c   :  { %1051 = vmatprep.subr.bf16.mxu0 %v1152_v6 }
  0x4f   :  { %1052 = vmatpush3.bf16.msra.mxu0 %v1146_v12 }
  0x50   :  { %1053 = vmatprep.subr.bf16.mxu0 %v1152_v6 }
  0x53   :  { %1054 = vmatpush3.bf16.msra.mxu0 %v1147_v13 }
  0x54   :  { %1055 = vmatprep.subr.bf16.mxu0 %v1152_v6 }
  0x57   :  { %1056 = vmatpush3.bf16.msra.mxu0 %v1148_v14 }
  0x58   :  { %1057 = vmatprep.subr.bf16.mxu0 %v1152_v6 }
  0x5b   :  { %1058 = vmatpush3.bf16.msra.mxu0 %v1149_v15 }
  0x5c   :  { %1059 = vmatprep.subr.bf16.mxu0 %v1152_v6 }
  0x5f   :  { %1060 = vmatpush3.bf16.msra.mxu0 %v1150_v16 }
  0x62   :  { %1062 = vmatmul.mubr.bf16.vlgmr.msra.gmra.mxu0 %v1151_v17 }
  0xe2   :  { %v964_v18 = vpop.f32.mrf.mxu0 }
  0xe4   :  { %v965_v19 = vpop.f32.mrf.mxu0  ;;  %v986_v20 = vpop.f32.mrf.mxu1 }
  0xe5   :  { %v966_v29 = vadd.f32 %v965_v19, %v964_v18 }
  0xe6   :  { %v967_v21 = vpop.f32.mrf.mxu0  ;;  %v987_v22 = vpop.f32.mrf.mxu1 }
  0xe7   :  { %v689_v33 = vadd.f32 %v966_v29, %v866_v30  ;;  %v988_v34 = vadd.f32 %v987_v22, %v986_v20 }
  0xe8   :  { %v968_v23 = vpop.f32.mrf.mxu0  ;;  %v989_v24 = vpop.f32.mrf.mxu1 }
  0xe9   :  { %v969_v35 = vadd.f32 %v968_v23, %v967_v21  ;;  %v730_v39 = vadd.f32 %v988_v34, %v689_v33 }
  0xea   :  { %v990_v26 = vpop.f32.mrf.mxu1 }
  0xeb   :  { %v692_v40 = vadd.f32 %v969_v35, %v866_v30  ;;  %v991_v41 = vadd.f32 %v990_v26, %v989_v24 }
  0xed   :  { %v733_v46 = vadd.f32 %v991_v41, %v692_v40 }
 0x102   :  { %v1008_v25 = vpop.f32.mrf.mxu0 }
 0x104   :  { %v1009_v27 = vpop.f32.mrf.mxu0  ;;  %v1030_v28 = vpop.f32.mrf.mxu1 }
 0x105   :  { %v1010_v36 = vadd.f32 %v1009_v27, %v1008_v25 }
 0x106   :  { %v1011_v31 = vpop.f32.mrf.mxu0  ;;  %v1031_v32 = vpop.f32.mrf.mxu1 }
 0x107   :  { %v771_v42 = vadd.f32 %v1010_v36, %v730_v39  ;;  %v1032_v43 = vadd.f32 %v1031_v32, %v1030_v28 }
 0x108   :  { %v1012_v37 = vpop.f32.mrf.mxu0  ;;  %v1033_v38 = vpop.f32.mrf.mxu1 }
 0x109   :  { %v1013_v44 = vadd.f32 %v1012_v37, %v1011_v31  ;;  %v812_v49 = vadd.f32 %v1032_v43, %v771_v42 }
 0x10a   :  { %v1034_v45 = vpop.f32.mrf.mxu1 }
 0x10b   :  { %v774_v47 = vadd.f32 %v1013_v44, %v733_v46  ;;  %v1035_v48 = vadd.f32 %v1034_v45, %v1033_v38 }
 0x10d   :  { %v815_v53 = vadd.f32 %v1035_v48, %v774_v47 }
 0x122   :  { %v852_v50 = vpop.f32.mrf.mxu0 }
 0x123   :  { %v853_v51 = vadd.f32 %v852_v50, %v812_v49 }
 0x124   :  { %v1063_v52 = vpop.f32.mrf.mxu0 }
 0x125   :  { %860 = vst.msk [vmem:[%s1429_s3] sm:$0xff] %vm859_vm1, %v853_v51 }
 0x126   :  { %v855_v54 = vpop.f32.mrf.mxu0 }
 0x127   :  { %v856_v55 = vadd.f32 %v855_v54, %v815_v53 }
 0x128   :  { %v1064_v56 = vpop.f32.mrf.mxu0 }
 0x129   :  { %861 = vst.msk [vmem:[%s1429_s3 + $0x8] sm:$0xff] %vm859_vm1, %v856_v55 }

</bundles_post_ra>
